<compile_context>
chip_gen: v7x
topology: tpu7x:2x2x1
jax: 0.10.0
libtpu: 0.0.40
codegen_flags: <defaults>
</compile_context>

<pallas_src>
import jax
import jax.numpy as jnp
from jax.experimental import pallas as pl
from jax.experimental.pallas import tpu as pltpu

IN_FEATURES = 7 * 7 * 352      # 17248
HIDDEN = 128
OUT_FEATURES = 1024
_MAX_FULL_BATCH = 128          # above this, tile the batch (M) axis


def _fc_kernel(x_ref, w1_ref, b1_ref, w2_ref, b2_ref, fc1_ref, fc2_ref):
    # x arrives as f32; cast to bf16 in-kernel (free VPU work hidden under the
    # dominant W1 DMA) -> bf16 x bf16 MXU matmul with f32 accumulate.
    x = x_ref[...].astype(jnp.bfloat16)
    h1 = jnp.dot(x, w1_ref[...], preferred_element_type=jnp.float32)
    h1 = jnp.maximum(h1 + b1_ref[...], 0.0)
    fc1_ref[...] = h1.astype(fc1_ref.dtype)
    # Linear2: explicit bf16 operands (single-pass MXU), f32 accumulate,
    # bias + ReLU fused.
    h2 = jnp.dot(h1.astype(jnp.bfloat16), w2_ref[...],
                 preferred_element_type=jnp.float32)
    fc2_ref[...] = jnp.maximum(h2 + b2_ref[...], 0.0).astype(fc2_ref.dtype)


@jax.jit
def fully_connected_forward(x, w1_bf16, b1, w2_bf16, b2):
    """x: (B, 352, 7, 7) f32.  w1_bf16: (17248, 128) bf16, w2_bf16: (128, 1024)
    bf16 (both pre-converted once, outside this jitted function).
    Returns (fc1 (B,128), fc2 (B,1024)) in f32, matching torch:
    relu(linear_2(relu(linear_1(x.view(B, -1)))))."""
    B = x.shape[0]
    x_flat = x.reshape(B, -1)                      # f32; row-major == torch .view
    b1_2d = b1.reshape(1, HIDDEN).astype(jnp.float32)
    b2_2d = b2.reshape(1, OUT_FEATURES).astype(jnp.float32)

    # Batch tiling: one full block at small B (no K grid, no padding); at large
    # B stream x/fc1/fc2 in TILE_M slabs while W1/W2 stay VMEM-resident.
    if B <= _MAX_FULL_BATCH:
        tile_m, bp = B, B
    else:
        tile_m = _MAX_FULL_BATCH
        bp = ((B + tile_m - 1) // tile_m) * tile_m
    if bp != B:
        x_flat = jnp.pad(x_flat, ((0, bp - B), (0, 0)))

    cost = pl.CostEstimate(
        flops=2 * bp * (IN_FEATURES * HIDDEN + HIDDEN * OUT_FEATURES),
        transcendentals=0,
        bytes_accessed=(bp * IN_FEATURES * 4            # x (f32)
                        + IN_FEATURES * HIDDEN * 2      # W1 (bf16)
                        + HIDDEN * OUT_FEATURES * 2     # W2 (bf16)
                        + (HIDDEN + OUT_FEATURES) * 4   # biases
                        + bp * (HIDDEN + OUT_FEATURES) * 4))  # outputs

    fc1, fc2 = pl.pallas_call(
        _fc_kernel,
        out_shape=(jax.ShapeDtypeStruct((bp, HIDDEN), jnp.float32),
                   jax.ShapeDtypeStruct((bp, OUT_FEATURES), jnp.float32)),
        grid=(bp // tile_m,),
        in_specs=[
            pl.BlockSpec((tile_m, IN_FEATURES), lambda i: (i, 0)),    # x  (f32)
            pl.BlockSpec((IN_FEATURES, HIDDEN), lambda i: (0, 0)),    # W1 (bf16)
            pl.BlockSpec((1, HIDDEN), lambda i: (0, 0)),              # b1
            pl.BlockSpec((HIDDEN, OUT_FEATURES), lambda i: (0, 0)),   # W2 (bf16)
            pl.BlockSpec((1, OUT_FEATURES), lambda i: (0, 0)),        # b2
        ],
        out_specs=(
            pl.BlockSpec((tile_m, HIDDEN), lambda i: (i, 0)),         # fc1
            pl.BlockSpec((tile_m, OUT_FEATURES), lambda i: (i, 0)),   # fc2
        ),
        compiler_params=pltpu.CompilerParams(
            dimension_semantics=("parallel",),
            vmem_limit_bytes=32 * 1024 * 1024),
        cost_estimate=cost,
    )(x_flat, w1_bf16, b1_2d, w2_bf16, b2_2d)

    if bp != B:
        fc1 = fc1[:B]
        fc2 = fc2[:B]
    return fc1, fc2


def _init_params(key):
    """Deterministic init matching nn.Linear default (U(-1/sqrt(fan_in), ..)).
    Weights stored transposed relative to torch (in_features, out_features) so
    the kernel computes x @ W directly."""
    k1, k2, k3, k4 = jax.random.split(key, 4)
    bound1 = 1.0 / jnp.sqrt(IN_FEATURES)
    bound2 = 1.0 / jnp.sqrt(HIDDEN)
    w1 = jax.random.uniform(k1, (IN_FEATURES, HIDDEN), jnp.float32,
                            -bound1, bound1)
    b1 = jax.random.uniform(k2, (HIDDEN,), jnp.float32, -bound1, bound1)
    w2 = jax.random.uniform(k3, (HIDDEN, OUT_FEATURES), jnp.float32,
                            -bound2, bound2)
    b2 = jax.random.uniform(k4, (OUT_FEATURES,), jnp.float32, -bound2, bound2)
    return w1, b1, w2, b2


if __name__ == "__main__":
    key = jax.random.PRNGKey(0)
    kx, kp = jax.random.split(key)

    B = 2
    x = jax.random.normal(kx, (B, 352, 7, 7), jnp.float32)   # NCHW, as in torch
    w1, b1, w2, b2 = _init_params(kp)

    # One-time (outside the jitted hot path) dtype prep of the weights.
    w1_bf16 = w1.astype(jnp.bfloat16)
    w2_bf16 = w2.astype(jnp.bfloat16)
    w1_bf16, w2_bf16, b1, b2 = jax.block_until_ready((w1_bf16, w2_bf16, b1, b2))

    fc1, fc2 = fully_connected_forward(x, w1_bf16, b1, w2_bf16, b2)
    jax.block_until_ready((fc1, fc2))
    assert fc1.shape == (B, HIDDEN) and fc2.shape == (B, OUT_FEATURES)

    x_flat = x.reshape(B, -1)

    # Matched-precision reference (bf16 GEMMs, f32 accumulate).
    ref1 = jnp.maximum(
        jnp.dot(x_flat.astype(jnp.bfloat16), w1_bf16,
                preferred_element_type=jnp.float32) + b1, 0.0)
    ref2 = jnp.maximum(
        jnp.dot(ref1.astype(jnp.bfloat16), w2_bf16,
                preferred_element_type=jnp.float32) + b2, 0.0)
    assert jnp.allclose(fc1, ref1, atol=1e-2, rtol=1e-2)
    assert jnp.allclose(fc2, ref2, atol=1e-2, rtol=1e-2)

    # Sanity vs pure-f32 math (loose tolerance: x/W1/W2 are bf16 in the kernel).
    ref1_f32 = jnp.maximum(x_flat @ w1 + b1, 0.0)
    ref2_f32 = jnp.maximum(ref1_f32 @ w2 + b2, 0.0)
    assert jnp.allclose(fc1, ref1_f32, atol=5e-2, rtol=5e-2)
    assert jnp.allclose(fc2, ref2_f32, atol=5e-2, rtol=5e-2)

    print("KERNEL_OK")
</pallas_src>

<mosaic_0001>
module attributes {stable_mosaic.version = 11 : i64} {
  func.func @_fc_kernel(%arg0: i32, %arg1: memref<2x17248xf32, #tpu.memory_space<vmem>>, %arg2: memref<17248x128xbf16, #tpu.memory_space<vmem>>, %arg3: memref<1x128xf32, #tpu.memory_space<vmem>>, %arg4: memref<128x1024xbf16, #tpu.memory_space<vmem>>, %arg5: memref<1x1024xf32, #tpu.memory_space<vmem>>, %arg6: memref<2x128xf32, #tpu.memory_space<vmem>>, %arg7: memref<2x1024xf32, #tpu.memory_space<vmem>>) attributes {dimension_semantics = [#tpu.dimension_semantics<parallel>], iteration_bounds = array<i64: 1>, scalar_prefetch = 0 : i64, scratch_operands = 0 : i64, tpu.core_type = #tpu.core_type<tc>, window_params = [{transform_indices = @transform_0, window_bounds = array<i64: 2, 17248>}, {pipeline_mode = #tpu.pipeline_mode<synchronous>, transform_indices = @transform_1, window_bounds = array<i64: 17248, 128>}, {pipeline_mode = #tpu.pipeline_mode<synchronous>, transform_indices = @transform_2, window_bounds = array<i64: 1, 128>}, {pipeline_mode = #tpu.pipeline_mode<synchronous>, transform_indices = @transform_3, window_bounds = array<i64: 128, 1024>}, {pipeline_mode = #tpu.pipeline_mode<synchronous>, transform_indices = @transform_4, window_bounds = array<i64: 1, 1024>}, {transform_indices = @transform_5, window_bounds = array<i64: 2, 128>}, {transform_indices = @transform_6, window_bounds = array<i64: 2, 1024>}]} {
    %c0 = arith.constant 0 : index
    %c0_0 = arith.constant 0 : index
    %0 = vector.load %arg1[%c0, %c0_0] : memref<2x17248xf32, #tpu.memory_space<vmem>>, vector<2x17248xf32>
    %1 = arith.truncf %0 : vector<2x17248xf32> to vector<2x17248xbf16>
    %c0_1 = arith.constant 0 : index
    %c0_2 = arith.constant 0 : index
    %2 = vector.load %arg2[%c0_1, %c0_2] : memref<17248x128xbf16, #tpu.memory_space<vmem>>, vector<17248x128xbf16>
    %cst = arith.constant dense<0.000000e+00> : vector<2x128xf32>
    %3 = tpu.matmul %1, %2, %cst {dimension_numbers = #tpu.dot_dimension_numbers<[1], [0], [0], [1], [0, 0, 1, 1], [], []>} : vector<2x17248xbf16>, vector<17248x128xbf16>, vector<2x128xf32> -> vector<2x128xf32>
    %c0_3 = arith.constant 0 : index
    %c0_4 = arith.constant 0 : index
    %4 = vector.load %arg3[%c0_3, %c0_4] : memref<1x128xf32, #tpu.memory_space<vmem>>, vector<1x128xf32>
    %5 = vector.broadcast %4 : vector<1x128xf32> to vector<2x128xf32>
    %6 = arith.addf %3, %5 : vector<2x128xf32>
    %cst_5 = arith.constant 0.000000e+00 : f32
    %7 = vector.broadcast %cst_5 : f32 to vector<2x128xf32>
    %8 = arith.maximumf %6, %7 : vector<2x128xf32>
    %c0_6 = arith.constant 0 : index
    %c0_7 = arith.constant 0 : index
    %9 = vector.load %arg6[%c0_6, %c0_7] : memref<2x128xf32, #tpu.memory_space<vmem>>, vector<2x128xf32>
    tpu.vector_store %arg6[%c0_6, %c0_7], %8 {strides = array<i32>} : memref<2x128xf32, #tpu.memory_space<vmem>>, vector<2x128xf32>,
    %10 = arith.truncf %8 : vector<2x128xf32> to vector<2x128xbf16>
    %c0_8 = arith.constant 0 : index
    %c0_9 = arith.constant 0 : index
    %11 = vector.load %arg4[%c0_8, %c0_9] : memref<128x1024xbf16, #tpu.memory_space<vmem>>, vector<128x1024xbf16>
    %cst_10 = arith.constant dense<0.000000e+00> : vector<2x1024xf32>
    %12 = tpu.matmul %10, %11, %cst_10 {dimension_numbers = #tpu.dot_dimension_numbers<[1], [0], [0], [1], [0, 0, 1, 1], [], []>} : vector<2x128xbf16>, vector<128x1024xbf16>, vector<2x1024xf32> -> vector<2x1024xf32>
    %c0_11 = arith.constant 0 : index
    %c0_12 = arith.constant 0 : index
    %13 = vector.load %arg5[%c0_11, %c0_12] : memref<1x1024xf32, #tpu.memory_space<vmem>>, vector<1x1024xf32>
    %14 = vector.broadcast %13 : vector<1x1024xf32> to vector<2x1024xf32>
    %15 = arith.addf %12, %14 : vector<2x1024xf32>
    %cst_13 = arith.constant 0.000000e+00 : f32
    %16 = vector.broadcast %cst_13 : f32 to vector<2x1024xf32>
    %17 = arith.maximumf %15, %16 : vector<2x1024xf32>
    %c0_14 = arith.constant 0 : index
    %c0_15 = arith.constant 0 : index
    %18 = vector.load %arg7[%c0_14, %c0_15] : memref<2x1024xf32, #tpu.memory_space<vmem>>, vector<2x1024xf32>
    tpu.vector_store %arg7[%c0_14, %c0_15], %17 {strides = array<i32>} : memref<2x1024xf32, #tpu.memory_space<vmem>>, vector<2x1024xf32>,
    return
  }
  func.func @transform_0(%arg0: i32) -> (i32, i32) {
    %c0_i32 = arith.constant 0 : i32
    %c0_i32_0 = arith.constant 0 : i32
    return %arg0, %c0_i32 : i32, i32
  }
  func.func @transform_1(%arg0: i32) -> (i32, i32) {
    %c0_i32 = arith.constant 0 : i32
    %c0_i32_0 = arith.constant 0 : i32
    %c0_i32_1 = arith.constant 0 : i32
    return %c0_i32, %c0_i32_0 : i32, i32
  }
  func.func @transform_2(%arg0: i32) -> (i32, i32) {
    %c0_i32 = arith.constant 0 : i32
    %c0_i32_0 = arith.constant 0 : i32
    %c0_i32_1 = arith.constant 0 : i32
    return %c0_i32, %c0_i32_0 : i32, i32
  }
  func.func @transform_3(%arg0: i32) -> (i32, i32) {
    %c0_i32 = arith.constant 0 : i32
    %c0_i32_0 = arith.constant 0 : i32
    %c0_i32_1 = arith.constant 0 : i32
    return %c0_i32, %c0_i32_0 : i32, i32
  }
  func.func @transform_4(%arg0: i32) -> (i32, i32) {
    %c0_i32 = arith.constant 0 : i32
    %c0_i32_0 = arith.constant 0 : i32
    %c0_i32_1 = arith.constant 0 : i32
    return %c0_i32, %c0_i32_0 : i32, i32
  }
  func.func @transform_5(%arg0: i32) -> (i32, i32) {
    %c0_i32 = arith.constant 0 : i32
    %c0_i32_0 = arith.constant 0 : i32
    return %arg0, %c0_i32 : i32, i32
  }
  func.func @transform_6(%arg0: i32) -> (i32, i32) {
    %c0_i32 = arith.constant 0 : i32
    %c0_i32_0 = arith.constant 0 : i32
    return %arg0, %c0_i32 : i32, i32
  }
}

</mosaic_0001>

<bundles_post_ra>
// kernel: fully_connected_forward.1
= control target key start
LH: loop header
LB: loop body
LE: loop exit
PB: predicated region body
PF: predicated region fallthrough
CT: control target
= control target key end

     0   :  { %12 = vsyncpa [#allocation3], 0  ;;  %v97_v27 = vlaneseq  ;;  %v16777_v35 = vmov 1983009808   ;;  %vm16779_vm0 = vmmov 0   ;;  %s20574_s0 = inlined_call_operand.vmem [shape: f32[2,17248], index: 0, kind: input, shape index: {}]   ;;  %s20575_s1 = inlined_call_operand.vmem [shape: bf16[17248,128], index: 1, kind: input, shape index: {}]   ;;  %s20576_s2 = inlined_call_operand.vmem [shape: f32[1,128], index: 2, kind: input, shape index: {}]   ;;  %s20577_s3 = inlined_call_operand.vmem [shape: bf16[128,1024], index: 3, kind: input, shape index: {}]   ;;  %s20578_s4 = inlined_call_operand.vmem [shape: f32[1,1024], index: 4, kind: input, shape index: {}]   ;;  %s20579_s5 = inlined_call_operand.hbm [shape: f32[2,128], index: 5, kind: output, shape index: {0}]   ;;  %s20580_s6 = inlined_call_operand.hbm [shape: f32[2,1024], index: 6, kind: output, shape index: {1}]  }
   0x1   :  { %v15617_v0 = vld [vmem:[%s20575_s1 + $0x40] sm:$0xff]   ;;  %v15621_v4 = vld [vmem:[%s20575_s1 + $0x48] sm:$0xff]   ;;  %v15625_v8 = vld [vmem:[%s20575_s1 + $0x50] sm:$0xff]   ;;  %v95_v36 = vunpack.c.l.s4 %v16777_v35 }
   0x2   :  { %v15618_v1 = vld [vmem:[%s20575_s1] sm:$0xff]   ;;  %14114 = vmatprep.subr.bf16.mxu0 %v15617_v0  ;;  %v15622_v5 = vld [vmem:[%s20575_s1 + $0x8] sm:$0xff]   ;;  %v15626_v9 = vld [vmem:[%s20575_s1 + $0x10] sm:$0xff]   ;;  %v16911_v32 = vshrl.u32 %v97_v27, 7 }
   0x3   :  { %v15619_v2 = vld [vmem:[%s20575_s1 + $0xc0] sm:$0xff]   ;;  %14115 = vmatpush3.bf16.msra.mxu0 %v15618_v1  ;;  %v15623_v6 = vld [vmem:[%s20575_s1 + $0xc8] sm:$0xff]   ;;  %v15627_v10 = vld [vmem:[%s20575_s1 + $0xd0] sm:$0xff]   ;;  %v96_v38 = vunpack.c.0.s8 %v95_v36 }
   0x4   :  { %v15620_v3 = vld [vmem:[%s20575_s1 + $0x80] sm:$0xff]   ;;  %14136 = vmatprep.subr.bf16.mxu1 %v15619_v2  ;;  %14116 = vmatprep.subr.bf16.mxu0 %v15621_v4  ;;  %v15624_v7 = vld [vmem:[%s20575_s1 + $0x88] sm:$0xff]   ;;  %v15628_v11 = vld [vmem:[%s20575_s1 + $0x90] sm:$0xff]  }
   0x5   :  { %14137 = vmatpush3.bf16.msra.mxu1 %v15620_v3  ;;  %v15629_v12 = vld [vmem:[%s20575_s1 + $0x58] sm:$0xff]   ;;  %v15633_v16 = vld [vmem:[%s20575_s1 + $0x60] sm:$0xff]   ;;  %v15637_v20 = vld [vmem:[%s20575_s1 + $0x68] sm:$0xff]   ;;  %v16926_v41 = vsub.s32 %v96_v38, %v16911_v32 }
   0x6   :  { %14138 = vmatprep.subr.bf16.mxu1 %v15623_v6  ;;  %v15630_v13 = vld [vmem:[%s20575_s1 + $0x18] sm:$0xff]   ;;  %v15634_v17 = vld [vmem:[%s20575_s1 + $0x20] sm:$0xff]   ;;  %v15638_v21 = vld [vmem:[%s20575_s1 + $0x28] sm:$0xff]  }
   0x7   :  { %14117 = vmatpush3.bf16.msra.mxu0 %v15622_v5  ;;  %v15631_v14 = vld [vmem:[%s20575_s1 + $0xd8] sm:$0xff]   ;;  %v15635_v18 = vld [vmem:[%s20575_s1 + $0xe0] sm:$0xff]   ;;  %v15639_v22 = vld [vmem:[%s20575_s1 + $0xe8] sm:$0xff]  }
   0x8   :  { %14118 = vmatprep.subr.bf16.mxu0 %v15625_v8  ;;  %v15632_v15 = vld [vmem:[%s20575_s1 + $0x98] sm:$0xff]   ;;  %v15636_v19 = vld [vmem:[%s20575_s1 + $0xa0] sm:$0xff]   ;;  %v15640_v23 = vld [vmem:[%s20575_s1 + $0xa8] sm:$0xff]  }
   0x9   :  { %14139 = vmatpush3.bf16.msra.mxu1 %v15624_v7  ;;  %v15641_v24 = vld [vmem:[%s20575_s1 + $0x70] sm:$0xff]   ;;  %v15645_v29 = vld [vmem:[%s20575_s1 + $0x78] sm:$0xff]   ;;  %v25_v33 = vld [vmem:[%s20574_s0] sm:$0xff] }
   0xa   :  { %14140 = vmatprep.subr.bf16.mxu1 %v15627_v10  ;;  %v15642_v25 = vld [vmem:[%s20575_s1 + $0x30] sm:$0xff]   ;;  %v15646_v30 = vld [vmem:[%s20575_s1 + $0x38] sm:$0xff]   ;;  %v15649_v37 = vld [vmem:[%s20575_s1 + $0x140] sm:$0xff]   ;;  %v93_v39 = vcombine.high %v25_v33, %v25_v33  ;;  %v100_v42 = vrot.slane %v25_v33, %v16926_v41 }
   0xb   :  { %14119 = vmatpush3.bf16.msra.mxu0 %v15626_v9  ;;  %v15643_v26 = vld [vmem:[%s20575_s1 + $0xf0] sm:$0xff]   ;;  %v15647_v31 = vld [vmem:[%s20575_s1 + $0xf8] sm:$0xff]   ;;  %v15652_v40 = vld [vmem:[%s20575_s1 + $0x1c0] sm:$0xff]  }
   0xc   :  { %14120 = vmatprep.subr.bf16.mxu0 %v15629_v12  ;;  %v15644_v28 = vld [vmem:[%s20575_s1 + $0xb0] sm:$0xff]   ;;  %v15648_v34 = vld [vmem:[%s20575_s1 + $0xb8] sm:$0xff]   ;;  %v107_v43 = vrot.slane %v93_v39, %v16926_v41  ;;  %v108_v44 = vcombine.high %v100_v42, %v100_v42  ;;  %v15651_v46 = vld [vmem:[%s20575_s1 + $0x100] sm:$0xff]   ;;  %v805_v47 = vpack.c.bf16 %v100_v42, %v100_v42 }
   0xd   :  { %14141 = vmatpush3.bf16.msra.mxu1 %v15628_v11  ;;  %v15653_v49 = vld [vmem:[%s20575_s1 + $0x180] sm:$0xff]   ;;  %v15654_v52 = vld [vmem:[%s20575_s1 + $0x148] sm:$0xff]   ;;  %v15658_v56 = vld [vmem:[%s20575_s1 + $0x150] sm:$0xff]  }
   0xe   :  { %14142 = vmatprep.subr.bf16.mxu1 %v15631_v14  ;;  %v109_v45 = vcombine.high %v107_v43, %v107_v43  ;;  %v807_v48 = vpack.c.bf16 %v107_v43, %v107_v43  ;;  %v806_v50 = vpack.c.bf16 %v108_v44, %v108_v44  ;;  %v15656_v53 = vld [vmem:[%s20575_s1 + $0x1c8] sm:$0xff]   ;;  %v15660_v57 = vld [vmem:[%s20575_s1 + $0x1d0] sm:$0xff]   ;;  %v15662_v60 = vld [vmem:[%s20575_s1 + $0x158] sm:$0xff]  }
   0xf   :  { %14121 = vmatpush3.bf16.msra.mxu0 %v15630_v13  ;;  %v15655_v54 = vld [vmem:[%s20575_s1 + $0x108] sm:$0xff]   ;;  %v15659_v58 = vld [vmem:[%s20575_s1 + $0x110] sm:$0xff]   ;;  %v15664_v61 = vld [vmem:[%s20575_s1 + $0x1d8] sm:$0xff]  }
  0x10   :  { %14122 = vmatprep.subr.bf16.mxu0 %v15633_v16  ;;  %v808_v51 = vpack.c.bf16 %v109_v45, %v109_v45  ;;  %9607 = vmatprep.mubr.bf16.mxu0 %v806_v50  ;;  %v15657_v55 = vld [vmem:[%s20575_s1 + $0x188] sm:$0xff]   ;;  %v15661_v59 = vld [vmem:[%s20575_s1 + $0x190] sm:$0xff]   ;;  %v15663_v62 = vld [vmem:[%s20575_s1 + $0x118] sm:$0xff]  }
  0x11   :  { %14143 = vmatpush3.bf16.msra.mxu1 %v15632_v15  ;;  %v15665_v63 = vld [vmem:[%s20575_s1 + $0x198] sm:$0xff]   ;;  %v15666_v0 = vld [vmem:[%s20575_s1 + $0x160] sm:$0xff]   ;;  %v15670_v4 = vld [vmem:[%s20575_s1 + $0x168] sm:$0xff]  }
  0x12   :  { %14144 = vmatprep.subr.bf16.mxu1 %v15635_v18  ;;  %9647 = vmatprep.mubr.bf16.mxu1 %v808_v51  ;;  %v15668_v1 = vld [vmem:[%s20575_s1 + $0x1e0] sm:$0xff]   ;;  %v15672_v5 = vld [vmem:[%s20575_s1 + $0x1e8] sm:$0xff]   ;;  %v15674_v8 = vld [vmem:[%s20575_s1 + $0x170] sm:$0xff]  }
  0x13   :  { %14123 = vmatpush3.bf16.msra.mxu0 %v15634_v17  ;;  %v15667_v2 = vld [vmem:[%s20575_s1 + $0x120] sm:$0xff]   ;;  %v15671_v6 = vld [vmem:[%s20575_s1 + $0x128] sm:$0xff]   ;;  %v15676_v9 = vld [vmem:[%s20575_s1 + $0x1f0] sm:$0xff]  }
  0x14   :  { %14124 = vmatprep.subr.bf16.mxu0 %v15637_v20  ;;  %v15669_v3 = vld [vmem:[%s20575_s1 + $0x1a0] sm:$0xff]   ;;  %v15673_v7 = vld [vmem:[%s20575_s1 + $0x1a8] sm:$0xff]   ;;  %v15675_v11 = vld [vmem:[%s20575_s1 + $0x130] sm:$0xff]  }
  0x15   :  { %14145 = vmatpush3.bf16.msra.mxu1 %v15636_v19  ;;  %v26_v10 = vld [vmem:[%s20574_s0 + $0x8] sm:$0xff]  ;;  %v15677_v14 = vld [vmem:[%s20575_s1 + $0x1b0] sm:$0xff]   ;;  %v15678_v15 = vld [vmem:[%s20575_s1 + $0x178] sm:$0xff]  }
  0x16   :  { %14146 = vmatprep.subr.bf16.mxu1 %v15639_v22  ;;  %v117_v12 = vrot.slane %v26_v10, %v16926_v41  ;;  %v110_v13 = vcombine.high %v26_v10, %v26_v10  ;;  %v15680_v18 = vld [vmem:[%s20575_s1 + $0x1f8] sm:$0xff]   ;;  %v15688_v33 = vld [vmem:[%s20575_s1 + $0x208] sm:$0xff]   ;;  %v15691_v35 = vld [vmem:[%s20575_s1 + $0x250] sm:$0xff]  }
  0x17   :  { %14125 = vmatpush3.bf16.msra.mxu0 %v15638_v21  ;;  %v15679_v19 = vld [vmem:[%s20575_s1 + $0x138] sm:$0xff]   ;;  %v15693_v36 = vld [vmem:[%s20575_s1 + $0x2d0] sm:$0xff]   ;;  %v15699_v44 = vld [vmem:[%s20575_s1 + $0x260] sm:$0xff]  }
  0x18   :  { %14126 = vmatprep.subr.bf16.mxu0 %v15641_v24  ;;  %v125_v16 = vcombine.high %v117_v12, %v117_v12  ;;  %v124_v17 = vrot.slane %v110_v13, %v16926_v41  ;;  %v15681_v22 = vld [vmem:[%s20575_s1 + $0x1b8] sm:$0xff]   ;;  %v809_v27 = vpack.c.bf16 %v117_v12, %v117_v12  ;;  %v15694_v38 = vld [vmem:[%s20575_s1 + $0x290] sm:$0xff]   ;;  %v15701_v45 = vld [vmem:[%s20575_s1 + $0x2e0] sm:$0xff]  }
  0x19   :  { %14147 = vmatpush3.bf16.msra.mxu1 %v15640_v23  ;;  %v15682_v23 = vld [vmem:[%s20575_s1 + $0x240] sm:$0xff]   ;;  %v15695_v39 = vld [vmem:[%s20575_s1 + $0x258] sm:$0xff]   ;;  %v15704_v50 = vld [vmem:[%s20575_s1 + $0x228] sm:$0xff]  }
  0x1a   :  { %14148 = vmatprep.subr.bf16.mxu1 %v15643_v26  ;;  %v810_v20 = vpack.c.bf16 %v125_v16, %v125_v16  ;;  %v126_v21 = vcombine.high %v124_v17, %v124_v17  ;;  %v15684_v26 = vld [vmem:[%s20575_s1 + $0x200] sm:$0xff]   ;;  %v15696_v42 = vld [vmem:[%s20575_s1 + $0x218] sm:$0xff]   ;;  %v15706_v51 = vld [vmem:[%s20575_s1 + $0x2a8] sm:$0xff]  }
  0x1b   :  { %14127 = vmatpush3.bf16.msra.mxu0 %v15642_v25  ;;  %v15685_v25 = vld [vmem:[%s20575_s1 + $0x2c0] sm:$0xff]   ;;  %v15698_v43 = vld [vmem:[%s20575_s1 + $0x298] sm:$0xff]   ;;  %v15720_v10 = vld [vmem:[%s20575_s1 + $0x348] sm:$0xff]  }
  0x1c   :  { %14128 = vmatprep.subr.bf16.mxu0 %v15645_v29  ;;  %v812_v24 = vpack.c.bf16 %v126_v21, %v126_v21  ;;  %v15686_v29 = vld [vmem:[%s20575_s1 + $0x280] sm:$0xff]   ;;  %v15721_v12 = vld [vmem:[%s20575_s1 + $0x308] sm:$0xff]   ;;  %v15725_v16 = vld [vmem:[%s20575_s1 + $0x310] sm:$0xff]  }
  0x1d   :  { %14149 = vmatpush3.bf16.msra.mxu1 %v15644_v28  ;;  %v811_v28 = vpack.c.bf16 %v124_v17, %v124_v17  ;;  %v15723_v13 = vld [vmem:[%s20575_s1 + $0x388] sm:$0xff]   ;;  %v15727_v17 = vld [vmem:[%s20575_s1 + $0x390] sm:$0xff]   ;;  %v15731_v21 = vld [vmem:[%s20575_s1 + $0x398] sm:$0xff]  }
  0x1e   :  { %14150 = vmatprep.subr.bf16.mxu1 %v15647_v31  ;;  %v15689_v31 = vld [vmem:[%s20575_s1 + $0x2c8] sm:$0xff]  }
  0x1f   :  { %14129 = vmatpush3.bf16.msra.mxu0 %v15646_v30  ;;  %v15687_v30 = vld [vmem:[%s20575_s1 + $0x248] sm:$0xff]  }
  0x20   :  { %14158 = vmatprep.subr.bf16.mxu0 %v15649_v37  ;;  %v15692_v37 = vld [vmem:[%s20575_s1 + $0x210] sm:$0xff]  }
  0x21   :  { %14151 = vmatpush3.bf16.msra.mxu1 %v15648_v34  ;;  %v15690_v34 = vld [vmem:[%s20575_s1 + $0x288] sm:$0xff]  }
  0x22   :  { %14180 = vmatprep.subr.bf16.mxu1 %v15652_v40  ;;  %9608 = vmatmul.mubr.bf16.vlgmr.msra.gmra.mrb[0].mxu0 %v805_v47  ;;  %v15697_v40 = vld [vmem:[%s20575_s1 + $0x2d8] sm:$0xff]   ;;  %v15702_v47 = vld [vmem:[%s20575_s1 + $0x2a0] sm:$0xff]  }
  0x23   :  { %14159 = vmatpush3.bf16.msra.mxu0 %v15651_v46  ;;  %9687 = vmatprep.mubr.bf16.mxu0 %v810_v20  ;;  %v15700_v46 = vld [vmem:[%s20575_s1 + $0x220] sm:$0xff]   ;;  %v15729_v20 = vld [vmem:[%s20575_s1 + $0x318] sm:$0xff]  }
  0x24   :  { %9648 = vmatmul.mubr.bf16.vlgmr.msra.gmra.mrb[0].mxu1 %v807_v48  ;;  %14160 = vmatprep.subr.bf16.mxu0 %v15654_v52  ;;  %v15703_v48 = vld [vmem:[%s20575_s1 + $0x268] sm:$0xff]   ;;  %v15707_v52 = vld [vmem:[%s20575_s1 + $0x270] sm:$0xff]  }
  0x25   :  { %14181 = vmatpush3.bf16.msra.mxu1 %v15653_v49  ;;  %9727 = vmatprep.mubr.bf16.mxu1 %v812_v24  ;;  %v15705_v49 = vld [vmem:[%s20575_s1 + $0x2e8] sm:$0xff]   ;;  %v15733_v24 = vld [vmem:[%s20575_s1 + $0x320] sm:$0xff]  }
  0x26   :  { %14182 = vmatprep.subr.bf16.mxu1 %v15656_v53  ;;  %v15709_v53 = vld [vmem:[%s20575_s1 + $0x2f0] sm:$0xff]  }
  0x27   :  { %14161 = vmatpush3.bf16.msra.mxu0 %v15655_v54  ;;  %v27_v54 = vld [vmem:[%s20574_s0 + $0x10] sm:$0xff] }
  0x28   :  { %14162 = vmatprep.subr.bf16.mxu0 %v15658_v56  ;;  %v134_v56 = vrot.slane %v27_v54, %v16926_v41 }
  0x29   :  { %14183 = vmatpush3.bf16.msra.mxu1 %v15657_v55  ;;  %v15708_v55 = vld [vmem:[%s20575_s1 + $0x230] sm:$0xff]  }
  0x2a   :  { %14184 = vmatprep.subr.bf16.mxu1 %v15660_v57  ;;  %v127_v57 = vcombine.high %v27_v54, %v27_v54  ;;  %v15753_v54 = vld [vmem:[%s20575_s1 + $0x448] sm:$0xff]  }
  0x2b   :  { %14163 = vmatpush3.bf16.msra.mxu0 %v15659_v58  ;;  %v15710_v58 = vld [vmem:[%s20575_s1 + $0x2b0] sm:$0xff]  }
  0x2c   :  { %14164 = vmatprep.subr.bf16.mxu0 %v15662_v60  ;;  %v142_v60 = vcombine.high %v134_v56, %v134_v56 }
  0x2d   :  { %14185 = vmatpush3.bf16.msra.mxu1 %v15661_v59  ;;  %v15711_v59 = vld [vmem:[%s20575_s1 + $0x278] sm:$0xff]  }
  0x2e   :  { %14186 = vmatprep.subr.bf16.mxu1 %v15664_v61  ;;  %v141_v61 = vrot.slane %v127_v57, %v16926_v41  ;;  %v15756_v57 = vld [vmem:[%s20575_s1 + $0x488] sm:$0xff]  }
  0x2f   :  { %14165 = vmatpush3.bf16.msra.mxu0 %v15663_v62  ;;  %v15713_v62 = vld [vmem:[%s20575_s1 + $0x2f8] sm:$0xff]  }
  0x30   :  { %14166 = vmatprep.subr.bf16.mxu0 %v15666_v0  ;;  %v814_v0 = vpack.c.bf16 %v142_v60, %v142_v60  ;;  %v15758_v60 = vld [vmem:[%s20575_s1 + $0x410] sm:$0xff]  }
  0x31   :  { %14187 = vmatpush3.bf16.msra.mxu1 %v15665_v63  ;;  %v15712_v63 = vld [vmem:[%s20575_s1 + $0x238] sm:$0xff]  }
  0x32   :  { %14188 = vmatprep.subr.bf16.mxu1 %v15668_v1  ;;  %v143_v1 = vcombine.high %v141_v61, %v141_v61 }
  0x33   :  { %14167 = vmatpush3.bf16.msra.mxu0 %v15667_v2  ;;  %v15714_v2 = vld [vmem:[%s20575_s1 + $0x2b8] sm:$0xff]  }
  0x34   :  { %14168 = vmatprep.subr.bf16.mxu0 %v15670_v4  ;;  %v816_v4 = vpack.c.bf16 %v143_v1, %v143_v1  ;;  %v15764_v1 = vld [vmem:[%s20575_s1 + $0x498] sm:$0xff]  }
  0x35   :  { %14189 = vmatpush3.bf16.msra.mxu1 %v15669_v3  ;;  %v15715_v3 = vld [vmem:[%s20575_s1 + $0x340] sm:$0xff]  }
  0x36   :  { %14190 = vmatprep.subr.bf16.mxu1 %v15672_v5  ;;  %v15718_v5 = vld [vmem:[%s20575_s1 + $0x3c0] sm:$0xff]  }
  0x37   :  { %14169 = vmatpush3.bf16.msra.mxu0 %v15671_v6  ;;  %v15717_v6 = vld [vmem:[%s20575_s1 + $0x300] sm:$0xff]  }
  0x38   :  { %14170 = vmatprep.subr.bf16.mxu0 %v15674_v8  ;;  %v815_v8 = vpack.c.bf16 %v141_v61, %v141_v61  ;;  %v15760_v61 = vld [vmem:[%s20575_s1 + $0x490] sm:$0xff]  }
  0x39   :  { %14191 = vmatpush3.bf16.msra.mxu1 %v15673_v7  ;;  %v813_v7 = vpack.c.bf16 %v134_v56, %v134_v56  ;;  %v15754_v56 = vld [vmem:[%s20575_s1 + $0x408] sm:$0xff]  }
  0x3a   :  { %14192 = vmatprep.subr.bf16.mxu1 %v15676_v9  ;;  %v15719_v9 = vld [vmem:[%s20575_s1 + $0x380] sm:$0xff]  }
  0x3b   :  { %14171 = vmatpush3.bf16.msra.mxu0 %v15675_v11  ;;  %v15722_v11 = vld [vmem:[%s20575_s1 + $0x3c8] sm:$0xff]  }
  0x3c   :  { %14172 = vmatprep.subr.bf16.mxu0 %v15678_v15  ;;  %v15726_v15 = vld [vmem:[%s20575_s1 + $0x3d0] sm:$0xff]  }
  0x3d   :  { %14193 = vmatpush3.bf16.msra.mxu1 %v15677_v14  ;;  %v15724_v14 = vld [vmem:[%s20575_s1 + $0x350] sm:$0xff]  }
  0x3e   :  { %14194 = vmatprep.subr.bf16.mxu1 %v15680_v18  ;;  %v15728_v18 = vld [vmem:[%s20575_s1 + $0x358] sm:$0xff]  }
  0x3f   :  { %14173 = vmatpush3.bf16.msra.mxu0 %v15679_v19  ;;  %v15730_v19 = vld [vmem:[%s20575_s1 + $0x3d8] sm:$0xff]  }
  0x40   :  { %14202 = vmatprep.subr.bf16.mxu0 %v15682_v23  ;;  %v15734_v23 = vld [vmem:[%s20575_s1 + $0x3e0] sm:$0xff]  }
  0x41   :  { %14195 = vmatpush3.bf16.msra.mxu1 %v15681_v22  ;;  %v15732_v22 = vld [vmem:[%s20575_s1 + $0x360] sm:$0xff]  }
  0x42   :  { %14224 = vmatprep.subr.bf16.mxu1 %v15685_v25  ;;  %9688 = vmatmul.mubr.bf16.vlgmr.msra.gmra.mrb[4].mxu0 %v809_v27  ;;  %v15735_v25 = vld [vmem:[%s20575_s1 + $0x3a0] sm:$0xff]   ;;  %v15738_v27 = vld [vmem:[%s20575_s1 + $0x3e8] sm:$0xff]  }
  0x43   :  { %14203 = vmatpush3.bf16.msra.mxu0 %v15684_v26  ;;  %9767 = vmatprep.mubr.bf16.mxu0 %v814_v0  ;;  %v15736_v26 = vld [vmem:[%s20575_s1 + $0x368] sm:$0xff]   ;;  %v15762_v0 = vld [vmem:[%s20575_s1 + $0x418] sm:$0xff]  }
  0x44   :  { %9728 = vmatmul.mubr.bf16.vlgmr.msra.gmra.mrb[4].mxu1 %v811_v28  ;;  %14204 = vmatprep.subr.bf16.mxu0 %v15687_v30  ;;  %v15737_v28 = vld [vmem:[%s20575_s1 + $0x328] sm:$0xff]   ;;  %v15740_v30 = vld [vmem:[%s20575_s1 + $0x370] sm:$0xff]  }
  0x45   :  { %14225 = vmatpush3.bf16.msra.mxu1 %v15686_v29  ;;  %9807 = vmatprep.mubr.bf16.mxu1 %v816_v4  ;;  %v15739_v29 = vld [vmem:[%s20575_s1 + $0x3a8] sm:$0xff]   ;;  %v15766_v4 = vld [vmem:[%s20575_s1 + $0x420] sm:$0xff]  }
  0x46   :  { %14226 = vmatprep.subr.bf16.mxu1 %v15689_v31  ;;  %v15742_v31 = vld [vmem:[%s20575_s1 + $0x3f0] sm:$0xff]  }
  0x47   :  { %14205 = vmatpush3.bf16.msra.mxu0 %v15688_v33  ;;  %v15741_v33 = vld [vmem:[%s20575_s1 + $0x330] sm:$0xff]  }
  0x48   :  { %14206 = vmatprep.subr.bf16.mxu0 %v15691_v35  ;;  %v15743_v35 = vld [vmem:[%s20575_s1 + $0x3b0] sm:$0xff]  }
  0x49   :  { %14227 = vmatpush3.bf16.msra.mxu1 %v15690_v34  ;;  %v28_v34 = vld [vmem:[%s20574_s0 + $0x18] sm:$0xff] }
  0x4a   :  { %14228 = vmatprep.subr.bf16.mxu1 %v15693_v36  ;;  %v151_v36 = vrot.slane %v28_v34, %v16926_v41 }
  0x4b   :  { %14207 = vmatpush3.bf16.msra.mxu0 %v15692_v37  ;;  %v144_v37 = vcombine.high %v28_v34, %v28_v34  ;;  %v15788_v34 = vld [vmem:[%s20575_s1 + $0x5c8] sm:$0xff]  }
  0x4c   :  { %14208 = vmatprep.subr.bf16.mxu0 %v15695_v39  ;;  %v15746_v39 = vld [vmem:[%s20575_s1 + $0x3f8] sm:$0xff]  }
  0x4d   :  { %14229 = vmatpush3.bf16.msra.mxu1 %v15694_v38  ;;  %v15744_v38 = vld [vmem:[%s20575_s1 + $0x378] sm:$0xff]  }
  0x4e   :  { %14230 = vmatprep.subr.bf16.mxu1 %v15697_v40  ;;  %v159_v40 = vcombine.high %v151_v36, %v151_v36 }
  0x4f   :  { %14209 = vmatpush3.bf16.msra.mxu0 %v15696_v42  ;;  %v158_v42 = vrot.slane %v144_v37, %v16926_v41  ;;  %v15790_v37 = vld [vmem:[%s20575_s1 + $0x550] sm:$0xff]  }
  0x50   :  { %14210 = vmatprep.subr.bf16.mxu0 %v15699_v44  ;;  %v818_v44 = vpack.c.bf16 %v159_v40, %v159_v40  ;;  %v15793_v40 = vld [vmem:[%s20575_s1 + $0x590] sm:$0xff]  }
  0x51   :  { %14231 = vmatpush3.bf16.msra.mxu1 %v15698_v43  ;;  %v15745_v43 = vld [vmem:[%s20575_s1 + $0x338] sm:$0xff]  }
  0x52   :  { %14232 = vmatprep.subr.bf16.mxu1 %v15701_v45  ;;  %v15747_v45 = vld [vmem:[%s20575_s1 + $0x3b8] sm:$0xff]  }
  0x53   :  { %14211 = vmatpush3.bf16.msra.mxu0 %v15700_v46  ;;  %v160_v46 = vcombine.high %v158_v42, %v158_v42 }
  0x54   :  { %14212 = vmatprep.subr.bf16.mxu0 %v15703_v48 }
  0x55   :  { %14233 = vmatpush3.bf16.msra.mxu1 %v15702_v47  ;;  %v15748_v47 = vld [vmem:[%s20575_s1 + $0x440] sm:$0xff]   ;;  %v820_v48 = vpack.c.bf16 %v160_v46, %v160_v46 }
  0x56   :  { %14234 = vmatprep.subr.bf16.mxu1 %v15705_v49  ;;  %v15751_v49 = vld [vmem:[%s20575_s1 + $0x4c0] sm:$0xff]  }
  0x57   :  { %14213 = vmatpush3.bf16.msra.mxu0 %v15704_v50  ;;  %v15750_v50 = vld [vmem:[%s20575_s1 + $0x400] sm:$0xff]  }
  0x58   :  { %14214 = vmatprep.subr.bf16.mxu0 %v15707_v52  ;;  %v819_v52 = vpack.c.bf16 %v158_v42, %v158_v42  ;;  %v15794_v42 = vld [vmem:[%s20575_s1 + $0x558] sm:$0xff]   ;;  %v15798_v46 = vld [vmem:[%s20575_s1 + $0x560] sm:$0xff]  }
  0x59   :  { %14235 = vmatpush3.bf16.msra.mxu1 %v15706_v51  ;;  %v817_v51 = vpack.c.bf16 %v151_v36, %v151_v36  ;;  %v15789_v36 = vld [vmem:[%s20575_s1 + $0x588] sm:$0xff]  }
  0x5a   :  { %14236 = vmatprep.subr.bf16.mxu1 %v15709_v53  ;;  %v15752_v53 = vld [vmem:[%s20575_s1 + $0x480] sm:$0xff]  }
  0x5b   :  { %14215 = vmatpush3.bf16.msra.mxu0 %v15708_v55  ;;  %v15755_v55 = vld [vmem:[%s20575_s1 + $0x4c8] sm:$0xff]  }
  0x5c   :  { %14216 = vmatprep.subr.bf16.mxu0 %v15711_v59  ;;  %v15759_v59 = vld [vmem:[%s20575_s1 + $0x4d0] sm:$0xff]  }
  0x5d   :  { %14237 = vmatpush3.bf16.msra.mxu1 %v15710_v58  ;;  %v15757_v58 = vld [vmem:[%s20575_s1 + $0x450] sm:$0xff]  }
  0x5e   :  { %14238 = vmatprep.subr.bf16.mxu1 %v15713_v62  ;;  %v15761_v62 = vld [vmem:[%s20575_s1 + $0x458] sm:$0xff]  }
  0x5f   :  { %14217 = vmatpush3.bf16.msra.mxu0 %v15712_v63  ;;  %v15763_v63 = vld [vmem:[%s20575_s1 + $0x4d8] sm:$0xff]  }
  0x60   :  { %14246 = vmatprep.subr.bf16.mxu0 %v15715_v3  ;;  %v15767_v3 = vld [vmem:[%s20575_s1 + $0x4e0] sm:$0xff]  }
  0x61   :  { %14239 = vmatpush3.bf16.msra.mxu1 %v15714_v2  ;;  %v15765_v2 = vld [vmem:[%s20575_s1 + $0x460] sm:$0xff]  }
  0x62   :  { %14268 = vmatprep.subr.bf16.mxu1 %v15718_v5  ;;  %9768 = vmatmul.mubr.bf16.vlgmr.msra.gmra.mrb[8].mxu0 %v813_v7  ;;  %v15768_v5 = vld [vmem:[%s20575_s1 + $0x4a0] sm:$0xff]   ;;  %v15771_v7 = vld [vmem:[%s20575_s1 + $0x4e8] sm:$0xff]  }
  0x63   :  { %14247 = vmatpush3.bf16.msra.mxu0 %v15717_v6  ;;  %9847 = vmatprep.mubr.bf16.mxu0 %v818_v44  ;;  %v15769_v6 = vld [vmem:[%s20575_s1 + $0x468] sm:$0xff]   ;;  %v15795_v44 = vld [vmem:[%s20575_s1 + $0x518] sm:$0xff]  }
  0x64   :  { %9808 = vmatmul.mubr.bf16.vlgmr.msra.gmra.mrb[8].mxu1 %v815_v8  ;;  %14248 = vmatprep.subr.bf16.mxu0 %v15720_v10  ;;  %v15770_v8 = vld [vmem:[%s20575_s1 + $0x428] sm:$0xff]   ;;  %v15773_v10 = vld [vmem:[%s20575_s1 + $0x470] sm:$0xff]  }
  0x65   :  { %14269 = vmatpush3.bf16.msra.mxu1 %v15719_v9  ;;  %9887 = vmatprep.mubr.bf16.mxu1 %v820_v48  ;;  %v15772_v9 = vld [vmem:[%s20575_s1 + $0x4a8] sm:$0xff]   ;;  %v15799_v48 = vld [vmem:[%s20575_s1 + $0x520] sm:$0xff]  }
  0x66   :  { %14270 = vmatprep.subr.bf16.mxu1 %v15722_v11  ;;  %v15775_v11 = vld [vmem:[%s20575_s1 + $0x4f0] sm:$0xff]  }
  0x67   :  { %14249 = vmatpush3.bf16.msra.mxu0 %v15721_v12  ;;  %v15774_v12 = vld [vmem:[%s20575_s1 + $0x430] sm:$0xff]  }
  0x68   :  { %14250 = vmatprep.subr.bf16.mxu0 %v15724_v14  ;;  %v15776_v14 = vld [vmem:[%s20575_s1 + $0x4b0] sm:$0xff]  }
  0x69   :  { %14271 = vmatpush3.bf16.msra.mxu1 %v15723_v13  ;;  %v29_v13 = vld [vmem:[%s20574_s0 + $0x20] sm:$0xff] }
  0x6a   :  { %14272 = vmatprep.subr.bf16.mxu1 %v15726_v15  ;;  %v168_v15 = vrot.slane %v29_v13, %v16926_v41 }
  0x6b   :  { %14251 = vmatpush3.bf16.msra.mxu0 %v15725_v16  ;;  %v161_v16 = vcombine.high %v29_v13, %v29_v13  ;;  %v15821_v13 = vld [vmem:[%s20575_s1 + $0x6c8] sm:$0xff]  }
  0x6c   :  { %14252 = vmatprep.subr.bf16.mxu0 %v15728_v18  ;;  %v15779_v18 = vld [vmem:[%s20575_s1 + $0x4f8] sm:$0xff]  }
  0x6d   :  { %14273 = vmatpush3.bf16.msra.mxu1 %v15727_v17  ;;  %v15777_v17 = vld [vmem:[%s20575_s1 + $0x478] sm:$0xff]  }
  0x6e   :  { %14274 = vmatprep.subr.bf16.mxu1 %v15730_v19  ;;  %v176_v19 = vcombine.high %v168_v15, %v168_v15 }
  0x6f   :  { %14253 = vmatpush3.bf16.msra.mxu0 %v15729_v20  ;;  %v175_v20 = vrot.slane %v161_v16, %v16926_v41  ;;  %v15823_v16 = vld [vmem:[%s20575_s1 + $0x650] sm:$0xff]  }
  0x70   :  { %14254 = vmatprep.subr.bf16.mxu0 %v15732_v22  ;;  %v822_v22 = vpack.c.bf16 %v176_v19, %v176_v19  ;;  %v15826_v19 = vld [vmem:[%s20575_s1 + $0x690] sm:$0xff]  }
  0x71   :  { %14275 = vmatpush3.bf16.msra.mxu1 %v15731_v21  ;;  %v15778_v21 = vld [vmem:[%s20575_s1 + $0x438] sm:$0xff]  }
  0x72   :  { %14276 = vmatprep.subr.bf16.mxu1 %v15734_v23  ;;  %v15780_v23 = vld [vmem:[%s20575_s1 + $0x4b8] sm:$0xff]  }
  0x73   :  { %14255 = vmatpush3.bf16.msra.mxu0 %v15733_v24  ;;  %v177_v24 = vcombine.high %v175_v20, %v175_v20 }
  0x74   :  { %14256 = vmatprep.subr.bf16.mxu0 %v15736_v26 }
  0x75   :  { %14277 = vmatpush3.bf16.msra.mxu1 %v15735_v25  ;;  %v15781_v25 = vld [vmem:[%s20575_s1 + $0x540] sm:$0xff]   ;;  %v824_v26 = vpack.c.bf16 %v177_v24, %v177_v24 }
  0x76   :  { %14278 = vmatprep.subr.bf16.mxu1 %v15738_v27  ;;  %v15784_v27 = vld [vmem:[%s20575_s1 + $0x5c0] sm:$0xff]  }
  0x77   :  { %14257 = vmatpush3.bf16.msra.mxu0 %v15737_v28  ;;  %v15783_v28 = vld [vmem:[%s20575_s1 + $0x500] sm:$0xff]  }
  0x78   :  { %14258 = vmatprep.subr.bf16.mxu0 %v15740_v30  ;;  %v823_v30 = vpack.c.bf16 %v175_v20, %v175_v20  ;;  %v15827_v20 = vld [vmem:[%s20575_s1 + $0x658] sm:$0xff]   ;;  %v15831_v24 = vld [vmem:[%s20575_s1 + $0x660] sm:$0xff]  }
  0x79   :  { %14279 = vmatpush3.bf16.msra.mxu1 %v15739_v29  ;;  %v821_v29 = vpack.c.bf16 %v168_v15, %v168_v15  ;;  %v15822_v15 = vld [vmem:[%s20575_s1 + $0x688] sm:$0xff]  }
  0x7a   :  { %14280 = vmatprep.subr.bf16.mxu1 %v15742_v31  ;;  %v15785_v31 = vld [vmem:[%s20575_s1 + $0x580] sm:$0xff]  }
  0x7b   :  { %14259 = vmatpush3.bf16.msra.mxu0 %v15741_v33  ;;  %v15786_v33 = vld [vmem:[%s20575_s1 + $0x548] sm:$0xff]  }
  0x7c   :  { %14260 = vmatprep.subr.bf16.mxu0 %v15744_v38  ;;  %v15792_v38 = vld [vmem:[%s20575_s1 + $0x5d0] sm:$0xff]  }
  0x7d   :  { %14281 = vmatpush3.bf16.msra.mxu1 %v15743_v35  ;;  %v15787_v35 = vld [vmem:[%s20575_s1 + $0x508] sm:$0xff]  }
  0x7e   :  { %14282 = vmatprep.subr.bf16.mxu1 %v15746_v39  ;;  %v15791_v39 = vld [vmem:[%s20575_s1 + $0x510] sm:$0xff]  }
  0x7f   :  { %14261 = vmatpush3.bf16.msra.mxu0 %v15745_v43  ;;  %v15796_v43 = vld [vmem:[%s20575_s1 + $0x5d8] sm:$0xff]  }
  0x80   :  { %14290 = vmatprep.subr.bf16.mxu0 %v15748_v47  ;;  %v15800_v47 = vld [vmem:[%s20575_s1 + $0x5e0] sm:$0xff]  }
  0x81   :  { %14283 = vmatpush3.bf16.msra.mxu1 %v15747_v45  ;;  %v15797_v45 = vld [vmem:[%s20575_s1 + $0x598] sm:$0xff]  }
  0x82   :  { %14312 = vmatprep.subr.bf16.mxu1 %v15751_v49  ;;  %9848 = vmatmul.mubr.bf16.vlgmr.msra.gmra.mrb[12].mxu0 %v817_v51  ;;  %v15801_v49 = vld [vmem:[%s20575_s1 + $0x5a0] sm:$0xff]   ;;  %v15804_v51 = vld [vmem:[%s20575_s1 + $0x5e8] sm:$0xff]  }
  0x83   :  { %14291 = vmatpush3.bf16.msra.mxu0 %v15750_v50  ;;  %9927 = vmatprep.mubr.bf16.mxu0 %v822_v22  ;;  %v15802_v50 = vld [vmem:[%s20575_s1 + $0x568] sm:$0xff]   ;;  %v15828_v22 = vld [vmem:[%s20575_s1 + $0x618] sm:$0xff]  }
  0x84   :  { %9888 = vmatmul.mubr.bf16.vlgmr.msra.gmra.mrb[12].mxu1 %v819_v52  ;;  %14292 = vmatprep.subr.bf16.mxu0 %v15753_v54  ;;  %v15803_v52 = vld [vmem:[%s20575_s1 + $0x528] sm:$0xff]   ;;  %v15806_v54 = vld [vmem:[%s20575_s1 + $0x570] sm:$0xff]  }
  0x85   :  { %14313 = vmatpush3.bf16.msra.mxu1 %v15752_v53  ;;  %9967 = vmatprep.mubr.bf16.mxu1 %v824_v26  ;;  %v15805_v53 = vld [vmem:[%s20575_s1 + $0x5a8] sm:$0xff]   ;;  %v15832_v26 = vld [vmem:[%s20575_s1 + $0x620] sm:$0xff]  }
  0x86   :  { %14314 = vmatprep.subr.bf16.mxu1 %v15755_v55  ;;  %v15808_v55 = vld [vmem:[%s20575_s1 + $0x5f0] sm:$0xff]  }
  0x87   :  { %14293 = vmatpush3.bf16.msra.mxu0 %v15754_v56  ;;  %v15807_v56 = vld [vmem:[%s20575_s1 + $0x530] sm:$0xff]  }
  0x88   :  { %14294 = vmatprep.subr.bf16.mxu0 %v15757_v58  ;;  %v15809_v58 = vld [vmem:[%s20575_s1 + $0x5b0] sm:$0xff]  }
  0x89   :  { %14315 = vmatpush3.bf16.msra.mxu1 %v15756_v57  ;;  %v30_v57 = vld [vmem:[%s20574_s0 + $0x28] sm:$0xff] }
  0x8a   :  { %14316 = vmatprep.subr.bf16.mxu1 %v15759_v59  ;;  %v185_v59 = vrot.slane %v30_v57, %v16926_v41 }
  0x8b   :  { %14295 = vmatpush3.bf16.msra.mxu0 %v15758_v60  ;;  %v178_v60 = vcombine.high %v30_v57, %v30_v57  ;;  %v15854_v57 = vld [vmem:[%s20575_s1 + $0x7c8] sm:$0xff]  }
  0x8c   :  { %14296 = vmatprep.subr.bf16.mxu0 %v15761_v62  ;;  %v15812_v62 = vld [vmem:[%s20575_s1 + $0x5f8] sm:$0xff]  }
  0x8d   :  { %14317 = vmatpush3.bf16.msra.mxu1 %v15760_v61  ;;  %v15810_v61 = vld [vmem:[%s20575_s1 + $0x578] sm:$0xff]  }
  0x8e   :  { %14318 = vmatprep.subr.bf16.mxu1 %v15763_v63  ;;  %v193_v63 = vcombine.high %v185_v59, %v185_v59 }
  0x8f   :  { %14297 = vmatpush3.bf16.msra.mxu0 %v15762_v0  ;;  %v192_v0 = vrot.slane %v178_v60, %v16926_v41  ;;  %v15856_v60 = vld [vmem:[%s20575_s1 + $0x750] sm:$0xff]  }
  0x90   :  { %14298 = vmatprep.subr.bf16.mxu0 %v15765_v2  ;;  %v826_v2 = vpack.c.bf16 %v193_v63, %v193_v63  ;;  %v15859_v63 = vld [vmem:[%s20575_s1 + $0x790] sm:$0xff]  }
  0x91   :  { %14319 = vmatpush3.bf16.msra.mxu1 %v15764_v1  ;;  %v15811_v1 = vld [vmem:[%s20575_s1 + $0x538] sm:$0xff]  }
  0x92   :  { %14320 = vmatprep.subr.bf16.mxu1 %v15767_v3  ;;  %v15813_v3 = vld [vmem:[%s20575_s1 + $0x5b8] sm:$0xff]  }
  0x93   :  { %14299 = vmatpush3.bf16.msra.mxu0 %v15766_v4  ;;  %v194_v4 = vcombine.high %v192_v0, %v192_v0 }
  0x94   :  { %14300 = vmatprep.subr.bf16.mxu0 %v15769_v6 }
  0x95   :  { %14321 = vmatpush3.bf16.msra.mxu1 %v15768_v5  ;;  %v15814_v5 = vld [vmem:[%s20575_s1 + $0x640] sm:$0xff]   ;;  %v828_v6 = vpack.c.bf16 %v194_v4, %v194_v4 }
  0x96   :  { %14322 = vmatprep.subr.bf16.mxu1 %v15771_v7  ;;  %v15817_v7 = vld [vmem:[%s20575_s1 + $0x6c0] sm:$0xff]  }
  0x97   :  { %14301 = vmatpush3.bf16.msra.mxu0 %v15770_v8  ;;  %v15816_v8 = vld [vmem:[%s20575_s1 + $0x600] sm:$0xff]  }
  0x98   :  { %14302 = vmatprep.subr.bf16.mxu0 %v15773_v10  ;;  %v827_v10 = vpack.c.bf16 %v192_v0, %v192_v0  ;;  %v15860_v0 = vld [vmem:[%s20575_s1 + $0x758] sm:$0xff]   ;;  %v15864_v4 = vld [vmem:[%s20575_s1 + $0x760] sm:$0xff]  }
  0x99   :  { %14323 = vmatpush3.bf16.msra.mxu1 %v15772_v9  ;;  %v825_v9 = vpack.c.bf16 %v185_v59, %v185_v59  ;;  %v15855_v59 = vld [vmem:[%s20575_s1 + $0x788] sm:$0xff]  }
  0x9a   :  { %14324 = vmatprep.subr.bf16.mxu1 %v15775_v11  ;;  %v15818_v11 = vld [vmem:[%s20575_s1 + $0x680] sm:$0xff]  }
  0x9b   :  { %14303 = vmatpush3.bf16.msra.mxu0 %v15774_v12  ;;  %v15819_v12 = vld [vmem:[%s20575_s1 + $0x648] sm:$0xff]  }
  0x9c   :  { %14304 = vmatprep.subr.bf16.mxu0 %v15777_v17  ;;  %v15825_v17 = vld [vmem:[%s20575_s1 + $0x6d0] sm:$0xff]  }
  0x9d   :  { %14325 = vmatpush3.bf16.msra.mxu1 %v15776_v14  ;;  %v15820_v14 = vld [vmem:[%s20575_s1 + $0x608] sm:$0xff]  }
  0x9e   :  { %14326 = vmatprep.subr.bf16.mxu1 %v15779_v18  ;;  %v15824_v18 = vld [vmem:[%s20575_s1 + $0x610] sm:$0xff]  }
  0x9f   :  { %14305 = vmatpush3.bf16.msra.mxu0 %v15778_v21  ;;  %v15829_v21 = vld [vmem:[%s20575_s1 + $0x6d8] sm:$0xff]  }
  0xa0   :  { %14334 = vmatprep.subr.bf16.mxu0 %v15781_v25  ;;  %v15833_v25 = vld [vmem:[%s20575_s1 + $0x6e0] sm:$0xff]  }
  0xa1   :  { %14327 = vmatpush3.bf16.msra.mxu1 %v15780_v23  ;;  %v15830_v23 = vld [vmem:[%s20575_s1 + $0x698] sm:$0xff]  }
  0xa2   :  { %14356 = vmatprep.subr.bf16.mxu1 %v15784_v27  ;;  %9928 = vmatmul.mubr.bf16.vlgmr.msra.gmra.mrb[16].mxu0 %v821_v29  ;;  %v15834_v27 = vld [vmem:[%s20575_s1 + $0x6a0] sm:$0xff]   ;;  %v15837_v29 = vld [vmem:[%s20575_s1 + $0x6e8] sm:$0xff]  }
  0xa3   :  { %14335 = vmatpush3.bf16.msra.mxu0 %v15783_v28  ;;  %10007 = vmatprep.mubr.bf16.mxu0 %v826_v2  ;;  %v15835_v28 = vld [vmem:[%s20575_s1 + $0x668] sm:$0xff]   ;;  %v15861_v2 = vld [vmem:[%s20575_s1 + $0x718] sm:$0xff]  }
  0xa4   :  { %9968 = vmatmul.mubr.bf16.vlgmr.msra.gmra.mrb[16].mxu1 %v823_v30  ;;  %14336 = vmatprep.subr.bf16.mxu0 %v15786_v33  ;;  %v15836_v30 = vld [vmem:[%s20575_s1 + $0x628] sm:$0xff]   ;;  %v15839_v33 = vld [vmem:[%s20575_s1 + $0x670] sm:$0xff]  }
  0xa5   :  { %14357 = vmatpush3.bf16.msra.mxu1 %v15785_v31  ;;  %10047 = vmatprep.mubr.bf16.mxu1 %v828_v6  ;;  %v15838_v31 = vld [vmem:[%s20575_s1 + $0x6a8] sm:$0xff]   ;;  %v15865_v6 = vld [vmem:[%s20575_s1 + $0x720] sm:$0xff]  }
  0xa6   :  { %14358 = vmatprep.subr.bf16.mxu1 %v15788_v34  ;;  %v15841_v34 = vld [vmem:[%s20575_s1 + $0x6f0] sm:$0xff]  }
  0xa7   :  { %14337 = vmatpush3.bf16.msra.mxu0 %v15787_v35  ;;  %v15840_v35 = vld [vmem:[%s20575_s1 + $0x630] sm:$0xff]  }
  0xa8   :  { %14338 = vmatprep.subr.bf16.mxu0 %v15790_v37  ;;  %v31_v37 = vld [vmem:[%s20574_s0 + $0x30] sm:$0xff] }
  0xa9   :  { %14359 = vmatpush3.bf16.msra.mxu1 %v15789_v36  ;;  %v15842_v36 = vld [vmem:[%s20575_s1 + $0x6b0] sm:$0xff]  }
  0xaa   :  { %14360 = vmatprep.subr.bf16.mxu1 %v15792_v38  ;;  %v15843_v38 = vld [vmem:[%s20575_s1 + $0x678] sm:$0xff]  }
  0xab   :  { %14339 = vmatpush3.bf16.msra.mxu0 %v15791_v39  ;;  %v202_v39 = vrot.slane %v31_v37, %v16926_v41 }
  0xac   :  { %14340 = vmatprep.subr.bf16.mxu0 %v15794_v42  ;;  %v15845_v42 = vld [vmem:[%s20575_s1 + $0x6f8] sm:$0xff]  }
  0xad   :  { %14361 = vmatpush3.bf16.msra.mxu1 %v15793_v40  ;;  %v195_v40 = vcombine.high %v31_v37, %v31_v37 }
  0xae   :  { %14362 = vmatprep.subr.bf16.mxu1 %v15796_v43  ;;  %v210_v43 = vcombine.high %v202_v39, %v202_v39 }
  0xaf   :  { %14341 = vmatpush3.bf16.msra.mxu0 %v15795_v44  ;;  %v209_v44 = vrot.slane %v195_v40, %v16926_v41  ;;  %v15880_v40 = vld [vmem:[%s20575_s1 + $0x840] sm:$0xff]  }
  0xb0   :  { %14342 = vmatprep.subr.bf16.mxu0 %v15798_v46  ;;  %v830_v46 = vpack.c.bf16 %v210_v43, %v210_v43  ;;  %v15882_v43 = vld [vmem:[%s20575_s1 + $0x800] sm:$0xff]  }
  0xb1   :  { %14363 = vmatpush3.bf16.msra.mxu1 %v15797_v45  ;;  %v15844_v45 = vld [vmem:[%s20575_s1 + $0x638] sm:$0xff]  }
  0xb2   :  { %14364 = vmatprep.subr.bf16.mxu1 %v15800_v47  ;;  %v15846_v47 = vld [vmem:[%s20575_s1 + $0x6b8] sm:$0xff]  }
  0xb3   :  { %14343 = vmatpush3.bf16.msra.mxu0 %v15799_v48  ;;  %v211_v48 = vcombine.high %v209_v44, %v209_v44 }
  0xb4   :  { %14344 = vmatprep.subr.bf16.mxu0 %v15802_v50 }
  0xb5   :  { %14365 = vmatpush3.bf16.msra.mxu1 %v15801_v49  ;;  %v15847_v49 = vld [vmem:[%s20575_s1 + $0x740] sm:$0xff]   ;;  %v832_v50 = vpack.c.bf16 %v211_v48, %v211_v48 }
  0xb6   :  { %14366 = vmatprep.subr.bf16.mxu1 %v15804_v51  ;;  %v15849_v51 = vld [vmem:[%s20575_s1 + $0x700] sm:$0xff]  }
  0xb7   :  { %14345 = vmatpush3.bf16.msra.mxu0 %v15803_v52  ;;  %v15850_v52 = vld [vmem:[%s20575_s1 + $0x7c0] sm:$0xff]  }
  0xb8   :  { %14346 = vmatprep.subr.bf16.mxu0 %v15806_v54  ;;  %v831_v54 = vpack.c.bf16 %v209_v44, %v209_v44  ;;  %v15883_v44 = vld [vmem:[%s20575_s1 + $0x8c0] sm:$0xff]  }
  0xb9   :  { %14367 = vmatpush3.bf16.msra.mxu1 %v15805_v53  ;;  %v829_v53 = vpack.c.bf16 %v202_v39, %v202_v39  ;;  %v15884_v48 = vld [vmem:[%s20575_s1 + $0x880] sm:$0xff]  }
  0xba   :  { %14368 = vmatprep.subr.bf16.mxu1 %v15808_v55  ;;  %v15851_v55 = vld [vmem:[%s20575_s1 + $0x780] sm:$0xff]  }
  0xbb   :  { %14347 = vmatpush3.bf16.msra.mxu0 %v15807_v56  ;;  %v15852_v56 = vld [vmem:[%s20575_s1 + $0x748] sm:$0xff]  }
  0xbc   :  { %14348 = vmatprep.subr.bf16.mxu0 %v15810_v61  ;;  %v15858_v61 = vld [vmem:[%s20575_s1 + $0x7d0] sm:$0xff]  }
  0xbd   :  { %14369 = vmatpush3.bf16.msra.mxu1 %v15809_v58  ;;  %v15853_v58 = vld [vmem:[%s20575_s1 + $0x708] sm:$0xff]  }
  0xbe   :  { %14370 = vmatprep.subr.bf16.mxu1 %v15812_v62  ;;  %v15857_v62 = vld [vmem:[%s20575_s1 + $0x710] sm:$0xff]  }
  0xbf   :  { %14349 = vmatpush3.bf16.msra.mxu0 %v15811_v1  ;;  %v15862_v1 = vld [vmem:[%s20575_s1 + $0x7d8] sm:$0xff]  }
  0xc0   :  { %14378 = vmatprep.subr.bf16.mxu0 %v15814_v5  ;;  %v15866_v5 = vld [vmem:[%s20575_s1 + $0x7e0] sm:$0xff]  }
  0xc1   :  { %14371 = vmatpush3.bf16.msra.mxu1 %v15813_v3  ;;  %v15863_v3 = vld [vmem:[%s20575_s1 + $0x798] sm:$0xff]  }
  0xc2   :  { %14400 = vmatprep.subr.bf16.mxu1 %v15817_v7  ;;  %10008 = vmatmul.mubr.bf16.vlgmr.msra.gmra.mrb[20].mxu0 %v825_v9  ;;  %v15867_v7 = vld [vmem:[%s20575_s1 + $0x7a0] sm:$0xff]   ;;  %v15870_v9 = vld [vmem:[%s20575_s1 + $0x7e8] sm:$0xff]  }
  0xc3   :  { %14379 = vmatpush3.bf16.msra.mxu0 %v15816_v8  ;;  %10087 = vmatprep.mubr.bf16.mxu0 %v830_v46  ;;  %v15868_v8 = vld [vmem:[%s20575_s1 + $0x768] sm:$0xff]  }
  0xc4   :  { %10048 = vmatmul.mubr.bf16.vlgmr.msra.gmra.mrb[20].mxu1 %v827_v10  ;;  %14380 = vmatprep.subr.bf16.mxu0 %v15819_v12  ;;  %v15869_v10 = vld [vmem:[%s20575_s1 + $0x728] sm:$0xff]   ;;  %v15872_v12 = vld [vmem:[%s20575_s1 + $0x770] sm:$0xff]  }
  0xc5   :  { %14401 = vmatpush3.bf16.msra.mxu1 %v15818_v11  ;;  %10127 = vmatprep.mubr.bf16.mxu1 %v832_v50  ;;  %v15871_v11 = vld [vmem:[%s20575_s1 + $0x7a8] sm:$0xff]  }
  0xc6   :  { %14402 = vmatprep.subr.bf16.mxu1 %v15821_v13  ;;  %v12970_v13 = vld [vmem:[%s20576_s2] ss:$0 sm:$0xff]  ;;  %v15887_v50 = vld [vmem:[%s20575_s1 + $0x8c8] sm:$0xff]  }
  0xc7   :  { %14381 = vmatpush3.bf16.msra.mxu0 %v15820_v14  ;;  %v15874_v14 = vld [vmem:[%s20575_s1 + $0x7f0] sm:$0xff]  }
  0xc8   :  { %14382 = vmatprep.subr.bf16.mxu0 %v15823_v16 }
  0xc9   :  { %14403 = vmatpush3.bf16.msra.mxu1 %v15822_v15 }
  0xca   :  { %14404 = vmatprep.subr.bf16.mxu1 %v15825_v17  ;;  %v15873_v17 = vld [vmem:[%s20575_s1 + $0x730] sm:$0xff]  }
  0xcb   :  { %14383 = vmatpush3.bf16.msra.mxu0 %v15824_v18  ;;  %v15875_v18 = vld [vmem:[%s20575_s1 + $0x7b0] sm:$0xff]  }
  0xcc   :  { %14384 = vmatprep.subr.bf16.mxu0 %v15827_v20 }
  0xcd   :  { %14405 = vmatpush3.bf16.msra.mxu1 %v15826_v19 }
  0xce   :  { %14406 = vmatprep.subr.bf16.mxu1 %v15829_v21 }
  0xcf   :  { %14385 = vmatpush3.bf16.msra.mxu0 %v15828_v22 }
  0xd0   :  { %14386 = vmatprep.subr.bf16.mxu0 %v15831_v24  ;;  %v32_v24 = vld [vmem:[%s20574_s0 + $0x38] sm:$0xff] }
  0xd1   :  { %14407 = vmatpush3.bf16.msra.mxu1 %v15830_v23 }
  0xd2   :  { %14408 = vmatprep.subr.bf16.mxu1 %v15833_v25 }
  0xd3   :  { %14387 = vmatpush3.bf16.msra.mxu0 %v15832_v26  ;;  %v15876_v26 = vld [vmem:[%s20575_s1 + $0x778] sm:$0xff]  }
  0xd4   :  { %14388 = vmatprep.subr.bf16.mxu0 %v15835_v28  ;;  %v219_v28 = vrot.slane %v32_v24, %v16926_v41 }
  0xd5   :  { %14409 = vmatpush3.bf16.msra.mxu1 %v15834_v27  ;;  %v15878_v27 = vld [vmem:[%s20575_s1 + $0x7f8] sm:$0xff]  }
  0xd6   :  { %14410 = vmatprep.subr.bf16.mxu1 %v15837_v29 }
  0xd7   :  { %14389 = vmatpush3.bf16.msra.mxu0 %v15836_v30  ;;  %v212_v30 = vcombine.high %v32_v24, %v32_v24 }
  0xd8   :  { %14390 = vmatprep.subr.bf16.mxu0 %v15839_v33  ;;  %v15877_v33 = vld [vmem:[%s20575_s1 + $0x738] sm:$0xff]  }
  0xd9   :  { %14411 = vmatpush3.bf16.msra.mxu1 %v15838_v31 }
  0xda   :  { %14412 = vmatprep.subr.bf16.mxu1 %v15841_v34 }
  0xdb   :  { %14391 = vmatpush3.bf16.msra.mxu0 %v15840_v35  ;;  %v227_v35 = vcombine.high %v219_v28, %v219_v28 }
  0xdc   :  { %14392 = vmatprep.subr.bf16.mxu0 %v15843_v38  ;;  %v15879_v38 = vld [vmem:[%s20575_s1 + $0x7b8] sm:$0xff]  }
  0xdd   :  { %14413 = vmatpush3.bf16.msra.mxu1 %v15842_v36  ;;  %v226_v36 = vrot.slane %v212_v30, %v16926_v41  ;;  %v834_v39 = vpack.c.bf16 %v227_v35, %v227_v35  ;;  %v15916_v35 = vld [vmem:[%s20575_s1 + $0x9c0] sm:$0xff]  }
  0xde   :  { %14414 = vmatprep.subr.bf16.mxu1 %v15845_v42 }
  0xdf   :  { %14393 = vmatpush3.bf16.msra.mxu0 %v15844_v45  ;;  %v228_v42 = vcombine.high %v226_v36, %v226_v36  ;;  %v833_v45 = vpack.c.bf16 %v219_v28, %v219_v28 }
  0xe0   :  { %14422 = vmatprep.subr.bf16.mxu0 %v15847_v49  ;;  %v15885_v49 = vld [vmem:[%s20575_s1 + $0x848] sm:$0xff]  }
  0xe1   :  { %14415 = vmatpush3.bf16.msra.mxu1 %v15846_v47  ;;  %v836_v46 = vpack.c.bf16 %v228_v42, %v228_v42  ;;  %v835_v47 = vpack.c.bf16 %v226_v36, %v226_v36  ;;  %v15920_v42 = vld [vmem:[%s20575_s1 + $0x9c8] sm:$0xff]  }
  0xe2   :  { %14444 = vmatprep.subr.bf16.mxu1 %v15850_v52  ;;  %10088 = vmatmul.mubr.bf16.vlgmr.msra.gmra.mrb[24].mxu0 %v829_v53  ;;  %v15888_v52 = vld [vmem:[%s20575_s1 + $0x888] sm:$0xff]   ;;  %v15889_v53 = vld [vmem:[%s20575_s1 + $0x850] sm:$0xff]  }
  0xe3   :  { %14423 = vmatpush3.bf16.msra.mxu0 %v15849_v51  ;;  %10167 = vmatprep.mubr.bf16.mxu0 %v834_v39  ;;  %v15886_v51 = vld [vmem:[%s20575_s1 + $0x808] sm:$0xff]   ;;  %v15917_v39 = vld [vmem:[%s20575_s1 + $0x980] sm:$0xff]  }
  0xe4   :  { %10128 = vmatmul.mubr.bf16.vlgmr.msra.gmra.mrb[24].mxu1 %v831_v54  ;;  %14424 = vmatprep.subr.bf16.mxu0 %v15852_v56  ;;  %v15891_v54 = vld [vmem:[%s20575_s1 + $0x8d0] sm:$0xff]  }
  0xe5   :  { %14445 = vmatpush3.bf16.msra.mxu1 %v15851_v55  ;;  %10207 = vmatprep.mubr.bf16.mxu1 %v836_v46  ;;  %v15890_v55 = vld [vmem:[%s20575_s1 + $0x810] sm:$0xff]  }
  0xe6   :  { %14446 = vmatprep.subr.bf16.mxu1 %v15854_v57  ;;  %v15892_v56 = vld [vmem:[%s20575_s1 + $0x890] sm:$0xff]   ;;  %v15893_v57 = vld [vmem:[%s20575_s1 + $0x858] sm:$0xff]  }
  0xe7   :  { %14425 = vmatpush3.bf16.msra.mxu0 %v15853_v58  ;;  %v15895_v58 = vld [vmem:[%s20575_s1 + $0x8d8] sm:$0xff]   ;;  %v15924_v46 = vld [vmem:[%s20575_s1 + $0x9d0] sm:$0xff]  }
  0xe8   :  { %14426 = vmatprep.subr.bf16.mxu0 %v15856_v60  ;;  %v15896_v60 = vld [vmem:[%s20575_s1 + $0x898] sm:$0xff]  }
  0xe9   :  { %14447 = vmatpush3.bf16.msra.mxu1 %v15855_v59  ;;  %v15894_v59 = vld [vmem:[%s20575_s1 + $0x818] sm:$0xff]  }
  0xea   :  { %14448 = vmatprep.subr.bf16.mxu1 %v15858_v61  ;;  %v15897_v61 = vld [vmem:[%s20575_s1 + $0x860] sm:$0xff]  }
  0xeb   :  { %14427 = vmatpush3.bf16.msra.mxu0 %v15857_v62  ;;  %v15899_v62 = vld [vmem:[%s20575_s1 + $0x8e0] sm:$0xff]  }
  0xec   :  { %14428 = vmatprep.subr.bf16.mxu0 %v15860_v0  ;;  %v15900_v0 = vld [vmem:[%s20575_s1 + $0x8a0] sm:$0xff]  }
  0xed   :  { %14449 = vmatpush3.bf16.msra.mxu1 %v15859_v63  ;;  %v15898_v63 = vld [vmem:[%s20575_s1 + $0x820] sm:$0xff]  }
  0xee   :  { %14450 = vmatprep.subr.bf16.mxu1 %v15862_v1  ;;  %v15901_v1 = vld [vmem:[%s20575_s1 + $0x868] sm:$0xff]  }
  0xef   :  { %14429 = vmatpush3.bf16.msra.mxu0 %v15861_v2  ;;  %v15903_v2 = vld [vmem:[%s20575_s1 + $0x8e8] sm:$0xff]  }
  0xf0   :  { %14430 = vmatprep.subr.bf16.mxu0 %v15864_v4  ;;  %v15904_v4 = vld [vmem:[%s20575_s1 + $0x8a8] sm:$0xff]  }
  0xf1   :  { %14451 = vmatpush3.bf16.msra.mxu1 %v15863_v3  ;;  %v15902_v3 = vld [vmem:[%s20575_s1 + $0x828] sm:$0xff]  }
  0xf2   :  { %14452 = vmatprep.subr.bf16.mxu1 %v15866_v5  ;;  %v15905_v5 = vld [vmem:[%s20575_s1 + $0x870] sm:$0xff]  }
  0xf3   :  { %14431 = vmatpush3.bf16.msra.mxu0 %v15865_v6  ;;  %v15907_v6 = vld [vmem:[%s20575_s1 + $0x8f0] sm:$0xff]  }
  0xf4   :  { %14432 = vmatprep.subr.bf16.mxu0 %v15868_v8 }
  0xf5   :  { %14453 = vmatpush3.bf16.msra.mxu1 %v15867_v7  ;;  %v14130_v15 = vpop.f32.mrb[0].mxu0 }
  0xf6   :  { %14454 = vmatprep.subr.bf16.mxu1 %v15870_v9  ;;  %v14131_v19 = vpop.f32.mrb[1].mxu0  ;;  %v15906_v9 = vld [vmem:[%s20575_s1 + $0x830] sm:$0xff]  }
  0xf7   :  { %v14152_v16 = vpop.f32.mrb[0].mxu1  ;;  %v14132_v21 = vadd.f32 %v14131_v19, %v14130_v15  ;;  %v14133_v22 = vpop.f32.mrb[2].mxu0  ;;  %14433 = vmatpush3.bf16.msra.mxu0 %v15869_v10  ;;  %v15908_v10 = vld [vmem:[%s20575_s1 + $0x8b0] sm:$0xff]  }
  0xf8   :  { %v14153_v20 = vpop.f32.mrb[1].mxu1  ;;  %v14134_v25 = vpop.f32.mrb[3].mxu0  ;;  %14434 = vmatprep.subr.bf16.mxu0 %v15872_v12 }
  0xf9   :  { %v14154_v23 = vadd.f32 %v14153_v20, %v14152_v16  ;;  %14455 = vmatpush3.bf16.msra.mxu1 %v15871_v11  ;;  %v14155_v29 = vpop.f32.mrb[2].mxu1  ;;  %v9610_v31 = vadd.f32 %v14132_v21, %v12970_v13  ;;  %v15909_v16 = vld [vmem:[%s20575_s1 + $0x878] sm:$0xff]  }
  0xfa   :  { %14456 = vmatprep.subr.bf16.mxu1 %v15874_v14  ;;  %v14156_v34 = vpop.f32.mrb[3].mxu1  ;;  %v15911_v20 = vld [vmem:[%s20575_s1 + $0x8f8] sm:$0xff]  }
  0xfb   :  { %v17631_v37 = vadd.f32 %v14154_v23, %v9610_v31  ;;  %14435 = vmatpush3.bf16.msra.mxu0 %v15873_v17  ;;  %v33_v17 = vld [vmem:[%s20574_s0 + $0x40] sm:$0xff]  ;;  %v15910_v25 = vld [vmem:[%s20575_s1 + $0x838] sm:$0xff]  }
  0xfc   :  { %14436 = vmatprep.subr.bf16.mxu0 %v15876_v26  ;;  %v236_v21 = vrot.slane %v33_v17, %v16926_v41  ;;  %v229_v22 = vcombine.high %v33_v17, %v33_v17  ;;  %v15912_v29 = vld [vmem:[%s20575_s1 + $0x8b8] sm:$0xff]   ;;  %v15913_v31 = vld [vmem:[%s20575_s1 + $0x940] sm:$0xff]  }
  0xfd   :  { %14457 = vmatpush3.bf16.msra.mxu1 %v15875_v18  ;;  %v15915_v34 = vld [vmem:[%s20575_s1 + $0x900] sm:$0xff]  }
  0xfe   :  { %14458 = vmatprep.subr.bf16.mxu1 %v15878_v27  ;;  %v244_v26 = vcombine.high %v236_v21, %v236_v21  ;;  %v243_v27 = vrot.slane %v229_v22, %v16926_v41  ;;  %v837_v36 = vpack.c.bf16 %v236_v21, %v236_v21  ;;  %v15946_v21 = vld [vmem:[%s20575_s1 + $0xa40] sm:$0xff]  }
  0xff   :  { %14437 = vmatpush3.bf16.msra.mxu0 %v15877_v33 }
 0x100   :  { %14466 = vmatprep.subr.bf16.mxu0 %v15880_v40  ;;  %v838_v30 = vpack.c.bf16 %v244_v26, %v244_v26  ;;  %v245_v33 = vcombine.high %v243_v27, %v243_v27  ;;  %v15918_v40 = vld [vmem:[%s20575_s1 + $0x948] sm:$0xff]  }
 0x101   :  { %14459 = vmatpush3.bf16.msra.mxu1 %v15879_v38  ;;  %v839_v38 = vpack.c.bf16 %v243_v27, %v243_v27  ;;  %v15948_v27 = vld [vmem:[%s20575_s1 + $0xa00] sm:$0xff]  }
 0x102   :  { %14488 = vmatprep.subr.bf16.mxu1 %v15883_v44  ;;  %10168 = vmatmul.mubr.bf16.vlgmr.msra.gmra.mrb[28].mxu0 %v833_v45  ;;  %v15921_v44 = vld [vmem:[%s20575_s1 + $0x988] sm:$0xff]   ;;  %v15922_v45 = vld [vmem:[%s20575_s1 + $0x950] sm:$0xff]  }
 0x103   :  { %14467 = vmatpush3.bf16.msra.mxu0 %v15882_v43  ;;  %10247 = vmatprep.mubr.bf16.mxu0 %v838_v30  ;;  %v15919_v43 = vld [vmem:[%s20575_s1 + $0x908] sm:$0xff]  }
 0x104   :  { %10208 = vmatmul.mubr.bf16.vlgmr.msra.gmra.mrb[28].mxu1 %v835_v47  ;;  %14468 = vmatprep.subr.bf16.mxu0 %v15885_v49  ;;  %v15923_v47 = vld [vmem:[%s20575_s1 + $0x910] sm:$0xff]   ;;  %v15926_v49 = vld [vmem:[%s20575_s1 + $0x958] sm:$0xff]  }
 0x105   :  { %14489 = vmatpush3.bf16.msra.mxu1 %v15884_v48  ;;  %v15925_v48 = vld [vmem:[%s20575_s1 + $0x990] sm:$0xff]  }
 0x106   :  { %14490 = vmatprep.subr.bf16.mxu1 %v15887_v50  ;;  %v15928_v50 = vld [vmem:[%s20575_s1 + $0x9d8] sm:$0xff]  }
 0x107   :  { %14469 = vmatpush3.bf16.msra.mxu0 %v15886_v51  ;;  %v15927_v51 = vld [vmem:[%s20575_s1 + $0x918] sm:$0xff]  }
 0x108   :  { %14470 = vmatprep.subr.bf16.mxu0 %v15889_v53  ;;  %v15930_v53 = vld [vmem:[%s20575_s1 + $0x960] sm:$0xff]  }
 0x109   :  { %14491 = vmatpush3.bf16.msra.mxu1 %v15888_v52  ;;  %v15929_v52 = vld [vmem:[%s20575_s1 + $0x998] sm:$0xff]  }
 0x10a   :  { %14492 = vmatprep.subr.bf16.mxu1 %v15891_v54  ;;  %v15932_v54 = vld [vmem:[%s20575_s1 + $0x9e0] sm:$0xff]  }
 0x10b   :  { %14471 = vmatpush3.bf16.msra.mxu0 %v15890_v55  ;;  %v15931_v55 = vld [vmem:[%s20575_s1 + $0x920] sm:$0xff]  }
 0x10c   :  { %14472 = vmatprep.subr.bf16.mxu0 %v15893_v57  ;;  %v15934_v57 = vld [vmem:[%s20575_s1 + $0x968] sm:$0xff]  }
 0x10d   :  { %14493 = vmatpush3.bf16.msra.mxu1 %v15892_v56  ;;  %v15933_v56 = vld [vmem:[%s20575_s1 + $0x9a0] sm:$0xff]  }
 0x10e   :  { %14494 = vmatprep.subr.bf16.mxu1 %v15895_v58  ;;  %v15936_v58 = vld [vmem:[%s20575_s1 + $0x9e8] sm:$0xff]  }
 0x10f   :  { %14473 = vmatpush3.bf16.msra.mxu0 %v15894_v59  ;;  %v15935_v59 = vld [vmem:[%s20575_s1 + $0x928] sm:$0xff]  }
 0x110   :  { %14474 = vmatprep.subr.bf16.mxu0 %v15897_v61  ;;  %v15938_v61 = vld [vmem:[%s20575_s1 + $0x970] sm:$0xff]  }
 0x111   :  { %14495 = vmatpush3.bf16.msra.mxu1 %v15896_v60  ;;  %v15937_v60 = vld [vmem:[%s20575_s1 + $0x9a8] sm:$0xff]  }
 0x112   :  { %14496 = vmatprep.subr.bf16.mxu1 %v15899_v62  ;;  %v15940_v62 = vld [vmem:[%s20575_s1 + $0x9f0] sm:$0xff]  }
 0x113   :  { %14475 = vmatpush3.bf16.msra.mxu0 %v15898_v63 }
 0x114   :  { %14476 = vmatprep.subr.bf16.mxu0 %v15901_v1  ;;  %v15939_v1 = vld [vmem:[%s20575_s1 + $0x930] sm:$0xff]  }
 0x115   :  { %14497 = vmatpush3.bf16.msra.mxu1 %v15900_v0  ;;  %v14174_v7 = vpop.f32.mrb[4].mxu0 }
 0x116   :  { %14498 = vmatprep.subr.bf16.mxu1 %v15903_v2  ;;  %v14175_v11 = vpop.f32.mrb[5].mxu0 }
 0x117   :  { %v14196_v8 = vpop.f32.mrb[4].mxu1  ;;  %v14176_v13 = vadd.f32 %v14175_v11, %v14174_v7  ;;  %v14177_v14 = vpop.f32.mrb[6].mxu0  ;;  %14477 = vmatpush3.bf16.msra.mxu0 %v15902_v3  ;;  %v34_v11 = vld [vmem:[%s20574_s0 + $0x48] sm:$0xff] }
 0x118   :  { %v14197_v12 = vpop.f32.mrb[5].mxu1  ;;  %v14178_v19 = vpop.f32.mrb[7].mxu0  ;;  %14478 = vmatprep.subr.bf16.mxu0 %v15905_v5  ;;  %v15942_v5 = vld [vmem:[%s20575_s1 + $0x978] sm:$0xff]  }
 0x119   :  { %v14198_v15 = vadd.f32 %v14197_v12, %v14196_v8  ;;  %14499 = vmatpush3.bf16.msra.mxu1 %v15904_v4  ;;  %v14199_v18 = vpop.f32.mrb[6].mxu1  ;;  %v9690_v23 = vadd.f32 %v14176_v13, %v17631_v37  ;;  %v840_v37 = vpack.c.bf16 %v245_v33, %v245_v33  ;;  %v15941_v4 = vld [vmem:[%s20575_s1 + $0x9b0] sm:$0xff]   ;;  %v253_v13 = vrot.slane %v34_v11, %v16926_v41  ;;  %v15953_v33 = vld [vmem:[%s20575_s1 + $0xac8] sm:$0xff]  }
 0x11a   :  { %14500 = vmatprep.subr.bf16.mxu1 %v15907_v6  ;;  %v14200_v24 = vpop.f32.mrb[7].mxu1 }
 0x11b   :  { %v17735_v28 = vadd.f32 %v14198_v15, %v9690_v23  ;;  %14479 = vmatpush3.bf16.msra.mxu0 %v15906_v9  ;;  %10287 = vmatprep.mubr.bf16.mxu1 %v840_v37  ;;  %v15944_v9 = vld [vmem:[%s20575_s1 + $0x9f8] sm:$0xff]   ;;  %v246_v15 = vcombine.high %v34_v11, %v34_v11  ;;  %v261_v19 = vcombine.high %v253_v13, %v253_v13  ;;  %v15949_v24 = vld [vmem:[%s20575_s1 + $0xac0] sm:$0xff]   ;;  %v15957_v37 = vld [vmem:[%s20575_s1 + $0xad0] sm:$0xff]  }
 0x11c   :  { %14480 = vmatprep.subr.bf16.mxu0 %v15909_v16  ;;  %v15943_v16 = vld [vmem:[%s20575_s1 + $0x938] sm:$0xff]  }
 0x11d   :  { %14501 = vmatpush3.bf16.msra.mxu1 %v15908_v10  ;;  %v260_v22 = vrot.slane %v246_v15, %v16926_v41  ;;  %v842_v23 = vpack.c.bf16 %v261_v19, %v261_v19  ;;  %v15978_v11 = vld [vmem:[%s20575_s1 + $0xab8] sm:$0xff]   ;;  %v15982_v15 = vld [vmem:[%s20575_s1 + $0xbc0] sm:$0xff]  }
 0x11e   :  { %14502 = vmatprep.subr.bf16.mxu1 %v15911_v20  ;;  %v15945_v20 = vld [vmem:[%s20575_s1 + $0x9b8] sm:$0xff]   ;;  %v15981_v19 = vld [vmem:[%s20575_s1 + $0xb00] sm:$0xff]  }
 0x11f   :  { %14481 = vmatpush3.bf16.msra.mxu0 %v15910_v25  ;;  %v841_v25 = vpack.c.bf16 %v253_v13, %v253_v13  ;;  %v262_v26 = vcombine.high %v260_v22, %v260_v22  ;;  %v15979_v13 = vld [vmem:[%s20575_s1 + $0xb40] sm:$0xff]  }
 0x120   :  { %14510 = vmatprep.subr.bf16.mxu0 %v15913_v31  ;;  %v15951_v31 = vld [vmem:[%s20575_s1 + $0xa48] sm:$0xff]  }
 0x121   :  { %14503 = vmatpush3.bf16.msra.mxu1 %v15912_v29  ;;  %v15950_v29 = vld [vmem:[%s20575_s1 + $0xa80] sm:$0xff]   ;;  %v844_v30 = vpack.c.bf16 %v262_v26, %v262_v26  ;;  %v15987_v26 = vld [vmem:[%s20575_s1 + $0xb88] sm:$0xff]  }
 0x122   :  { %14532 = vmatprep.subr.bf16.mxu1 %v15916_v35  ;;  %10248 = vmatmul.mubr.bf16.vlgmr.msra.gmra.mrb[32].mxu0 %v837_v36  ;;  %v15954_v35 = vld [vmem:[%s20575_s1 + $0xa88] sm:$0xff]   ;;  %v15955_v36 = vld [vmem:[%s20575_s1 + $0xa50] sm:$0xff]  }
 0x123   :  { %14511 = vmatpush3.bf16.msra.mxu0 %v15915_v34  ;;  %10327 = vmatprep.mubr.bf16.mxu0 %v842_v23  ;;  %v15952_v34 = vld [vmem:[%s20575_s1 + $0xa08] sm:$0xff]  }
 0x124   :  { %10288 = vmatmul.mubr.bf16.vlgmr.msra.gmra.mrb[32].mxu1 %v839_v38  ;;  %14512 = vmatprep.subr.bf16.mxu0 %v15918_v40  ;;  %v15956_v38 = vld [vmem:[%s20575_s1 + $0xa10] sm:$0xff]   ;;  %v15959_v40 = vld [vmem:[%s20575_s1 + $0xa58] sm:$0xff]   ;;  %v15984_v23 = vld [vmem:[%s20575_s1 + $0xb48] sm:$0xff]  }
 0x125   :  { %14533 = vmatpush3.bf16.msra.mxu1 %v15917_v39  ;;  %10367 = vmatprep.mubr.bf16.mxu1 %v844_v30  ;;  %v15958_v39 = vld [vmem:[%s20575_s1 + $0xa90] sm:$0xff]  }
 0x126   :  { %14534 = vmatprep.subr.bf16.mxu1 %v15920_v42  ;;  %v15961_v42 = vld [vmem:[%s20575_s1 + $0xad8] sm:$0xff]   ;;  %v15991_v30 = vld [vmem:[%s20575_s1 + $0xb90] sm:$0xff]  }
 0x127   :  { %14513 = vmatpush3.bf16.msra.mxu0 %v15919_v43  ;;  %v15960_v43 = vld [vmem:[%s20575_s1 + $0xa18] sm:$0xff]  }
 0x128   :  { %14514 = vmatprep.subr.bf16.mxu0 %v15922_v45  ;;  %v15963_v45 = vld [vmem:[%s20575_s1 + $0xa60] sm:$0xff]  }
 0x129   :  { %14535 = vmatpush3.bf16.msra.mxu1 %v15921_v44  ;;  %v15962_v44 = vld [vmem:[%s20575_s1 + $0xa98] sm:$0xff]  }
 0x12a   :  { %14536 = vmatprep.subr.bf16.mxu1 %v15924_v46  ;;  %v15965_v46 = vld [vmem:[%s20575_s1 + $0xae0] sm:$0xff]  }
 0x12b   :  { %14515 = vmatpush3.bf16.msra.mxu0 %v15923_v47  ;;  %v15964_v47 = vld [vmem:[%s20575_s1 + $0xa20] sm:$0xff]  }
 0x12c   :  { %14516 = vmatprep.subr.bf16.mxu0 %v15926_v49  ;;  %v15967_v49 = vld [vmem:[%s20575_s1 + $0xa68] sm:$0xff]  }
 0x12d   :  { %14537 = vmatpush3.bf16.msra.mxu1 %v15925_v48  ;;  %v15966_v48 = vld [vmem:[%s20575_s1 + $0xaa0] sm:$0xff]  }
 0x12e   :  { %14538 = vmatprep.subr.bf16.mxu1 %v15928_v50  ;;  %v15969_v50 = vld [vmem:[%s20575_s1 + $0xae8] sm:$0xff]  }
 0x12f   :  { %14517 = vmatpush3.bf16.msra.mxu0 %v15927_v51  ;;  %v15968_v51 = vld [vmem:[%s20575_s1 + $0xa28] sm:$0xff]  }
 0x130   :  { %14518 = vmatprep.subr.bf16.mxu0 %v15930_v53  ;;  %v15971_v53 = vld [vmem:[%s20575_s1 + $0xa70] sm:$0xff]  }
 0x131   :  { %14539 = vmatpush3.bf16.msra.mxu1 %v15929_v52  ;;  %v15970_v52 = vld [vmem:[%s20575_s1 + $0xaa8] sm:$0xff]  }
 0x132   :  { %14540 = vmatprep.subr.bf16.mxu1 %v15932_v54 }
 0x133   :  { %14519 = vmatpush3.bf16.msra.mxu0 %v15931_v55 }
 0x134   :  { %14520 = vmatprep.subr.bf16.mxu0 %v15934_v57  ;;  %v15973_v57 = vld [vmem:[%s20575_s1 + $0xaf0] sm:$0xff]  }
 0x135   :  { %14541 = vmatpush3.bf16.msra.mxu1 %v15933_v56  ;;  %v14218_v63 = vpop.f32.mrb[8].mxu0  ;;  %v15972_v56 = vld [vmem:[%s20575_s1 + $0xa30] sm:$0xff]  }
 0x136   :  { %14542 = vmatprep.subr.bf16.mxu1 %v15936_v58  ;;  %v14219_v2 = vpop.f32.mrb[9].mxu0 }
 0x137   :  { %v14240_v0 = vpop.f32.mrb[8].mxu1  ;;  %v14220_v6 = vadd.f32 %v14219_v2, %v14218_v63  ;;  %v14221_v7 = vpop.f32.mrb[10].mxu0  ;;  %14521 = vmatpush3.bf16.msra.mxu0 %v15935_v59  ;;  %v15977_v2 = vld [vmem:[%s20575_s1 + $0xaf8] sm:$0xff]  }
 0x138   :  { %v14241_v3 = vpop.f32.mrb[9].mxu1  ;;  %v14222_v10 = vpop.f32.mrb[11].mxu0  ;;  %14522 = vmatprep.subr.bf16.mxu0 %v15938_v61 }
 0x139   :  { %v14242_v8 = vadd.f32 %v14241_v3, %v14240_v0  ;;  %14543 = vmatpush3.bf16.msra.mxu1 %v15937_v60  ;;  %v9770_v12 = vadd.f32 %v14220_v6, %v17735_v28  ;;  %v14243_v14 = vpop.f32.mrb[10].mxu1  ;;  %v843_v28 = vpack.c.bf16 %v260_v22, %v260_v22  ;;  %v15974_v60 = vld [vmem:[%s20575_s1 + $0xab0] sm:$0xff]   ;;  %v15975_v0 = vld [vmem:[%s20575_s1 + $0xa78] sm:$0xff]  }
 0x13a   :  { %14544 = vmatprep.subr.bf16.mxu1 %v15940_v62  ;;  %v14244_v17 = vpop.f32.mrb[11].mxu1  ;;  %v15976_v6 = vld [vmem:[%s20575_s1 + $0xa38] sm:$0xff]  }
 0x13b   :  { %v17838_v18 = vadd.f32 %v14242_v8, %v9770_v12  ;;  %14523 = vmatpush3.bf16.msra.mxu0 %v15939_v1 }
 0x13c   :  { %14524 = vmatprep.subr.bf16.mxu0 %v15942_v5 }
 0x13d   :  { %14545 = vmatpush3.bf16.msra.mxu1 %v15941_v4  ;;  %v35_v4 = vld [vmem:[%s20574_s0 + $0x50] sm:$0xff] }
 0x13e   :  { %14546 = vmatprep.subr.bf16.mxu1 %v15944_v9  ;;  %v270_v7 = vrot.slane %v35_v4, %v16926_v41  ;;  %v263_v9 = vcombine.high %v35_v4, %v35_v4 }
 0x13f   :  { %14525 = vmatpush3.bf16.msra.mxu0 %v15943_v16 }
 0x140   :  { %14554 = vmatprep.subr.bf16.mxu0 %v15946_v21  ;;  %v278_v12 = vcombine.high %v270_v7, %v270_v7  ;;  %v277_v14 = vrot.slane %v263_v9, %v16926_v41  ;;  %v845_v17 = vpack.c.bf16 %v270_v7, %v270_v7  ;;  %v15983_v21 = vld [vmem:[%s20575_s1 + $0xb80] sm:$0xff]  }
 0x141   :  { %14547 = vmatpush3.bf16.msra.mxu1 %v15945_v20  ;;  %v16015_v7 = vld [vmem:[%s20575_s1 + $0xcc0] sm:$0xff]  }
 0x142   :  { %14576 = vmatprep.subr.bf16.mxu1 %v15949_v24  ;;  %10328 = vmatmul.mubr.bf16.vlgmr.msra.gmra.mrb[36].mxu0 %v841_v25  ;;  %v846_v16 = vpack.c.bf16 %v278_v12, %v278_v12  ;;  %v847_v20 = vpack.c.bf16 %v277_v14, %v277_v14  ;;  %v15986_v24 = vld [vmem:[%s20575_s1 + $0xbc8] sm:$0xff]  }
 0x143   :  { %14555 = vmatpush3.bf16.msra.mxu0 %v15948_v27  ;;  %v15985_v25 = vld [vmem:[%s20575_s1 + $0xb08] sm:$0xff]   ;;  %v15988_v27 = vld [vmem:[%s20575_s1 + $0xb50] sm:$0xff]  }
 0x144   :  { %10368 = vmatmul.mubr.bf16.vlgmr.msra.gmra.mrb[36].mxu1 %v843_v28  ;;  %14556 = vmatprep.subr.bf16.mxu0 %v15951_v31  ;;  %v15990_v28 = vld [vmem:[%s20575_s1 + $0xbd0] sm:$0xff]   ;;  %v15992_v31 = vld [vmem:[%s20575_s1 + $0xb58] sm:$0xff]  }
 0x145   :  { %14577 = vmatpush3.bf16.msra.mxu1 %v15950_v29  ;;  %10407 = vmatprep.mubr.bf16.mxu0 %v846_v16  ;;  %v15989_v29 = vld [vmem:[%s20575_s1 + $0xb10] sm:$0xff]   ;;  %v16019_v16 = vld [vmem:[%s20575_s1 + $0xcc8] sm:$0xff]  }
 0x146   :  { %14578 = vmatprep.subr.bf16.mxu1 %v15953_v33  ;;  %v15994_v33 = vld [vmem:[%s20575_s1 + $0xbd8] sm:$0xff]  }
 0x147   :  { %14557 = vmatpush3.bf16.msra.mxu0 %v15952_v34  ;;  %v15993_v34 = vld [vmem:[%s20575_s1 + $0xb18] sm:$0xff]  }
 0x148   :  { %14558 = vmatprep.subr.bf16.mxu0 %v15955_v36  ;;  %v15996_v36 = vld [vmem:[%s20575_s1 + $0xb60] sm:$0xff]  }
 0x149   :  { %14579 = vmatpush3.bf16.msra.mxu1 %v15954_v35  ;;  %v15995_v35 = vld [vmem:[%s20575_s1 + $0xb98] sm:$0xff]  }
 0x14a   :  { %14580 = vmatprep.subr.bf16.mxu1 %v15957_v37  ;;  %v15998_v37 = vld [vmem:[%s20575_s1 + $0xbe0] sm:$0xff]  }
 0x14b   :  { %14559 = vmatpush3.bf16.msra.mxu0 %v15956_v38  ;;  %v15997_v38 = vld [vmem:[%s20575_s1 + $0xb20] sm:$0xff]  }
 0x14c   :  { %14560 = vmatprep.subr.bf16.mxu0 %v15959_v40  ;;  %v16000_v40 = vld [vmem:[%s20575_s1 + $0xb68] sm:$0xff]  }
 0x14d   :  { %14581 = vmatpush3.bf16.msra.mxu1 %v15958_v39  ;;  %v15999_v39 = vld [vmem:[%s20575_s1 + $0xba0] sm:$0xff]  }
 0x14e   :  { %14582 = vmatprep.subr.bf16.mxu1 %v15961_v42  ;;  %v16002_v42 = vld [vmem:[%s20575_s1 + $0xbe8] sm:$0xff]  }
 0x14f   :  { %14561 = vmatpush3.bf16.msra.mxu0 %v15960_v43  ;;  %v16001_v43 = vld [vmem:[%s20575_s1 + $0xb28] sm:$0xff]  }
 0x150   :  { %14562 = vmatprep.subr.bf16.mxu0 %v15963_v45  ;;  %v16004_v45 = vld [vmem:[%s20575_s1 + $0xb70] sm:$0xff]  }
 0x151   :  { %14583 = vmatpush3.bf16.msra.mxu1 %v15962_v44  ;;  %v16003_v44 = vld [vmem:[%s20575_s1 + $0xba8] sm:$0xff]  }
 0x152   :  { %14584 = vmatprep.subr.bf16.mxu1 %v15965_v46 }
 0x153   :  { %14563 = vmatpush3.bf16.msra.mxu0 %v15964_v47 }
 0x154   :  { %14564 = vmatprep.subr.bf16.mxu0 %v15967_v49  ;;  %v16006_v49 = vld [vmem:[%s20575_s1 + $0xbf0] sm:$0xff]  }
 0x155   :  { %14585 = vmatpush3.bf16.msra.mxu1 %v15966_v48  ;;  %v14262_v54 = vpop.f32.mrb[12].mxu0  ;;  %v16005_v48 = vld [vmem:[%s20575_s1 + $0xb30] sm:$0xff]  }
 0x156   :  { %14586 = vmatprep.subr.bf16.mxu1 %v15969_v50  ;;  %v14263_v58 = vpop.f32.mrb[13].mxu0 }
 0x157   :  { %v14284_v55 = vpop.f32.mrb[12].mxu1  ;;  %v14264_v61 = vadd.f32 %v14263_v58, %v14262_v54  ;;  %v14265_v62 = vpop.f32.mrb[14].mxu0  ;;  %14565 = vmatpush3.bf16.msra.mxu0 %v15968_v51 }
 0x158   :  { %v14285_v59 = vpop.f32.mrb[13].mxu1  ;;  %v14266_v1 = vpop.f32.mrb[15].mxu0  ;;  %14566 = vmatprep.subr.bf16.mxu0 %v15971_v53  ;;  %v16009_v62 = vld [vmem:[%s20575_s1 + $0xb38] sm:$0xff]  }
 0x159   :  { %v14286_v63 = vadd.f32 %v14285_v59, %v14284_v55  ;;  %14587 = vmatpush3.bf16.msra.mxu1 %v15970_v52  ;;  %v9850_v3 = vadd.f32 %v14264_v61, %v17838_v18  ;;  %v14287_v5 = vpop.f32.mrb[14].mxu1  ;;  %v279_v18 = vcombine.high %v277_v14, %v277_v14  ;;  %v16007_v55 = vld [vmem:[%s20575_s1 + $0xbb0] sm:$0xff]   ;;  %v16010_v59 = vld [vmem:[%s20575_s1 + $0xbf8] sm:$0xff]  }
 0x15a   :  { %14588 = vmatprep.subr.bf16.mxu1 %v15973_v57  ;;  %v14288_v8 = vpop.f32.mrb[15].mxu1  ;;  %v16008_v57 = vld [vmem:[%s20575_s1 + $0xb78] sm:$0xff]   ;;  %v16012_v5 = vld [vmem:[%s20575_s1 + $0xc40] sm:$0xff]  }
 0x15b   :  { %v17942_v10 = vadd.f32 %v14286_v63, %v9850_v3  ;;  %14567 = vmatpush3.bf16.msra.mxu0 %v15972_v56  ;;  %v848_v22 = vpack.c.bf16 %v279_v18, %v279_v18  ;;  %v16011_v3 = vld [vmem:[%s20575_s1 + $0xbb8] sm:$0xff]   ;;  %v16020_v18 = vld [vmem:[%s20575_s1 + $0xc88] sm:$0xff]  }
 0x15c   :  { %14568 = vmatprep.subr.bf16.mxu0 %v15975_v0 }
 0x15d   :  { %14589 = vmatpush3.bf16.msra.mxu1 %v15974_v60  ;;  %10447 = vmatprep.mubr.bf16.mxu1 %v848_v22  ;;  %v36_v60 = vld [vmem:[%s20574_s0 + $0x58] sm:$0xff]  ;;  %v16024_v22 = vld [vmem:[%s20575_s1 + $0xc90] sm:$0xff]  }
 0x15e   :  { %14590 = vmatprep.subr.bf16.mxu1 %v15977_v2  ;;  %v287_v63 = vrot.slane %v36_v60, %v16926_v41  ;;  %v280_v1 = vcombine.high %v36_v60, %v36_v60  ;;  %v16045_v60 = vld [vmem:[%s20575_s1 + $0xd40] sm:$0xff]  }
 0x15f   :  { %14569 = vmatpush3.bf16.msra.mxu0 %v15976_v6 }
 0x160   :  { %14598 = vmatprep.subr.bf16.mxu0 %v15979_v13  ;;  %v295_v4 = vcombine.high %v287_v63, %v287_v63  ;;  %v294_v6 = vrot.slane %v280_v1, %v16926_v41  ;;  %v849_v9 = vpack.c.bf16 %v287_v63, %v287_v63  ;;  %v16016_v13 = vld [vmem:[%s20575_s1 + $0xc80] sm:$0xff]  }
 0x161   :  { %14591 = vmatpush3.bf16.msra.mxu1 %v15978_v11  ;;  %v16014_v11 = vld [vmem:[%s20575_s1 + $0xc00] sm:$0xff]  }
 0x162   :  { %14620 = vmatprep.subr.bf16.mxu1 %v15982_v15  ;;  %10408 = vmatmul.mubr.bf16.vlgmr.msra.gmra.mrb[40].mxu0 %v845_v17  ;;  %v850_v8 = vpack.c.bf16 %v295_v4, %v295_v4  ;;  %v851_v12 = vpack.c.bf16 %v294_v6, %v294_v6  ;;  %v16017_v15 = vld [vmem:[%s20575_s1 + $0xc48] sm:$0xff]   ;;  %v16047_v63 = vld [vmem:[%s20575_s1 + $0xd00] sm:$0xff]  }
 0x163   :  { %14599 = vmatpush3.bf16.msra.mxu0 %v15981_v19  ;;  %v16018_v17 = vld [vmem:[%s20575_s1 + $0xc08] sm:$0xff]   ;;  %v16021_v19 = vld [vmem:[%s20575_s1 + $0xc50] sm:$0xff]   ;;  %v16048_v1 = vld [vmem:[%s20575_s1 + $0xdc0] sm:$0xff]  }
 0x164   :  { %10448 = vmatmul.mubr.bf16.vlgmr.msra.gmra.mrb[40].mxu1 %v847_v20  ;;  %14600 = vmatprep.subr.bf16.mxu0 %v15984_v23  ;;  %v16023_v20 = vld [vmem:[%s20575_s1 + $0xcd0] sm:$0xff]   ;;  %v16025_v23 = vld [vmem:[%s20575_s1 + $0xc58] sm:$0xff]   ;;  %v16049_v4 = vld [vmem:[%s20575_s1 + $0xd80] sm:$0xff]  }
 0x165   :  { %14621 = vmatpush3.bf16.msra.mxu1 %v15983_v21  ;;  %10487 = vmatprep.mubr.bf16.mxu0 %v850_v8  ;;  %v16022_v21 = vld [vmem:[%s20575_s1 + $0xc10] sm:$0xff]   ;;  %v16051_v8 = vld [vmem:[%s20575_s1 + $0xd08] sm:$0xff]  }
 0x166   :  { %14622 = vmatprep.subr.bf16.mxu1 %v15986_v24  ;;  %v16027_v24 = vld [vmem:[%s20575_s1 + $0xcd8] sm:$0xff]  }
 0x167   :  { %14601 = vmatpush3.bf16.msra.mxu0 %v15985_v25  ;;  %v16026_v25 = vld [vmem:[%s20575_s1 + $0xc18] sm:$0xff]  }
 0x168   :  { %14602 = vmatprep.subr.bf16.mxu0 %v15988_v27  ;;  %v16029_v27 = vld [vmem:[%s20575_s1 + $0xc60] sm:$0xff]  }
 0x169   :  { %14623 = vmatpush3.bf16.msra.mxu1 %v15987_v26  ;;  %v16028_v26 = vld [vmem:[%s20575_s1 + $0xc98] sm:$0xff]  }
 0x16a   :  { %14624 = vmatprep.subr.bf16.mxu1 %v15990_v28  ;;  %v16031_v28 = vld [vmem:[%s20575_s1 + $0xce0] sm:$0xff]  }
 0x16b   :  { %14603 = vmatpush3.bf16.msra.mxu0 %v15989_v29  ;;  %v16030_v29 = vld [vmem:[%s20575_s1 + $0xc20] sm:$0xff]  }
 0x16c   :  { %14604 = vmatprep.subr.bf16.mxu0 %v15992_v31  ;;  %v16033_v31 = vld [vmem:[%s20575_s1 + $0xc68] sm:$0xff]  }
 0x16d   :  { %14625 = vmatpush3.bf16.msra.mxu1 %v15991_v30  ;;  %v16032_v30 = vld [vmem:[%s20575_s1 + $0xca0] sm:$0xff]  }
 0x16e   :  { %14626 = vmatprep.subr.bf16.mxu1 %v15994_v33  ;;  %v16035_v33 = vld [vmem:[%s20575_s1 + $0xce8] sm:$0xff]  }
 0x16f   :  { %14605 = vmatpush3.bf16.msra.mxu0 %v15993_v34  ;;  %v16034_v34 = vld [vmem:[%s20575_s1 + $0xc28] sm:$0xff]  }
 0x170   :  { %14606 = vmatprep.subr.bf16.mxu0 %v15996_v36  ;;  %v16037_v36 = vld [vmem:[%s20575_s1 + $0xc70] sm:$0xff]  }
 0x171   :  { %14627 = vmatpush3.bf16.msra.mxu1 %v15995_v35  ;;  %v16036_v35 = vld [vmem:[%s20575_s1 + $0xca8] sm:$0xff]  }
 0x172   :  { %14628 = vmatprep.subr.bf16.mxu1 %v15998_v37 }
 0x173   :  { %14607 = vmatpush3.bf16.msra.mxu0 %v15997_v38 }
 0x174   :  { %14608 = vmatprep.subr.bf16.mxu0 %v16000_v40 }
 0x175   :  { %14629 = vmatpush3.bf16.msra.mxu1 %v15999_v39  ;;  %v14306_v46 = vpop.f32.mrb[16].mxu0 }
 0x176   :  { %14630 = vmatprep.subr.bf16.mxu1 %v16002_v42  ;;  %v14307_v50 = vpop.f32.mrb[17].mxu0  ;;  %v16038_v42 = vld [vmem:[%s20575_s1 + $0xc30] sm:$0xff]  }
 0x177   :  { %v14328_v47 = vpop.f32.mrb[16].mxu1  ;;  %v14308_v52 = vadd.f32 %v14307_v50, %v14306_v46  ;;  %v14309_v53 = vpop.f32.mrb[18].mxu0  ;;  %14609 = vmatpush3.bf16.msra.mxu0 %v16001_v43  ;;  %v16039_v43 = vld [vmem:[%s20575_s1 + $0xcf0] sm:$0xff]  }
 0x178   :  { %v14329_v51 = vpop.f32.mrb[17].mxu1  ;;  %v14310_v56 = vpop.f32.mrb[19].mxu0  ;;  %14610 = vmatprep.subr.bf16.mxu0 %v16004_v45  ;;  %v37_v53 = vld [vmem:[%s20574_s0 + $0x60] sm:$0xff] }
 0x179   :  { %v14330_v54 = vadd.f32 %v14329_v51, %v14328_v47  ;;  %14631 = vmatpush3.bf16.msra.mxu1 %v16003_v44  ;;  %v9930_v58 = vadd.f32 %v14308_v52, %v17942_v10  ;;  %v14331_v61 = vpop.f32.mrb[18].mxu1  ;;  %v296_v10 = vcombine.high %v294_v6, %v294_v6  ;;  %v16040_v47 = vld [vmem:[%s20575_s1 + $0xcb0] sm:$0xff]   ;;  %v16042_v51 = vld [vmem:[%s20575_s1 + $0xc38] sm:$0xff]   ;;  %v304_v56 = vrot.slane %v37_v53, %v16926_v41  ;;  %v16050_v6 = vld [vmem:[%s20575_s1 + $0xd48] sm:$0xff]  }
 0x17a   :  { %14632 = vmatprep.subr.bf16.mxu1 %v16006_v49  ;;  %v14332_v0 = vpop.f32.mrb[19].mxu1  ;;  %v16041_v49 = vld [vmem:[%s20575_s1 + $0xc78] sm:$0xff]  }
 0x17b   :  { %v18046_v2 = vadd.f32 %v14330_v54, %v9930_v58  ;;  %14611 = vmatpush3.bf16.msra.mxu0 %v16005_v48  ;;  %v852_v14 = vpack.c.bf16 %v296_v10, %v296_v10  ;;  %v16043_v52 = vld [vmem:[%s20575_s1 + $0xcf8] sm:$0xff]   ;;  %v312_v61 = vcombine.high %v304_v56, %v304_v56  ;;  %v853_v0 = vpack.c.bf16 %v304_v56, %v304_v56  ;;  %v16053_v10 = vld [vmem:[%s20575_s1 + $0xd88] sm:$0xff]   ;;  %v16081_v56 = vld [vmem:[%s20575_s1 + $0xec0] sm:$0xff]  }
 0x17c   :  { %14612 = vmatprep.subr.bf16.mxu0 %v16008_v57  ;;  %v16044_v57 = vld [vmem:[%s20575_s1 + $0xcb8] sm:$0xff]  }
 0x17d   :  { %14633 = vmatpush3.bf16.msra.mxu1 %v16007_v55  ;;  %10527 = vmatprep.mubr.bf16.mxu1 %v852_v14  ;;  %v16057_v14 = vld [vmem:[%s20575_s1 + $0xd90] sm:$0xff]  }
 0x17e   :  { %14634 = vmatprep.subr.bf16.mxu1 %v16010_v59  ;;  %v297_v59 = vcombine.high %v37_v53, %v37_v53 }
 0x17f   :  { %14613 = vmatpush3.bf16.msra.mxu0 %v16009_v62 }
 0x180   :  { %14642 = vmatprep.subr.bf16.mxu0 %v16012_v5  ;;  %v311_v62 = vrot.slane %v297_v59, %v16926_v41  ;;  %v16080_v59 = vld [vmem:[%s20575_s1 + $0xe00] sm:$0xff]  }
 0x181   :  { %14635 = vmatpush3.bf16.msra.mxu1 %v16011_v3 }
 0x182   :  { %14664 = vmatprep.subr.bf16.mxu1 %v16015_v7  ;;  %10488 = vmatmul.mubr.bf16.vlgmr.msra.gmra.mrb[44].mxu0 %v849_v9  ;;  %v313_v3 = vcombine.high %v311_v62, %v311_v62  ;;  %v855_v5 = vpack.c.bf16 %v311_v62, %v311_v62  ;;  %v16052_v9 = vld [vmem:[%s20575_s1 + $0xdc8] sm:$0xff]  }
 0x183   :  { %14643 = vmatpush3.bf16.msra.mxu0 %v16014_v11  ;;  %v16054_v11 = vld [vmem:[%s20575_s1 + $0xd50] sm:$0xff]  }
 0x184   :  { %10528 = vmatmul.mubr.bf16.vlgmr.msra.gmra.mrb[44].mxu1 %v851_v12  ;;  %14644 = vmatprep.subr.bf16.mxu0 %v16017_v15  ;;  %v856_v7 = vpack.c.bf16 %v313_v3, %v313_v3  ;;  %v16055_v12 = vld [vmem:[%s20575_s1 + $0xd10] sm:$0xff]   ;;  %v16058_v15 = vld [vmem:[%s20575_s1 + $0xd58] sm:$0xff]   ;;  %v16086_v3 = vld [vmem:[%s20575_s1 + $0xe88] sm:$0xff]  }
 0x185   :  { %14665 = vmatpush3.bf16.msra.mxu1 %v16016_v13  ;;  %v16056_v13 = vld [vmem:[%s20575_s1 + $0xdd0] sm:$0xff]  }
 0x186   :  { %14666 = vmatprep.subr.bf16.mxu1 %v16019_v16  ;;  %10607 = vmatprep.mubr.bf16.mxu1 %v856_v7  ;;  %v16059_v16 = vld [vmem:[%s20575_s1 + $0xd18] sm:$0xff]   ;;  %v16090_v7 = vld [vmem:[%s20575_s1 + $0xe90] sm:$0xff]  }
 0x187   :  { %14645 = vmatpush3.bf16.msra.mxu0 %v16018_v17  ;;  %v16060_v17 = vld [vmem:[%s20575_s1 + $0xdd8] sm:$0xff]  }
 0x188   :  { %14646 = vmatprep.subr.bf16.mxu0 %v16021_v19  ;;  %v16062_v19 = vld [vmem:[%s20575_s1 + $0xd60] sm:$0xff]  }
 0x189   :  { %14667 = vmatpush3.bf16.msra.mxu1 %v16020_v18  ;;  %v16061_v18 = vld [vmem:[%s20575_s1 + $0xd98] sm:$0xff]  }
 0x18a   :  { %14668 = vmatprep.subr.bf16.mxu1 %v16023_v20  ;;  %v16063_v20 = vld [vmem:[%s20575_s1 + $0xd20] sm:$0xff]  }
 0x18b   :  { %14647 = vmatpush3.bf16.msra.mxu0 %v16022_v21  ;;  %v16064_v21 = vld [vmem:[%s20575_s1 + $0xde0] sm:$0xff]  }
 0x18c   :  { %14648 = vmatprep.subr.bf16.mxu0 %v16025_v23  ;;  %v16066_v23 = vld [vmem:[%s20575_s1 + $0xd68] sm:$0xff]  }
 0x18d   :  { %14669 = vmatpush3.bf16.msra.mxu1 %v16024_v22  ;;  %v16065_v22 = vld [vmem:[%s20575_s1 + $0xda0] sm:$0xff]  }
 0x18e   :  { %14670 = vmatprep.subr.bf16.mxu1 %v16027_v24  ;;  %v16067_v24 = vld [vmem:[%s20575_s1 + $0xd28] sm:$0xff]  }
 0x18f   :  { %14649 = vmatpush3.bf16.msra.mxu0 %v16026_v25  ;;  %v16068_v25 = vld [vmem:[%s20575_s1 + $0xde8] sm:$0xff]  }
 0x190   :  { %14650 = vmatprep.subr.bf16.mxu0 %v16029_v27  ;;  %v16070_v27 = vld [vmem:[%s20575_s1 + $0xd70] sm:$0xff]  }
 0x191   :  { %14671 = vmatpush3.bf16.msra.mxu1 %v16028_v26  ;;  %v16069_v26 = vld [vmem:[%s20575_s1 + $0xda8] sm:$0xff]  }
 0x192   :  { %14672 = vmatprep.subr.bf16.mxu1 %v16031_v28 }
 0x193   :  { %14651 = vmatpush3.bf16.msra.mxu0 %v16030_v29 }
 0x194   :  { %14652 = vmatprep.subr.bf16.mxu0 %v16033_v31  ;;  %v16072_v31 = vld [vmem:[%s20575_s1 + $0xdf0] sm:$0xff]  }
 0x195   :  { %14673 = vmatpush3.bf16.msra.mxu1 %v16032_v30  ;;  %v14350_v37 = vpop.f32.mrb[20].mxu0  ;;  %v16071_v30 = vld [vmem:[%s20575_s1 + $0xd30] sm:$0xff]  }
 0x196   :  { %14674 = vmatprep.subr.bf16.mxu1 %v16035_v33  ;;  %v14351_v39 = vpop.f32.mrb[21].mxu0 }
 0x197   :  { %v14372_v38 = vpop.f32.mrb[20].mxu1  ;;  %v14352_v44 = vadd.f32 %v14351_v39, %v14350_v37  ;;  %v14353_v45 = vpop.f32.mrb[22].mxu0  ;;  %14653 = vmatpush3.bf16.msra.mxu0 %v16034_v34 }
 0x198   :  { %v14373_v40 = vpop.f32.mrb[21].mxu1  ;;  %v14354_v48 = vpop.f32.mrb[23].mxu0  ;;  %14654 = vmatprep.subr.bf16.mxu0 %v16037_v36  ;;  %v16076_v45 = vld [vmem:[%s20575_s1 + $0xdf8] sm:$0xff]  }
 0x199   :  { %v14374_v46 = vadd.f32 %v14373_v40, %v14372_v38  ;;  %14675 = vmatpush3.bf16.msra.mxu1 %v16036_v35  ;;  %v10010_v50 = vadd.f32 %v14352_v44, %v18046_v2  ;;  %v14375_v54 = vpop.f32.mrb[22].mxu1  ;;  %v854_v2 = vpack.c.bf16 %v312_v61, %v312_v61  ;;  %v16073_v38 = vld [vmem:[%s20575_s1 + $0xdb0] sm:$0xff]   ;;  %v16074_v40 = vld [vmem:[%s20575_s1 + $0xd78] sm:$0xff]   ;;  %v38_v48 = vld [vmem:[%s20574_s0 + $0x68] sm:$0xff] }
 0x19a   :  { %14676 = vmatprep.subr.bf16.mxu1 %v16039_v43  ;;  %v14376_v58 = vpop.f32.mrb[23].mxu1  ;;  %v16075_v43 = vld [vmem:[%s20575_s1 + $0xd38] sm:$0xff]   ;;  %v16083_v61 = vld [vmem:[%s20575_s1 + $0xe48] sm:$0xff]  }
 0x19b   :  { %v18149_v55 = vadd.f32 %v14374_v46, %v10010_v50  ;;  %14655 = vmatpush3.bf16.msra.mxu0 %v16038_v42  ;;  %10567 = vmatprep.mubr.bf16.mxu0 %v854_v2  ;;  %v16077_v50 = vld [vmem:[%s20575_s1 + $0xdb8] sm:$0xff]   ;;  %v16087_v2 = vld [vmem:[%s20575_s1 + $0xe50] sm:$0xff]  }
 0x19c   :  { %14656 = vmatprep.subr.bf16.mxu0 %v16041_v49  ;;  %v321_v49 = vrot.slane %v38_v48, %v16926_v41 }
 0x19d   :  { %14677 = vmatpush3.bf16.msra.mxu1 %v16040_v47 }
 0x19e   :  { %14678 = vmatprep.subr.bf16.mxu1 %v16043_v52  ;;  %v16078_v52 = vld [vmem:[%s20575_s1 + $0xe40] sm:$0xff]   ;;  %v329_v53 = vcombine.high %v321_v49, %v321_v49 }
 0x19f   :  { %14657 = vmatpush3.bf16.msra.mxu0 %v16042_v51  ;;  %v314_v51 = vcombine.high %v38_v48, %v38_v48 }
 0x1a0   :  { %14686 = vmatprep.subr.bf16.mxu0 %v16045_v60 }
 0x1a1   :  { %14679 = vmatpush3.bf16.msra.mxu1 %v16044_v57  ;;  %v328_v54 = vrot.slane %v314_v51, %v16926_v41  ;;  %v858_v57 = vpack.c.bf16 %v329_v53, %v329_v53 }
 0x1a2   :  { %14708 = vmatprep.subr.bf16.mxu1 %v16048_v1  ;;  %10568 = vmatmul.mubr.bf16.vlgmr.msra.gmra.mrb[48].mxu0 %v853_v0  ;;  %v16085_v0 = vld [vmem:[%s20575_s1 + $0xec8] sm:$0xff]  }
 0x1a3   :  { %14687 = vmatpush3.bf16.msra.mxu0 %v16047_v63  ;;  %v330_v58 = vcombine.high %v328_v54, %v328_v54  ;;  %v859_v60 = vpack.c.bf16 %v328_v54, %v328_v54  ;;  %10647 = vmatprep.mubr.bf16.mxu0 %v858_v57  ;;  %v16082_v63 = vld [vmem:[%s20575_s1 + $0xe80] sm:$0xff]   ;;  %v16084_v1 = vld [vmem:[%s20575_s1 + $0xe08] sm:$0xff]  }
 0x1a4   :  { %10608 = vmatmul.mubr.bf16.vlgmr.msra.gmra.mrb[48].mxu1 %v855_v5  ;;  %14688 = vmatprep.subr.bf16.mxu0 %v16050_v6  ;;  %v16088_v5 = vld [vmem:[%s20575_s1 + $0xe10] sm:$0xff]   ;;  %v16091_v6 = vld [vmem:[%s20575_s1 + $0xe58] sm:$0xff]   ;;  %v16116_v54 = vld [vmem:[%s20575_s1 + $0xf48] sm:$0xff]  }
 0x1a5   :  { %14709 = vmatpush3.bf16.msra.mxu1 %v16049_v4  ;;  %v860_v62 = vpack.c.bf16 %v330_v58, %v330_v58  ;;  %v16089_v4 = vld [vmem:[%s20575_s1 + $0xed0] sm:$0xff]   ;;  %v16118_v57 = vld [vmem:[%s20575_s1 + $0xfc8] sm:$0xff]  }
 0x1a6   :  { %14710 = vmatprep.subr.bf16.mxu1 %v16052_v9  ;;  %v16092_v9 = vld [vmem:[%s20575_s1 + $0xe18] sm:$0xff]   ;;  %v16119_v58 = vld [vmem:[%s20575_s1 + $0xf88] sm:$0xff]  }
 0x1a7   :  { %14689 = vmatpush3.bf16.msra.mxu0 %v16051_v8  ;;  %10687 = vmatprep.mubr.bf16.mxu1 %v860_v62  ;;  %v16093_v8 = vld [vmem:[%s20575_s1 + $0xed8] sm:$0xff]   ;;  %v16123_v62 = vld [vmem:[%s20575_s1 + $0xf90] sm:$0xff]  }
 0x1a8   :  { %14690 = vmatprep.subr.bf16.mxu0 %v16054_v11  ;;  %v16094_v11 = vld [vmem:[%s20575_s1 + $0xe98] sm:$0xff]  }
 0x1a9   :  { %14711 = vmatpush3.bf16.msra.mxu1 %v16053_v10  ;;  %v16095_v10 = vld [vmem:[%s20575_s1 + $0xe60] sm:$0xff]  }
 0x1aa   :  { %14712 = vmatprep.subr.bf16.mxu1 %v16056_v13  ;;  %v16096_v13 = vld [vmem:[%s20575_s1 + $0xe20] sm:$0xff]  }
 0x1ab   :  { %14691 = vmatpush3.bf16.msra.mxu0 %v16055_v12  ;;  %v16097_v12 = vld [vmem:[%s20575_s1 + $0xee0] sm:$0xff]  }
 0x1ac   :  { %14692 = vmatprep.subr.bf16.mxu0 %v16058_v15  ;;  %v16098_v15 = vld [vmem:[%s20575_s1 + $0xea0] sm:$0xff]  }
 0x1ad   :  { %14713 = vmatpush3.bf16.msra.mxu1 %v16057_v14  ;;  %v16099_v14 = vld [vmem:[%s20575_s1 + $0xe68] sm:$0xff]  }
 0x1ae   :  { %14714 = vmatprep.subr.bf16.mxu1 %v16060_v17  ;;  %v16100_v17 = vld [vmem:[%s20575_s1 + $0xe28] sm:$0xff]  }
 0x1af   :  { %14693 = vmatpush3.bf16.msra.mxu0 %v16059_v16  ;;  %v16101_v16 = vld [vmem:[%s20575_s1 + $0xee8] sm:$0xff]  }
 0x1b0   :  { %14694 = vmatprep.subr.bf16.mxu0 %v16062_v19 }
 0x1b1   :  { %14715 = vmatpush3.bf16.msra.mxu1 %v16061_v18 }
 0x1b2   :  { %14716 = vmatprep.subr.bf16.mxu1 %v16064_v21  ;;  %v16103_v21 = vld [vmem:[%s20575_s1 + $0xe70] sm:$0xff]  }
 0x1b3   :  { %14695 = vmatpush3.bf16.msra.mxu0 %v16063_v20  ;;  %v16102_v20 = vld [vmem:[%s20575_s1 + $0xea8] sm:$0xff]  }
 0x1b4   :  { %14696 = vmatprep.subr.bf16.mxu0 %v16066_v23 }
 0x1b5   :  { %v14394_v28 = vpop.f32.mrb[24].mxu0  ;;  %14717 = vmatpush3.bf16.msra.mxu1 %v16065_v22 }
 0x1b6   :  { %v14395_v33 = vpop.f32.mrb[25].mxu0  ;;  %14718 = vmatprep.subr.bf16.mxu1 %v16068_v25 }
 0x1b7   :  { %v14416_v29 = vpop.f32.mrb[24].mxu1  ;;  %v14396_v35 = vadd.f32 %v14395_v33, %v14394_v28  ;;  %v14397_v36 = vpop.f32.mrb[26].mxu0  ;;  %14697 = vmatpush3.bf16.msra.mxu0 %v16067_v24  ;;  %v16104_v24 = vld [vmem:[%s20575_s1 + $0xe30] sm:$0xff]   ;;  %v16107_v33 = vld [vmem:[%s20575_s1 + $0xe78] sm:$0xff]  }
 0x1b8   :  { %v14417_v34 = vpop.f32.mrb[25].mxu1  ;;  %v14398_v39 = vpop.f32.mrb[27].mxu0  ;;  %14698 = vmatprep.subr.bf16.mxu0 %v16070_v27  ;;  %v16105_v28 = vld [vmem:[%s20575_s1 + $0xef0] sm:$0xff]  }
 0x1b9   :  { %v14418_v37 = vadd.f32 %v14417_v34, %v14416_v29  ;;  %v10090_v42 = vadd.f32 %v14396_v35, %v18149_v55  ;;  %14719 = vmatpush3.bf16.msra.mxu1 %v16069_v26  ;;  %v14419_v44 = vpop.f32.mrb[26].mxu1  ;;  %v857_v55 = vpack.c.bf16 %v321_v49, %v321_v49  ;;  %v16108_v35 = vld [vmem:[%s20575_s1 + $0xe38] sm:$0xff]   ;;  %v39_v39 = vld [vmem:[%s20574_s0 + $0x70] sm:$0xff]  ;;  %v16114_v49 = vld [vmem:[%s20575_s1 + $0xfc0] sm:$0xff]  }
 0x1ba   :  { %14720 = vmatprep.subr.bf16.mxu1 %v16072_v31  ;;  %v14420_v46 = vpop.f32.mrb[27].mxu1  ;;  %v16111_v44 = vld [vmem:[%s20575_s1 + $0xf40] sm:$0xff]  }
 0x1bb   :  { %v18250_v47 = vadd.f32 %v14418_v37, %v10090_v42  ;;  %14699 = vmatpush3.bf16.msra.mxu0 %v16071_v30  ;;  %v16106_v30 = vld [vmem:[%s20575_s1 + $0xeb0] sm:$0xff]   ;;  %v16110_v42 = vld [vmem:[%s20575_s1 + $0xeb8] sm:$0xff]  }
 0x1bc   :  { %14700 = vmatprep.subr.bf16.mxu0 %v16074_v40  ;;  %v338_v40 = vrot.slane %v39_v39, %v16926_v41 }
 0x1bd   :  { %14721 = vmatpush3.bf16.msra.mxu1 %v16073_v38  ;;  %v16109_v38 = vld [vmem:[%s20575_s1 + $0xef8] sm:$0xff]  }
 0x1be   :  { %14722 = vmatprep.subr.bf16.mxu1 %v16076_v45  ;;  %v346_v45 = vcombine.high %v338_v40, %v338_v40  ;;  %v861_v48 = vpack.c.bf16 %v338_v40, %v338_v40 }
 0x1bf   :  { %14701 = vmatpush3.bf16.msra.mxu0 %v16075_v43  ;;  %v331_v43 = vcombine.high %v39_v39, %v39_v39  ;;  %v16147_v39 = vld [vmem:[%s20575_s1 + $0x10c0] sm:$0xff]  }
 0x1c0   :  { %14730 = vmatprep.subr.bf16.mxu0 %v16078_v52  ;;  %v16115_v52 = vld [vmem:[%s20575_s1 + $0xf80] sm:$0xff]  }
 0x1c1   :  { %14723 = vmatpush3.bf16.msra.mxu1 %v16077_v50  ;;  %v345_v46 = vrot.slane %v331_v43, %v16926_v41  ;;  %v862_v50 = vpack.c.bf16 %v346_v45, %v346_v45  ;;  %v16146_v43 = vld [vmem:[%s20575_s1 + $0x1000] sm:$0xff]   ;;  %v16149_v45 = vld [vmem:[%s20575_s1 + $0x1048] sm:$0xff]  }
 0x1c2   :  { %14752 = vmatprep.subr.bf16.mxu1 %v16081_v56  ;;  %10648 = vmatmul.mubr.bf16.vlgmr.msra.gmra.mrb[52].mxu0 %v857_v55  ;;  %v16117_v56 = vld [vmem:[%s20575_s1 + $0xf08] sm:$0xff]  }
 0x1c3   :  { %14731 = vmatpush3.bf16.msra.mxu0 %v16080_v59  ;;  %v347_v51 = vcombine.high %v345_v46, %v345_v46  ;;  %v863_v53 = vpack.c.bf16 %v345_v46, %v345_v46  ;;  %10727 = vmatprep.mubr.bf16.mxu0 %v862_v50  ;;  %v16120_v59 = vld [vmem:[%s20575_s1 + $0xf50] sm:$0xff]  }
 0x1c4   :  { %10688 = vmatmul.mubr.bf16.vlgmr.msra.gmra.mrb[52].mxu1 %v859_v60  ;;  %14732 = vmatprep.subr.bf16.mxu0 %v16083_v61  ;;  %v16121_v60 = vld [vmem:[%s20575_s1 + $0xf10] sm:$0xff]  }
 0x1c5   :  { %14753 = vmatpush3.bf16.msra.mxu1 %v16082_v63  ;;  %v864_v55 = vpack.c.bf16 %v347_v51, %v347_v51  ;;  %v16122_v61 = vld [vmem:[%s20575_s1 + $0xfd0] sm:$0xff]   ;;  %v16124_v63 = vld [vmem:[%s20575_s1 + $0xf58] sm:$0xff]   ;;  %v16152_v51 = vld [vmem:[%s20575_s1 + $0x1088] sm:$0xff]  }
 0x1c6   :  { %14754 = vmatprep.subr.bf16.mxu1 %v16085_v0  ;;  %v16125_v0 = vld [vmem:[%s20575_s1 + $0xf18] sm:$0xff]   ;;  %v16153_v50 = vld [vmem:[%s20575_s1 + $0x1050] sm:$0xff]  }
 0x1c7   :  { %14733 = vmatpush3.bf16.msra.mxu0 %v16084_v1  ;;  %10767 = vmatprep.mubr.bf16.mxu1 %v864_v55  ;;  %v16126_v1 = vld [vmem:[%s20575_s1 + $0xfd8] sm:$0xff]   ;;  %v16156_v55 = vld [vmem:[%s20575_s1 + $0x1090] sm:$0xff]  }
 0x1c8   :  { %14734 = vmatprep.subr.bf16.mxu0 %v16087_v2  ;;  %v16127_v2 = vld [vmem:[%s20575_s1 + $0xf98] sm:$0xff]  }
 0x1c9   :  { %14755 = vmatpush3.bf16.msra.mxu1 %v16086_v3  ;;  %v16128_v3 = vld [vmem:[%s20575_s1 + $0xf60] sm:$0xff]  }
 0x1ca   :  { %14756 = vmatprep.subr.bf16.mxu1 %v16089_v4  ;;  %v16129_v4 = vld [vmem:[%s20575_s1 + $0xf20] sm:$0xff]  }
 0x1cb   :  { %14735 = vmatpush3.bf16.msra.mxu0 %v16088_v5  ;;  %v16130_v5 = vld [vmem:[%s20575_s1 + $0xfe0] sm:$0xff]  }
 0x1cc   :  { %14736 = vmatprep.subr.bf16.mxu0 %v16091_v6  ;;  %v16131_v6 = vld [vmem:[%s20575_s1 + $0xfa0] sm:$0xff]  }
 0x1cd   :  { %14757 = vmatpush3.bf16.msra.mxu1 %v16090_v7  ;;  %v16132_v7 = vld [vmem:[%s20575_s1 + $0xf68] sm:$0xff]  }
 0x1ce   :  { %14758 = vmatprep.subr.bf16.mxu1 %v16093_v8  ;;  %v16133_v8 = vld [vmem:[%s20575_s1 + $0xf28] sm:$0xff]  }
 0x1cf   :  { %14737 = vmatpush3.bf16.msra.mxu0 %v16092_v9  ;;  %v16134_v9 = vld [vmem:[%s20575_s1 + $0xfe8] sm:$0xff]  }
 0x1d0   :  { %14738 = vmatprep.subr.bf16.mxu0 %v16095_v10  ;;  %v16135_v10 = vld [vmem:[%s20575_s1 + $0xfa8] sm:$0xff]  }
 0x1d1   :  { %14759 = vmatpush3.bf16.msra.mxu1 %v16094_v11 }
 0x1d2   :  { %14760 = vmatprep.subr.bf16.mxu1 %v16097_v12 }
 0x1d3   :  { %14739 = vmatpush3.bf16.msra.mxu0 %v16096_v13 }
 0x1d4   :  { %14740 = vmatprep.subr.bf16.mxu0 %v16099_v14 }
 0x1d5   :  { %v14438_v18 = vpop.f32.mrb[28].mxu0  ;;  %14761 = vmatpush3.bf16.msra.mxu1 %v16098_v15  ;;  %v16136_v15 = vld [vmem:[%s20575_s1 + $0xf70] sm:$0xff]  }
 0x1d6   :  { %v14439_v22 = vpop.f32.mrb[29].mxu0  ;;  %14762 = vmatprep.subr.bf16.mxu1 %v16101_v16  ;;  %v16137_v16 = vld [vmem:[%s20575_s1 + $0xf30] sm:$0xff]  }
 0x1d7   :  { %v14460_v19 = vpop.f32.mrb[28].mxu1  ;;  %v14440_v25 = vadd.f32 %v14439_v22, %v14438_v18  ;;  %v14441_v26 = vpop.f32.mrb[30].mxu0  ;;  %14741 = vmatpush3.bf16.msra.mxu0 %v16100_v17  ;;  %v16139_v22 = vld [vmem:[%s20575_s1 + $0xfb0] sm:$0xff]  }
 0x1d8   :  { %v14461_v23 = vpop.f32.mrb[29].mxu1  ;;  %v14442_v29 = vpop.f32.mrb[31].mxu0  ;;  %14742 = vmatprep.subr.bf16.mxu0 %v16103_v21 }
 0x1d9   :  { %v14462_v27 = vadd.f32 %v14461_v23, %v14460_v19  ;;  %v10170_v31 = vadd.f32 %v14440_v25, %v18250_v47  ;;  %v14463_v34 = vpop.f32.mrb[30].mxu1  ;;  %14763 = vmatpush3.bf16.msra.mxu1 %v16102_v20  ;;  %v16113_v47 = vld [vmem:[%s20575_s1 + $0xf00] sm:$0xff]   ;;  %v16138_v20 = vld [vmem:[%s20575_s1 + $0xff0] sm:$0xff]   ;;  %v16142_v29 = vld [vmem:[%s20575_s1 + $0xff8] sm:$0xff]  }
 0x1da   :  { %v14464_v36 = vpop.f32.mrb[31].mxu1  ;;  %14764 = vmatprep.subr.bf16.mxu1 %v16105_v28 }
 0x1db   :  { %v18351_v37 = vadd.f32 %v14462_v27, %v10170_v31  ;;  %14743 = vmatpush3.bf16.msra.mxu0 %v16104_v24  ;;  %v16140_v24 = vld [vmem:[%s20575_s1 + $0xf78] sm:$0xff]  }
 0x1dc   :  { %14744 = vmatprep.subr.bf16.mxu0 %v16107_v33  ;;  %v16141_v27 = vld [vmem:[%s20575_s1 + $0xf38] sm:$0xff]  }
 0x1dd   :  { %14765 = vmatpush3.bf16.msra.mxu1 %v16106_v30  ;;  %v40_v30 = vld [vmem:[%s20574_s0 + $0x78] sm:$0xff] }
 0x1de   :  { %14766 = vmatprep.subr.bf16.mxu1 %v16109_v38  ;;  %v355_v31 = vrot.slane %v40_v30, %v16926_v41  ;;  %v16143_v33 = vld [vmem:[%s20575_s1 + $0xfb8] sm:$0xff]   ;;  %v348_v34 = vcombine.high %v40_v30, %v40_v30 }
 0x1df   :  { %14745 = vmatpush3.bf16.msra.mxu0 %v16108_v35  ;;  %v16144_v35 = vld [vmem:[%s20575_s1 + $0x1040] sm:$0xff]  }
 0x1e0   :  { %14774 = vmatprep.subr.bf16.mxu0 %v16111_v44  ;;  %v363_v36 = vcombine.high %v355_v31, %v355_v31  ;;  %v865_v38 = vpack.c.bf16 %v355_v31, %v355_v31  ;;  %v16180_v31 = vld [vmem:[%s20575_s1 + $0x11c0] sm:$0xff]  }
 0x1e1   :  { %14767 = vmatpush3.bf16.msra.mxu1 %v16110_v42 }
 0x1e2   :  { %10728 = vmatmul.mubr.bf16.vlgmr.msra.gmra.mrb[56].mxu0 %v861_v48  ;;  %14796 = vmatprep.subr.bf16.mxu1 %v16114_v49  ;;  %v866_v40 = vpack.c.bf16 %v363_v36, %v363_v36  ;;  %v16151_v48 = vld [vmem:[%s20575_s1 + $0x10c8] sm:$0xff]  }
 0x1e3   :  { %14775 = vmatpush3.bf16.msra.mxu0 %v16113_v47  ;;  %v16148_v47 = vld [vmem:[%s20575_s1 + $0x1080] sm:$0xff]   ;;  %v16150_v49 = vld [vmem:[%s20575_s1 + $0x1008] sm:$0xff]  }
 0x1e4   :  { %10768 = vmatmul.mubr.bf16.vlgmr.msra.gmra.mrb[56].mxu1 %v863_v53  ;;  %14776 = vmatprep.subr.bf16.mxu0 %v16116_v54  ;;  %v16154_v53 = vld [vmem:[%s20575_s1 + $0x1010] sm:$0xff]   ;;  %v16157_v54 = vld [vmem:[%s20575_s1 + $0x1058] sm:$0xff]  }
 0x1e5   :  { %14797 = vmatpush3.bf16.msra.mxu1 %v16115_v52  ;;  %10807 = vmatprep.mubr.bf16.mxu0 %v866_v40  ;;  %v16155_v52 = vld [vmem:[%s20575_s1 + $0x10d0] sm:$0xff]   ;;  %v16184_v40 = vld [vmem:[%s20575_s1 + $0x11c8] sm:$0xff]  }
 0x1e6   :  { %14798 = vmatprep.subr.bf16.mxu1 %v16118_v57  ;;  %v16158_v57 = vld [vmem:[%s20575_s1 + $0x1018] sm:$0xff]  }
 0x1e7   :  { %14777 = vmatpush3.bf16.msra.mxu0 %v16117_v56  ;;  %v16159_v56 = vld [vmem:[%s20575_s1 + $0x10d8] sm:$0xff]  }
 0x1e8   :  { %14778 = vmatprep.subr.bf16.mxu0 %v16120_v59  ;;  %v16160_v59 = vld [vmem:[%s20575_s1 + $0x1098] sm:$0xff]  }
 0x1e9   :  { %14799 = vmatpush3.bf16.msra.mxu1 %v16119_v58  ;;  %v16161_v58 = vld [vmem:[%s20575_s1 + $0x1060] sm:$0xff]  }
 0x1ea   :  { %14800 = vmatprep.subr.bf16.mxu1 %v16122_v61  ;;  %v16162_v61 = vld [vmem:[%s20575_s1 + $0x1020] sm:$0xff]  }
 0x1eb   :  { %14779 = vmatpush3.bf16.msra.mxu0 %v16121_v60  ;;  %v16163_v60 = vld [vmem:[%s20575_s1 + $0x10e0] sm:$0xff]  }
 0x1ec   :  { %14780 = vmatprep.subr.bf16.mxu0 %v16124_v63  ;;  %v16164_v63 = vld [vmem:[%s20575_s1 + $0x10a0] sm:$0xff]  }
 0x1ed   :  { %14801 = vmatpush3.bf16.msra.mxu1 %v16123_v62  ;;  %v16165_v62 = vld [vmem:[%s20575_s1 + $0x1068] sm:$0xff]  }
 0x1ee   :  { %14802 = vmatprep.subr.bf16.mxu1 %v16126_v1 }
 0x1ef   :  { %14781 = vmatpush3.bf16.msra.mxu0 %v16125_v0  ;;  %v16167_v0 = vld [vmem:[%s20575_s1 + $0x10e8] sm:$0xff]  }
 0x1f0   :  { %14782 = vmatprep.subr.bf16.mxu0 %v16128_v3 }
 0x1f1   :  { %14803 = vmatpush3.bf16.msra.mxu1 %v16127_v2  ;;  %v16166_v2 = vld [vmem:[%s20575_s1 + $0x1028] sm:$0xff]  }
 0x1f2   :  { %14804 = vmatprep.subr.bf16.mxu1 %v16130_v5  ;;  %v16168_v5 = vld [vmem:[%s20575_s1 + $0x10a8] sm:$0xff]  }
 0x1f3   :  { %14783 = vmatpush3.bf16.msra.mxu0 %v16129_v4 }
 0x1f4   :  { %14784 = vmatprep.subr.bf16.mxu0 %v16132_v7 }
 0x1f5   :  { %v14482_v11 = vpop.f32.mrb[32].mxu0  ;;  %14805 = vmatpush3.bf16.msra.mxu1 %v16131_v6  ;;  %v16169_v6 = vld [vmem:[%s20575_s1 + $0x1070] sm:$0xff]  }
 0x1f6   :  { %v14483_v13 = vpop.f32.mrb[33].mxu0  ;;  %14806 = vmatprep.subr.bf16.mxu1 %v16134_v9 }
 0x1f7   :  { %v14504_v12 = vpop.f32.mrb[32].mxu1  ;;  %v14484_v17 = vadd.f32 %v14483_v13, %v14482_v11  ;;  %v14485_v18 = vpop.f32.mrb[34].mxu0  ;;  %14785 = vmatpush3.bf16.msra.mxu0 %v16133_v8  ;;  %v16171_v13 = vld [vmem:[%s20575_s1 + $0x10f0] sm:$0xff]  }
 0x1f8   :  { %v14505_v14 = vpop.f32.mrb[33].mxu1  ;;  %v14486_v21 = vpop.f32.mrb[35].mxu0  ;;  %14786 = vmatprep.subr.bf16.mxu0 %v16136_v15  ;;  %v16172_v15 = vld [vmem:[%s20575_s1 + $0x10b0] sm:$0xff]  }
 0x1f9   :  { %v14506_v19 = vadd.f32 %v14505_v14, %v14504_v12  ;;  %v10250_v23 = vadd.f32 %v14484_v17, %v18351_v37  ;;  %14807 = vmatpush3.bf16.msra.mxu1 %v16135_v10  ;;  %v14507_v25 = vpop.f32.mrb[34].mxu1  ;;  %v362_v37 = vrot.slane %v348_v34, %v16926_v41  ;;  %v16170_v10 = vld [vmem:[%s20575_s1 + $0x1030] sm:$0xff]   ;;  %v16173_v17 = vld [vmem:[%s20575_s1 + $0x1078] sm:$0xff]  }
 0x1fa   :  { %14808 = vmatprep.subr.bf16.mxu1 %v16138_v20  ;;  %v14508_v28 = vpop.f32.mrb[35].mxu1  ;;  %v16174_v20 = vld [vmem:[%s20575_s1 + $0x1038] sm:$0xff]  }
 0x1fb   :  { %v18452_v26 = vadd.f32 %v14506_v19, %v10250_v23  ;;  %14787 = vmatpush3.bf16.msra.mxu0 %v16137_v16  ;;  %v364_v42 = vcombine.high %v362_v37, %v362_v37  ;;  %v867_v44 = vpack.c.bf16 %v362_v37, %v362_v37  ;;  %v16175_v21 = vld [vmem:[%s20575_s1 + $0x10f8] sm:$0xff]   ;;  %v16182_v37 = vld [vmem:[%s20575_s1 + $0x1148] sm:$0xff]  }
 0x1fc   :  { %14788 = vmatprep.subr.bf16.mxu0 %v16140_v24  ;;  %v16176_v24 = vld [vmem:[%s20575_s1 + $0x10b8] sm:$0xff]  }
 0x1fd   :  { %14809 = vmatpush3.bf16.msra.mxu1 %v16139_v22  ;;  %v868_v46 = vpack.c.bf16 %v364_v42, %v364_v42  ;;  %v41_v22 = vld [vmem:[%s20574_s0 + $0x80] sm:$0xff]  ;;  %v16185_v42 = vld [vmem:[%s20575_s1 + $0x1188] sm:$0xff]  }
 0x1fe   :  { %14810 = vmatprep.subr.bf16.mxu1 %v16142_v29  ;;  %v372_v23 = vrot.slane %v41_v22, %v16926_v41  ;;  %v365_v25 = vcombine.high %v41_v22, %v41_v22  ;;  %v16179_v29 = vld [vmem:[%s20575_s1 + $0x1100] sm:$0xff]  }
 0x1ff   :  { %14789 = vmatpush3.bf16.msra.mxu0 %v16141_v27  ;;  %10847 = vmatprep.mubr.bf16.mxu1 %v868_v46  ;;  %v16189_v46 = vld [vmem:[%s20575_s1 + $0x1190] sm:$0xff]  }
 0x200   :  { %14818 = vmatprep.subr.bf16.mxu0 %v16144_v35  ;;  %v380_v27 = vcombine.high %v372_v23, %v372_v23  ;;  %v379_v28 = vrot.slane %v365_v25, %v16926_v41  ;;  %v869_v30 = vpack.c.bf16 %v372_v23, %v372_v23  ;;  %v16181_v35 = vld [vmem:[%s20575_s1 + $0x1180] sm:$0xff]  }
 0x201   :  { %14811 = vmatpush3.bf16.msra.mxu1 %v16143_v33  ;;  %v16213_v23 = vld [vmem:[%s20575_s1 + $0x12c0] sm:$0xff]  }
 0x202   :  { %14840 = vmatprep.subr.bf16.mxu1 %v16147_v39  ;;  %10808 = vmatmul.mubr.bf16.vlgmr.msra.gmra.mrb[60].mxu0 %v865_v38  ;;  %v870_v33 = vpack.c.bf16 %v380_v27, %v380_v27  ;;  %v381_v34 = vcombine.high %v379_v28, %v379_v28  ;;  %v871_v36 = vpack.c.bf16 %v379_v28, %v379_v28  ;;  %v16183_v39 = vld [vmem:[%s20575_s1 + $0x1108] sm:$0xff]  }
 0x203   :  { %14819 = vmatpush3.bf16.msra.mxu0 %v16146_v43  ;;  %v16186_v43 = vld [vmem:[%s20575_s1 + $0x1150] sm:$0xff]   ;;  %v16215_v28 = vld [vmem:[%s20575_s1 + $0x1248] sm:$0xff]  }
 0x204   :  { %10848 = vmatmul.mubr.bf16.vlgmr.msra.gmra.mrb[60].mxu1 %v867_v44  ;;  %14820 = vmatprep.subr.bf16.mxu0 %v16149_v45  ;;  %v872_v38 = vpack.c.bf16 %v381_v34, %v381_v34  ;;  %v16187_v44 = vld [vmem:[%s20575_s1 + $0x1110] sm:$0xff]  }
 0x205   :  { %14841 = vmatpush3.bf16.msra.mxu1 %v16148_v47  ;;  %10887 = vmatprep.mubr.bf16.mxu0 %v870_v33  ;;  %v16188_v45 = vld [vmem:[%s20575_s1 + $0x11d0] sm:$0xff]   ;;  %v16190_v47 = vld [vmem:[%s20575_s1 + $0x1158] sm:$0xff]   ;;  %v16218_v33 = vld [vmem:[%s20575_s1 + $0x1288] sm:$0xff]  }
 0x206   :  { %14842 = vmatprep.subr.bf16.mxu1 %v16151_v48  ;;  %10927 = vmatprep.mubr.bf16.mxu1 %v872_v38  ;;  %v16191_v48 = vld [vmem:[%s20575_s1 + $0x1118] sm:$0xff]   ;;  %v16219_v34 = vld [vmem:[%s20575_s1 + $0x1250] sm:$0xff]  }
 0x207   :  { %14821 = vmatpush3.bf16.msra.mxu0 %v16150_v49  ;;  %v16192_v49 = vld [vmem:[%s20575_s1 + $0x11d8] sm:$0xff]  }
 0x208   :  { %14822 = vmatprep.subr.bf16.mxu0 %v16153_v50  ;;  %v16193_v50 = vld [vmem:[%s20575_s1 + $0x1198] sm:$0xff]  }
 0x209   :  { %14843 = vmatpush3.bf16.msra.mxu1 %v16152_v51  ;;  %v16194_v51 = vld [vmem:[%s20575_s1 + $0x1160] sm:$0xff]   ;;  %v16223_v38 = vld [vmem:[%s20575_s1 + $0x1258] sm:$0xff]  }
 0x20a   :  { %14844 = vmatprep.subr.bf16.mxu1 %v16155_v52  ;;  %v16195_v52 = vld [vmem:[%s20575_s1 + $0x1120] sm:$0xff]  }
 0x20b   :  { %14823 = vmatpush3.bf16.msra.mxu0 %v16154_v53  ;;  %v16196_v53 = vld [vmem:[%s20575_s1 + $0x11e0] sm:$0xff]  }
 0x20c   :  { %14824 = vmatprep.subr.bf16.mxu0 %v16157_v54  ;;  %v16197_v54 = vld [vmem:[%s20575_s1 + $0x11a0] sm:$0xff]  }
 0x20d   :  { %14845 = vmatpush3.bf16.msra.mxu1 %v16156_v55  ;;  %v16198_v55 = vld [vmem:[%s20575_s1 + $0x1168] sm:$0xff]  }
 0x20e   :  { %14846 = vmatprep.subr.bf16.mxu1 %v16159_v56  ;;  %v16199_v56 = vld [vmem:[%s20575_s1 + $0x1128] sm:$0xff]  }
 0x20f   :  { %14825 = vmatpush3.bf16.msra.mxu0 %v16158_v57 }
 0x210   :  { %14826 = vmatprep.subr.bf16.mxu0 %v16161_v58  ;;  %v16200_v58 = vld [vmem:[%s20575_s1 + $0x11e8] sm:$0xff]  }
 0x211   :  { %14847 = vmatpush3.bf16.msra.mxu1 %v16160_v59 }
 0x212   :  { %14848 = vmatprep.subr.bf16.mxu1 %v16163_v60 }
 0x213   :  { %14827 = vmatpush3.bf16.msra.mxu0 %v16162_v61  ;;  %v16201_v61 = vld [vmem:[%s20575_s1 + $0x11a8] sm:$0xff]  }
 0x214   :  { %14828 = vmatprep.subr.bf16.mxu0 %v16165_v62  ;;  %v16202_v62 = vld [vmem:[%s20575_s1 + $0x1170] sm:$0xff]  }
 0x215   :  { %v14526_v1 = vpop.f32.mrb[36].mxu0  ;;  %14849 = vmatpush3.bf16.msra.mxu1 %v16164_v63 }
 0x216   :  { %v14527_v3 = vpop.f32.mrb[37].mxu0  ;;  %14850 = vmatprep.subr.bf16.mxu1 %v16167_v0 }
 0x217   :  { %v14548_v4 = vpop.f32.mrb[36].mxu1  ;;  %v14528_v7 = vadd.f32 %v14527_v3, %v14526_v1  ;;  %v14529_v8 = vpop.f32.mrb[38].mxu0  ;;  %14829 = vmatpush3.bf16.msra.mxu0 %v16166_v2 }
 0x218   :  { %v14549_v9 = vpop.f32.mrb[37].mxu1  ;;  %v14530_v11 = vpop.f32.mrb[39].mxu0  ;;  %14830 = vmatprep.subr.bf16.mxu0 %v16169_v6  ;;  %v16204_v6 = vld [vmem:[%s20575_s1 + $0x11f0] sm:$0xff]  }
 0x219   :  { %v14550_v12 = vadd.f32 %v14549_v9, %v14548_v4  ;;  %v10330_v14 = vadd.f32 %v14528_v7, %v18452_v26  ;;  %v14551_v16 = vpop.f32.mrb[38].mxu1  ;;  %14851 = vmatpush3.bf16.msra.mxu1 %v16168_v5  ;;  %v16177_v26 = vld [vmem:[%s20575_s1 + $0x1140] sm:$0xff]   ;;  %v16203_v4 = vld [vmem:[%s20575_s1 + $0x1130] sm:$0xff]   ;;  %v16206_v11 = vld [vmem:[%s20575_s1 + $0x1178] sm:$0xff]  }
 0x21a   :  { %v14552_v18 = vpop.f32.mrb[39].mxu1  ;;  %14852 = vmatprep.subr.bf16.mxu1 %v16171_v13  ;;  %v16205_v8 = vld [vmem:[%s20575_s1 + $0x11b0] sm:$0xff]   ;;  %v16208_v13 = vld [vmem:[%s20575_s1 + $0x11f8] sm:$0xff]  }
 0x21b   :  { %v18556_v19 = vadd.f32 %v14550_v12, %v10330_v14  ;;  %14831 = vmatpush3.bf16.msra.mxu0 %v16170_v10  ;;  %v16207_v12 = vld [vmem:[%s20575_s1 + $0x1138] sm:$0xff]   ;;  %v42_v14 = vld [vmem:[%s20574_s0 + $0x88] sm:$0xff]  ;;  %v16210_v18 = vld [vmem:[%s20575_s1 + $0x1240] sm:$0xff]  }
 0x21c   :  { %14832 = vmatprep.subr.bf16.mxu0 %v16173_v17  ;;  %v16209_v16 = vld [vmem:[%s20575_s1 + $0x11b8] sm:$0xff]   ;;  %v382_v17 = vcombine.high %v42_v14, %v42_v14 }
 0x21d   :  { %14853 = vmatpush3.bf16.msra.mxu1 %v16172_v15  ;;  %v389_v15 = vrot.slane %v42_v14, %v16926_v41 }
 0x21e   :  { %14854 = vmatprep.subr.bf16.mxu1 %v16175_v21  ;;  %v16212_v21 = vld [vmem:[%s20575_s1 + $0x1200] sm:$0xff]  }
 0x21f   :  { %14833 = vmatpush3.bf16.msra.mxu0 %v16174_v20  ;;  %v396_v20 = vrot.slane %v382_v17, %v16926_v41  ;;  %v873_v22 = vpack.c.bf16 %v389_v15, %v389_v15 }
 0x220   :  { %14862 = vmatprep.subr.bf16.mxu0 %v16177_v26  ;;  %v16214_v26 = vld [vmem:[%s20575_s1 + $0x1280] sm:$0xff]  }
 0x221   :  { %14855 = vmatpush3.bf16.msra.mxu1 %v16176_v24  ;;  %v398_v25 = vcombine.high %v396_v20, %v396_v20  ;;  %v875_v27 = vpack.c.bf16 %v396_v20, %v396_v20  ;;  %v16248_v20 = vld [vmem:[%s20575_s1 + $0x1348] sm:$0xff]  }
 0x222   :  { %14884 = vmatprep.subr.bf16.mxu1 %v16180_v31  ;;  %10888 = vmatmul.mubr.bf16.vlgmr.msra.gmra.mrb[64].mxu0 %v869_v30  ;;  %v16216_v30 = vld [vmem:[%s20575_s1 + $0x1208] sm:$0xff]  }
 0x223   :  { %14863 = vmatpush3.bf16.msra.mxu0 %v16179_v29  ;;  %v876_v29 = vpack.c.bf16 %v398_v25, %v398_v25  ;;  %v16217_v31 = vld [vmem:[%s20575_s1 + $0x12c8] sm:$0xff]   ;;  %v16252_v25 = vld [vmem:[%s20575_s1 + $0x1350] sm:$0xff]  }
 0x224   :  { %10928 = vmatmul.mubr.bf16.vlgmr.msra.gmra.mrb[64].mxu1 %v871_v36  ;;  %14864 = vmatprep.subr.bf16.mxu0 %v16182_v37  ;;  %v16221_v36 = vld [vmem:[%s20575_s1 + $0x12d0] sm:$0xff]  }
 0x225   :  { %14885 = vmatpush3.bf16.msra.mxu1 %v16181_v35  ;;  %11007 = vmatprep.mubr.bf16.mxu1 %v876_v29  ;;  %v16220_v35 = vld [vmem:[%s20575_s1 + $0x1210] sm:$0xff]   ;;  %v16256_v29 = vld [vmem:[%s20575_s1 + $0x1358] sm:$0xff]  }
 0x226   :  { %14886 = vmatprep.subr.bf16.mxu1 %v16184_v40  ;;  %v16222_v37 = vld [vmem:[%s20575_s1 + $0x1290] sm:$0xff]   ;;  %v16225_v40 = vld [vmem:[%s20575_s1 + $0x12d8] sm:$0xff]  }
 0x227   :  { %14865 = vmatpush3.bf16.msra.mxu0 %v16183_v39  ;;  %v16224_v39 = vld [vmem:[%s20575_s1 + $0x1218] sm:$0xff]  }
 0x228   :  { %14866 = vmatprep.subr.bf16.mxu0 %v16186_v43  ;;  %v16227_v43 = vld [vmem:[%s20575_s1 + $0x1260] sm:$0xff]  }
 0x229   :  { %14887 = vmatpush3.bf16.msra.mxu1 %v16185_v42  ;;  %v16226_v42 = vld [vmem:[%s20575_s1 + $0x1298] sm:$0xff]  }
 0x22a   :  { %14888 = vmatprep.subr.bf16.mxu1 %v16188_v45  ;;  %v16229_v45 = vld [vmem:[%s20575_s1 + $0x12e0] sm:$0xff]  }
 0x22b   :  { %14867 = vmatpush3.bf16.msra.mxu0 %v16187_v44  ;;  %v16228_v44 = vld [vmem:[%s20575_s1 + $0x1220] sm:$0xff]  }
 0x22c   :  { %14868 = vmatprep.subr.bf16.mxu0 %v16190_v47  ;;  %v16231_v47 = vld [vmem:[%s20575_s1 + $0x1268] sm:$0xff]  }
 0x22d   :  { %14889 = vmatpush3.bf16.msra.mxu1 %v16189_v46  ;;  %v16230_v46 = vld [vmem:[%s20575_s1 + $0x12a0] sm:$0xff]  }
 0x22e   :  { %14890 = vmatprep.subr.bf16.mxu1 %v16192_v49 }
 0x22f   :  { %14869 = vmatpush3.bf16.msra.mxu0 %v16191_v48  ;;  %v16232_v48 = vld [vmem:[%s20575_s1 + $0x1228] sm:$0xff]  }
 0x230   :  { %14870 = vmatprep.subr.bf16.mxu0 %v16194_v51 }
 0x231   :  { %14891 = vmatpush3.bf16.msra.mxu1 %v16193_v50  ;;  %v16233_v50 = vld [vmem:[%s20575_s1 + $0x12e8] sm:$0xff]  }
 0x232   :  { %14892 = vmatprep.subr.bf16.mxu1 %v16196_v53 }
 0x233   :  { %14871 = vmatpush3.bf16.msra.mxu0 %v16195_v52 }
 0x234   :  { %14872 = vmatprep.subr.bf16.mxu0 %v16198_v55 }
 0x235   :  { %v14570_v57 = vpop.f32.mrb[40].mxu0  ;;  %14893 = vmatpush3.bf16.msra.mxu1 %v16197_v54 }
 0x236   :  { %v14571_v59 = vpop.f32.mrb[41].mxu0  ;;  %14894 = vmatprep.subr.bf16.mxu1 %v16200_v58 }
 0x237   :  { %v14592_v60 = vpop.f32.mrb[40].mxu1  ;;  %v14572_v63 = vadd.f32 %v14571_v59, %v14570_v57  ;;  %v14573_v0 = vpop.f32.mrb[42].mxu0  ;;  %14873 = vmatpush3.bf16.msra.mxu0 %v16199_v56  ;;  %v16234_v56 = vld [vmem:[%s20575_s1 + $0x12a8] sm:$0xff]   ;;  %v16235_v57 = vld [vmem:[%s20575_s1 + $0x1270] sm:$0xff]  }
 0x238   :  { %v14593_v1 = vpop.f32.mrb[41].mxu1  ;;  %v14574_v2 = vpop.f32.mrb[43].mxu0  ;;  %14874 = vmatprep.subr.bf16.mxu0 %v16202_v62  ;;  %v16237_v62 = vld [vmem:[%s20575_s1 + $0x12f0] sm:$0xff]  }
 0x239   :  { %v14594_v3 = vadd.f32 %v14593_v1, %v14592_v60  ;;  %v10410_v5 = vadd.f32 %v14572_v63, %v18556_v19  ;;  %v14595_v7 = vpop.f32.mrb[42].mxu1  ;;  %14895 = vmatpush3.bf16.msra.mxu1 %v16201_v61  ;;  %v397_v19 = vcombine.high %v389_v15, %v389_v15  ;;  %v16236_v60 = vld [vmem:[%s20575_s1 + $0x1230] sm:$0xff]   ;;  %v16246_v15 = vld [vmem:[%s20575_s1 + $0x13c0] sm:$0xff]  }
 0x23a   :  { %v14596_v9 = vpop.f32.mrb[43].mxu1  ;;  %14896 = vmatprep.subr.bf16.mxu1 %v16204_v6  ;;  %v16238_v1 = vld [vmem:[%s20575_s1 + $0x12b0] sm:$0xff]  }
 0x23b   :  { %v18657_v10 = vadd.f32 %v14594_v3, %v10410_v5  ;;  %14875 = vmatpush3.bf16.msra.mxu0 %v16203_v4  ;;  %v874_v24 = vpack.c.bf16 %v397_v19, %v397_v19  ;;  %v16239_v3 = vld [vmem:[%s20575_s1 + $0x1278] sm:$0xff]   ;;  %v43_v6 = vld [vmem:[%s20574_s0 + $0x90] sm:$0xff] }
 0x23c   :  { %14876 = vmatprep.subr.bf16.mxu0 %v16206_v11  ;;  %v16240_v4 = vld [vmem:[%s20575_s1 + $0x1238] sm:$0xff]   ;;  %v406_v7 = vrot.slane %v43_v6, %v16926_v41  ;;  %v399_v9 = vcombine.high %v43_v6, %v43_v6 }
 0x23d   :  { %14897 = vmatpush3.bf16.msra.mxu1 %v16205_v8  ;;  %10967 = vmatprep.mubr.bf16.mxu0 %v874_v24  ;;  %v16241_v5 = vld [vmem:[%s20575_s1 + $0x12f8] sm:$0xff]   ;;  %v16251_v24 = vld [vmem:[%s20575_s1 + $0x1388] sm:$0xff]  }
 0x23e   :  { %14898 = vmatprep.subr.bf16.mxu1 %v16208_v13  ;;  %v16242_v8 = vld [vmem:[%s20575_s1 + $0x12b8] sm:$0xff]   ;;  %v414_v11 = vcombine.high %v406_v7, %v406_v7  ;;  %v16245_v13 = vld [vmem:[%s20575_s1 + $0x1300] sm:$0xff]   ;;  %v877_v14 = vpack.c.bf16 %v406_v7, %v406_v7 }
 0x23f   :  { %14877 = vmatpush3.bf16.msra.mxu0 %v16207_v12  ;;  %v413_v12 = vrot.slane %v399_v9, %v16926_v41  ;;  %v16279_v7 = vld [vmem:[%s20575_s1 + $0x14c0] sm:$0xff]  }
 0x240   :  { %14906 = vmatprep.subr.bf16.mxu0 %v16210_v18  ;;  %v16247_v18 = vld [vmem:[%s20575_s1 + $0x1380] sm:$0xff]  }
 0x241   :  { %14899 = vmatpush3.bf16.msra.mxu1 %v16209_v16  ;;  %v878_v16 = vpack.c.bf16 %v414_v11, %v414_v11  ;;  %v415_v17 = vcombine.high %v413_v12, %v413_v12  ;;  %v879_v19 = vpack.c.bf16 %v413_v12, %v413_v12  ;;  %v16281_v12 = vld [vmem:[%s20575_s1 + $0x1448] sm:$0xff]  }
 0x242   :  { %10968 = vmatmul.mubr.bf16.vlgmr.msra.gmra.mrb[68].mxu0 %v873_v22  ;;  %14928 = vmatprep.subr.bf16.mxu1 %v16213_v23  ;;  %v16249_v22 = vld [vmem:[%s20575_s1 + $0x1308] sm:$0xff]  }
 0x243   :  { %14907 = vmatpush3.bf16.msra.mxu0 %v16212_v21  ;;  %11047 = vmatprep.mubr.bf16.mxu0 %v878_v16  ;;  %v880_v21 = vpack.c.bf16 %v415_v17, %v415_v17  ;;  %v16250_v23 = vld [vmem:[%s20575_s1 + $0x13c8] sm:$0xff]   ;;  %v16285_v17 = vld [vmem:[%s20575_s1 + $0x1450] sm:$0xff]  }
 0x244   :  { %11008 = vmatmul.mubr.bf16.vlgmr.msra.gmra.mrb[68].mxu1 %v875_v27  ;;  %14908 = vmatprep.subr.bf16.mxu0 %v16215_v28  ;;  %v16254_v27 = vld [vmem:[%s20575_s1 + $0x13d0] sm:$0xff]   ;;  %v16284_v16 = vld [vmem:[%s20575_s1 + $0x1488] sm:$0xff]  }
 0x245   :  { %14929 = vmatpush3.bf16.msra.mxu1 %v16214_v26  ;;  %11087 = vmatprep.mubr.bf16.mxu1 %v880_v21  ;;  %v16253_v26 = vld [vmem:[%s20575_s1 + $0x1310] sm:$0xff]   ;;  %v16289_v21 = vld [vmem:[%s20575_s1 + $0x1458] sm:$0xff]  }
 0x246   :  { %14930 = vmatprep.subr.bf16.mxu1 %v16217_v31  ;;  %v16255_v28 = vld [vmem:[%s20575_s1 + $0x1390] sm:$0xff]   ;;  %v16258_v31 = vld [vmem:[%s20575_s1 + $0x13d8] sm:$0xff]  }
 0x247   :  { %14909 = vmatpush3.bf16.msra.mxu0 %v16216_v30  ;;  %v16257_v30 = vld [vmem:[%s20575_s1 + $0x1318] sm:$0xff]  }
 0x248   :  { %14910 = vmatprep.subr.bf16.mxu0 %v16219_v34  ;;  %v16260_v34 = vld [vmem:[%s20575_s1 + $0x1360] sm:$0xff]  }
 0x249   :  { %14931 = vmatpush3.bf16.msra.mxu1 %v16218_v33  ;;  %v16259_v33 = vld [vmem:[%s20575_s1 + $0x1398] sm:$0xff]  }
 0x24a   :  { %14932 = vmatprep.subr.bf16.mxu1 %v16221_v36  ;;  %v16262_v36 = vld [vmem:[%s20575_s1 + $0x13e0] sm:$0xff]  }
 0x24b   :  { %14911 = vmatpush3.bf16.msra.mxu0 %v16220_v35  ;;  %v16261_v35 = vld [vmem:[%s20575_s1 + $0x1320] sm:$0xff]  }
 0x24c   :  { %14912 = vmatprep.subr.bf16.mxu0 %v16223_v38  ;;  %v16264_v38 = vld [vmem:[%s20575_s1 + $0x1368] sm:$0xff]  }
 0x24d   :  { %14933 = vmatpush3.bf16.msra.mxu1 %v16222_v37  ;;  %v16263_v37 = vld [vmem:[%s20575_s1 + $0x13a0] sm:$0xff]  }
 0x24e   :  { %14934 = vmatprep.subr.bf16.mxu1 %v16225_v40  ;;  %v16265_v40 = vld [vmem:[%s20575_s1 + $0x1328] sm:$0xff]  }
 0x24f   :  { %14913 = vmatpush3.bf16.msra.mxu0 %v16224_v39 }
 0x250   :  { %14914 = vmatprep.subr.bf16.mxu0 %v16227_v43  ;;  %v16266_v43 = vld [vmem:[%s20575_s1 + $0x13e8] sm:$0xff]  }
 0x251   :  { %14935 = vmatpush3.bf16.msra.mxu1 %v16226_v42 }
 0x252   :  { %14936 = vmatprep.subr.bf16.mxu1 %v16229_v45 }
 0x253   :  { %14915 = vmatpush3.bf16.msra.mxu0 %v16228_v44 }
 0x254   :  { %14916 = vmatprep.subr.bf16.mxu0 %v16231_v47  ;;  %v16267_v47 = vld [vmem:[%s20575_s1 + $0x13a8] sm:$0xff]  }
 0x255   :  { %v14614_v49 = vpop.f32.mrb[44].mxu0  ;;  %14937 = vmatpush3.bf16.msra.mxu1 %v16230_v46 }
 0x256   :  { %v14615_v51 = vpop.f32.mrb[45].mxu0  ;;  %14938 = vmatprep.subr.bf16.mxu1 %v16233_v50 }
 0x257   :  { %v14636_v52 = vpop.f32.mrb[44].mxu1  ;;  %v14616_v53 = vadd.f32 %v14615_v51, %v14614_v49  ;;  %v14617_v54 = vpop.f32.mrb[46].mxu0  ;;  %14917 = vmatpush3.bf16.msra.mxu0 %v16232_v48  ;;  %v16268_v48 = vld [vmem:[%s20575_s1 + $0x1370] sm:$0xff]  }
 0x258   :  { %v14637_v55 = vpop.f32.mrb[45].mxu1  ;;  %v14618_v58 = vpop.f32.mrb[47].mxu0  ;;  %14918 = vmatprep.subr.bf16.mxu0 %v16235_v57 }
 0x259   :  { %v14638_v59 = vadd.f32 %v14637_v55, %v14636_v52  ;;  %v10490_v61 = vadd.f32 %v14616_v53, %v18657_v10  ;;  %v14639_v63 = vpop.f32.mrb[46].mxu1  ;;  %14939 = vmatpush3.bf16.msra.mxu1 %v16234_v56  ;;  %v16243_v10 = vld [vmem:[%s20575_s1 + $0x1340] sm:$0xff]   ;;  %v16269_v53 = vld [vmem:[%s20575_s1 + $0x1330] sm:$0xff]  }
 0x25a   :  { %v14640_v2 = vpop.f32.mrb[47].mxu1  ;;  %14940 = vmatprep.subr.bf16.mxu1 %v16237_v62  ;;  %v16270_v55 = vld [vmem:[%s20575_s1 + $0x13f0] sm:$0xff]   ;;  %v44_v62 = vld [vmem:[%s20574_s0 + $0x98] sm:$0xff] }
 0x25b   :  { %v18758_v0 = vadd.f32 %v14638_v59, %v10490_v61  ;;  %14919 = vmatpush3.bf16.msra.mxu0 %v16236_v60  ;;  %v16271_v58 = vld [vmem:[%s20575_s1 + $0x13b0] sm:$0xff]   ;;  %v16272_v59 = vld [vmem:[%s20575_s1 + $0x1378] sm:$0xff]   ;;  %v423_v63 = vrot.slane %v44_v62, %v16926_v41  ;;  %v16276_v2 = vld [vmem:[%s20575_s1 + $0x1440] sm:$0xff]  }
 0x25c   :  { %14920 = vmatprep.subr.bf16.mxu0 %v16239_v3  ;;  %v16273_v60 = vld [vmem:[%s20575_s1 + $0x1338] sm:$0xff]  }
 0x25d   :  { %14941 = vmatpush3.bf16.msra.mxu1 %v16238_v1  ;;  %v16274_v61 = vld [vmem:[%s20575_s1 + $0x13f8] sm:$0xff]   ;;  %v416_v1 = vcombine.high %v44_v62, %v44_v62  ;;  %v431_v3 = vcombine.high %v423_v63, %v423_v63  ;;  %v881_v6 = vpack.c.bf16 %v423_v63, %v423_v63  ;;  %v16312_v63 = vld [vmem:[%s20575_s1 + $0x15c0] sm:$0xff]  }
 0x25e   :  { %14942 = vmatprep.subr.bf16.mxu1 %v16241_v5  ;;  %v16278_v5 = vld [vmem:[%s20575_s1 + $0x1400] sm:$0xff]  }
 0x25f   :  { %14921 = vmatpush3.bf16.msra.mxu0 %v16240_v4  ;;  %v430_v4 = vrot.slane %v416_v1, %v16926_v41 }
 0x260   :  { %14950 = vmatprep.subr.bf16.mxu0 %v16243_v10  ;;  %v16280_v10 = vld [vmem:[%s20575_s1 + $0x1480] sm:$0xff]  }
 0x261   :  { %14943 = vmatpush3.bf16.msra.mxu1 %v16242_v8  ;;  %v882_v8 = vpack.c.bf16 %v431_v3, %v431_v3  ;;  %v432_v9 = vcombine.high %v430_v4, %v430_v4  ;;  %v883_v11 = vpack.c.bf16 %v430_v4, %v430_v4  ;;  %v16314_v4 = vld [vmem:[%s20575_s1 + $0x1548] sm:$0xff]  }
 0x262   :  { %14972 = vmatprep.subr.bf16.mxu1 %v16246_v15  ;;  %11048 = vmatmul.mubr.bf16.vlgmr.msra.gmra.mrb[72].mxu0 %v877_v14  ;;  %v16282_v14 = vld [vmem:[%s20575_s1 + $0x1408] sm:$0xff]  }
 0x263   :  { %14951 = vmatpush3.bf16.msra.mxu0 %v16245_v13  ;;  %11127 = vmatprep.mubr.bf16.mxu0 %v882_v8  ;;  %v884_v13 = vpack.c.bf16 %v432_v9, %v432_v9  ;;  %v16283_v15 = vld [vmem:[%s20575_s1 + $0x14c8] sm:$0xff]   ;;  %v16318_v9 = vld [vmem:[%s20575_s1 + $0x1550] sm:$0xff]  }
 0x264   :  { %11088 = vmatmul.mubr.bf16.vlgmr.msra.gmra.mrb[72].mxu1 %v879_v19  ;;  %14952 = vmatprep.subr.bf16.mxu0 %v16248_v20  ;;  %v16287_v19 = vld [vmem:[%s20575_s1 + $0x14d0] sm:$0xff]   ;;  %v16317_v8 = vld [vmem:[%s20575_s1 + $0x1588] sm:$0xff]  }
 0x265   :  { %14973 = vmatpush3.bf16.msra.mxu1 %v16247_v18  ;;  %11167 = vmatprep.mubr.bf16.mxu1 %v884_v13  ;;  %v16286_v18 = vld [vmem:[%s20575_s1 + $0x1410] sm:$0xff]   ;;  %v16322_v13 = vld [vmem:[%s20575_s1 + $0x1558] sm:$0xff]  }
 0x266   :  { %14974 = vmatprep.subr.bf16.mxu1 %v16250_v23  ;;  %v16288_v20 = vld [vmem:[%s20575_s1 + $0x1490] sm:$0xff]   ;;  %v16291_v23 = vld [vmem:[%s20575_s1 + $0x14d8] sm:$0xff]  }
 0x267   :  { %14953 = vmatpush3.bf16.msra.mxu0 %v16249_v22  ;;  %v16290_v22 = vld [vmem:[%s20575_s1 + $0x1418] sm:$0xff]  }
 0x268   :  { %14954 = vmatprep.subr.bf16.mxu0 %v16252_v25  ;;  %v16293_v25 = vld [vmem:[%s20575_s1 + $0x1460] sm:$0xff]  }
 0x269   :  { %14975 = vmatpush3.bf16.msra.mxu1 %v16251_v24  ;;  %v16292_v24 = vld [vmem:[%s20575_s1 + $0x1498] sm:$0xff]  }
 0x26a   :  { %14976 = vmatprep.subr.bf16.mxu1 %v16254_v27  ;;  %v16295_v27 = vld [vmem:[%s20575_s1 + $0x14e0] sm:$0xff]  }
 0x26b   :  { %14955 = vmatpush3.bf16.msra.mxu0 %v16253_v26  ;;  %v16294_v26 = vld [vmem:[%s20575_s1 + $0x1420] sm:$0xff]  }
 0x26c   :  { %14956 = vmatprep.subr.bf16.mxu0 %v16256_v29  ;;  %v16297_v29 = vld [vmem:[%s20575_s1 + $0x1468] sm:$0xff]  }
 0x26d   :  { %14977 = vmatpush3.bf16.msra.mxu1 %v16255_v28  ;;  %v16296_v28 = vld [vmem:[%s20575_s1 + $0x14a0] sm:$0xff]  }
 0x26e   :  { %14978 = vmatprep.subr.bf16.mxu1 %v16258_v31  ;;  %v16298_v31 = vld [vmem:[%s20575_s1 + $0x1428] sm:$0xff]  }
 0x26f   :  { %14957 = vmatpush3.bf16.msra.mxu0 %v16257_v30 }
 0x270   :  { %14958 = vmatprep.subr.bf16.mxu0 %v16260_v34  ;;  %v16299_v34 = vld [vmem:[%s20575_s1 + $0x14e8] sm:$0xff]  }
 0x271   :  { %14979 = vmatpush3.bf16.msra.mxu1 %v16259_v33 }
 0x272   :  { %14980 = vmatprep.subr.bf16.mxu1 %v16262_v36 }
 0x273   :  { %14959 = vmatpush3.bf16.msra.mxu0 %v16261_v35 }
 0x274   :  { %14960 = vmatprep.subr.bf16.mxu0 %v16264_v38  ;;  %v16300_v38 = vld [vmem:[%s20575_s1 + $0x14a8] sm:$0xff]  }
 0x275   :  { %v14658_v39 = vpop.f32.mrb[48].mxu0  ;;  %14981 = vmatpush3.bf16.msra.mxu1 %v16263_v37 }
 0x276   :  { %v14659_v42 = vpop.f32.mrb[49].mxu0  ;;  %14982 = vmatprep.subr.bf16.mxu1 %v16266_v43 }
 0x277   :  { %v14660_v44 = vadd.f32 %v14659_v42, %v14658_v39  ;;  %v14661_v45 = vpop.f32.mrb[50].mxu0  ;;  %v14680_v46 = vpop.f32.mrb[48].mxu1  ;;  %14961 = vmatpush3.bf16.msra.mxu0 %v16265_v40  ;;  %v16301_v39 = vld [vmem:[%s20575_s1 + $0x1470] sm:$0xff]  }
 0x278   :  { %v14662_v49 = vpop.f32.mrb[51].mxu0  ;;  %v14681_v50 = vpop.f32.mrb[49].mxu1  ;;  %14962 = vmatprep.subr.bf16.mxu0 %v16268_v48  ;;  %v16302_v45 = vld [vmem:[%s20575_s1 + $0x1430] sm:$0xff]  }
 0x279   :  { %v10570_v51 = vadd.f32 %v14660_v44, %v18758_v0  ;;  %v14682_v52 = vadd.f32 %v14681_v50, %v14680_v46  ;;  %v14683_v54 = vpop.f32.mrb[50].mxu1  ;;  %14983 = vmatpush3.bf16.msra.mxu1 %v16267_v47  ;;  %v16275_v0 = vld [vmem:[%s20575_s1 + $0x13b8] sm:$0xff]   ;;  %v16303_v47 = vld [vmem:[%s20575_s1 + $0x14f0] sm:$0xff]  }
 0x27a   :  { %v14684_v56 = vpop.f32.mrb[51].mxu1  ;;  %14984 = vmatprep.subr.bf16.mxu1 %v16270_v55  ;;  %v16304_v50 = vld [vmem:[%s20575_s1 + $0x14b0] sm:$0xff]   ;;  %v45_v54 = vld [vmem:[%s20574_s0 + $0xa0] sm:$0xff] }
 0x27b   :  { %v18862_v57 = vadd.f32 %v14682_v52, %v10570_v51  ;;  %14963 = vmatpush3.bf16.msra.mxu0 %v16269_v53  ;;  %v16305_v51 = vld [vmem:[%s20575_s1 + $0x1478] sm:$0xff]   ;;  %v440_v55 = vrot.slane %v45_v54, %v16926_v41 }
 0x27c   :  { %14964 = vmatprep.subr.bf16.mxu0 %v16272_v59  ;;  %v16306_v52 = vld [vmem:[%s20575_s1 + $0x1438] sm:$0xff]  }
 0x27d   :  { %14985 = vmatpush3.bf16.msra.mxu1 %v16271_v58  ;;  %v16307_v53 = vld [vmem:[%s20575_s1 + $0x14f8] sm:$0xff]   ;;  %v16309_v58 = vld [vmem:[%s20575_s1 + $0x1540] sm:$0xff]   ;;  %v448_v59 = vcombine.high %v440_v55, %v440_v55  ;;  %v885_v62 = vpack.c.bf16 %v440_v55, %v440_v55 }
 0x27e   :  { %14986 = vmatprep.subr.bf16.mxu1 %v16274_v61  ;;  %v16308_v56 = vld [vmem:[%s20575_s1 + $0x14b8] sm:$0xff]   ;;  %v16311_v61 = vld [vmem:[%s20575_s1 + $0x1500] sm:$0xff]  }
 0x27f   :  { %14965 = vmatpush3.bf16.msra.mxu0 %v16273_v60  ;;  %v16345_v55 = vld [vmem:[%s20575_s1 + $0x16c0] sm:$0xff]  }
 0x280   :  { %14994 = vmatprep.subr.bf16.mxu0 %v16276_v2  ;;  %v16313_v2 = vld [vmem:[%s20575_s1 + $0x1580] sm:$0xff]  }
 0x281   :  { %14987 = vmatpush3.bf16.msra.mxu1 %v16275_v0  ;;  %v886_v0 = vpack.c.bf16 %v448_v59, %v448_v59 }
 0x282   :  { %15016 = vmatprep.subr.bf16.mxu1 %v16279_v7  ;;  %11128 = vmatmul.mubr.bf16.vlgmr.msra.gmra.mrb[76].mxu0 %v881_v6  ;;  %v16315_v6 = vld [vmem:[%s20575_s1 + $0x1508] sm:$0xff]  }
 0x283   :  { %14995 = vmatpush3.bf16.msra.mxu0 %v16278_v5  ;;  %11207 = vmatprep.mubr.bf16.mxu0 %v886_v0  ;;  %v16316_v7 = vld [vmem:[%s20575_s1 + $0x15c8] sm:$0xff]  }
 0x284   :  { %11168 = vmatmul.mubr.bf16.vlgmr.msra.gmra.mrb[76].mxu1 %v883_v11  ;;  %14996 = vmatprep.subr.bf16.mxu0 %v16281_v12  ;;  %v16320_v11 = vld [vmem:[%s20575_s1 + $0x15d0] sm:$0xff]   ;;  %v16350_v0 = vld [vmem:[%s20575_s1 + $0x1688] sm:$0xff]  }
 0x285   :  { %15017 = vmatpush3.bf16.msra.mxu1 %v16280_v10  ;;  %v16319_v10 = vld [vmem:[%s20575_s1 + $0x1510] sm:$0xff]  }
 0x286   :  { %15018 = vmatprep.subr.bf16.mxu1 %v16283_v15  ;;  %v16321_v12 = vld [vmem:[%s20575_s1 + $0x1590] sm:$0xff]   ;;  %v16324_v15 = vld [vmem:[%s20575_s1 + $0x15d8] sm:$0xff]  }
 0x287   :  { %14997 = vmatpush3.bf16.msra.mxu0 %v16282_v14  ;;  %v16323_v14 = vld [vmem:[%s20575_s1 + $0x1518] sm:$0xff]  }
 0x288   :  { %14998 = vmatprep.subr.bf16.mxu0 %v16285_v17  ;;  %v16326_v17 = vld [vmem:[%s20575_s1 + $0x1560] sm:$0xff]  }
 0x289   :  { %15019 = vmatpush3.bf16.msra.mxu1 %v16284_v16  ;;  %v16325_v16 = vld [vmem:[%s20575_s1 + $0x1598] sm:$0xff]  }
 0x28a   :  { %15020 = vmatprep.subr.bf16.mxu1 %v16287_v19  ;;  %v16328_v19 = vld [vmem:[%s20575_s1 + $0x15e0] sm:$0xff]  }
 0x28b   :  { %14999 = vmatpush3.bf16.msra.mxu0 %v16286_v18  ;;  %v16327_v18 = vld [vmem:[%s20575_s1 + $0x1520] sm:$0xff]  }
 0x28c   :  { %15000 = vmatprep.subr.bf16.mxu0 %v16289_v21  ;;  %v16330_v21 = vld [vmem:[%s20575_s1 + $0x1568] sm:$0xff]  }
 0x28d   :  { %15021 = vmatpush3.bf16.msra.mxu1 %v16288_v20  ;;  %v16329_v20 = vld [vmem:[%s20575_s1 + $0x15a0] sm:$0xff]  }
 0x28e   :  { %15022 = vmatprep.subr.bf16.mxu1 %v16291_v23  ;;  %v16331_v23 = vld [vmem:[%s20575_s1 + $0x1528] sm:$0xff]  }
 0x28f   :  { %15001 = vmatpush3.bf16.msra.mxu0 %v16290_v22 }
 0x290   :  { %15002 = vmatprep.subr.bf16.mxu0 %v16293_v25  ;;  %v16332_v25 = vld [vmem:[%s20575_s1 + $0x15e8] sm:$0xff]  }
 0x291   :  { %15023 = vmatpush3.bf16.msra.mxu1 %v16292_v24 }
 0x292   :  { %15024 = vmatprep.subr.bf16.mxu1 %v16295_v27 }
 0x293   :  { %15003 = vmatpush3.bf16.msra.mxu0 %v16294_v26 }
 0x294   :  { %15004 = vmatprep.subr.bf16.mxu0 %v16297_v29 }
 0x295   :  { %v14702_v30 = vpop.f32.mrb[52].mxu0  ;;  %15025 = vmatpush3.bf16.msra.mxu1 %v16296_v28 }
 0x296   :  { %v14703_v33 = vpop.f32.mrb[53].mxu0  ;;  %15026 = vmatprep.subr.bf16.mxu1 %v16299_v34 }
 0x297   :  { %v14704_v35 = vadd.f32 %v14703_v33, %v14702_v30  ;;  %v14705_v36 = vpop.f32.mrb[54].mxu0  ;;  %v14724_v37 = vpop.f32.mrb[52].mxu1  ;;  %15005 = vmatpush3.bf16.msra.mxu0 %v16298_v31  ;;  %v16333_v31 = vld [vmem:[%s20575_s1 + $0x15a8] sm:$0xff]   ;;  %v16334_v33 = vld [vmem:[%s20575_s1 + $0x1570] sm:$0xff]  }
 0x298   :  { %v14706_v40 = vpop.f32.mrb[55].mxu0  ;;  %v14725_v42 = vpop.f32.mrb[53].mxu1  ;;  %15006 = vmatprep.subr.bf16.mxu0 %v16301_v39  ;;  %v16335_v36 = vld [vmem:[%s20575_s1 + $0x1530] sm:$0xff]  }
 0x299   :  { %v10650_v43 = vadd.f32 %v14704_v35, %v18862_v57  ;;  %v14726_v44 = vadd.f32 %v14725_v42, %v14724_v37  ;;  %v14727_v46 = vpop.f32.mrb[54].mxu1  ;;  %15027 = vmatpush3.bf16.msra.mxu1 %v16300_v38  ;;  %v433_v57 = vcombine.high %v45_v54, %v45_v54  ;;  %v16336_v39 = vld [vmem:[%s20575_s1 + $0x15f0] sm:$0xff]  }
 0x29a   :  { %v14728_v48 = vpop.f32.mrb[55].mxu1  ;;  %15028 = vmatprep.subr.bf16.mxu1 %v16303_v47  ;;  %v16337_v42 = vld [vmem:[%s20575_s1 + $0x15b0] sm:$0xff]   ;;  %v46_v46 = vld [vmem:[%s20574_s0 + $0xa8] sm:$0xff] }
 0x29b   :  { %v18966_v49 = vadd.f32 %v14726_v44, %v10650_v43  ;;  %15007 = vmatpush3.bf16.msra.mxu0 %v16302_v45  ;;  %v447_v60 = vrot.slane %v433_v57, %v16926_v41  ;;  %v16338_v43 = vld [vmem:[%s20575_s1 + $0x1578] sm:$0xff]   ;;  %v457_v47 = vrot.slane %v46_v46, %v16926_v41 }
 0x29c   :  { %15008 = vmatprep.subr.bf16.mxu0 %v16305_v51  ;;  %v16339_v44 = vld [vmem:[%s20575_s1 + $0x1538] sm:$0xff]  }
 0x29d   :  { %15029 = vmatpush3.bf16.msra.mxu1 %v16304_v50  ;;  %v449_v1 = vcombine.high %v447_v60, %v447_v60  ;;  %v887_v3 = vpack.c.bf16 %v447_v60, %v447_v60  ;;  %v16340_v45 = vld [vmem:[%s20575_s1 + $0x15f8] sm:$0xff]   ;;  %v16342_v50 = vld [vmem:[%s20575_s1 + $0x1640] sm:$0xff]   ;;  %v465_v51 = vcombine.high %v457_v47, %v457_v47  ;;  %v889_v54 = vpack.c.bf16 %v457_v47, %v457_v47  ;;  %v16347_v60 = vld [vmem:[%s20575_s1 + $0x1648] sm:$0xff]  }
 0x29e   :  { %15030 = vmatprep.subr.bf16.mxu1 %v16307_v53  ;;  %v16341_v48 = vld [vmem:[%s20575_s1 + $0x15b8] sm:$0xff]   ;;  %v16344_v53 = vld [vmem:[%s20575_s1 + $0x1600] sm:$0xff]  }
 0x29f   :  { %15009 = vmatpush3.bf16.msra.mxu0 %v16306_v52  ;;  %v888_v5 = vpack.c.bf16 %v449_v1, %v449_v1  ;;  %v16351_v1 = vld [vmem:[%s20575_s1 + $0x1650] sm:$0xff]   ;;  %v16378_v47 = vld [vmem:[%s20575_s1 + $0x17c0] sm:$0xff]  }
 0x2a0   :  { %15038 = vmatprep.subr.bf16.mxu0 %v16309_v58  ;;  %v16346_v58 = vld [vmem:[%s20575_s1 + $0x1680] sm:$0xff]  }
 0x2a1   :  { %15031 = vmatpush3.bf16.msra.mxu1 %v16308_v56  ;;  %11247 = vmatprep.mubr.bf16.mxu1 %v888_v5  ;;  %v890_v56 = vpack.c.bf16 %v465_v51, %v465_v51  ;;  %v16355_v5 = vld [vmem:[%s20575_s1 + $0x1658] sm:$0xff]  }
 0x2a2   :  { %11208 = vmatmul.mubr.bf16.vlgmr.msra.gmra.mrb[80].mxu0 %v885_v62  ;;  %15060 = vmatprep.subr.bf16.mxu1 %v16312_v63  ;;  %v16348_v62 = vld [vmem:[%s20575_s1 + $0x1608] sm:$0xff]  }
 0x2a3   :  { %15039 = vmatpush3.bf16.msra.mxu0 %v16311_v61  ;;  %11287 = vmatprep.mubr.bf16.mxu0 %v890_v56  ;;  %v16349_v63 = vld [vmem:[%s20575_s1 + $0x16c8] sm:$0xff]  }
 0x2a4   :  { %11248 = vmatmul.mubr.bf16.vlgmr.msra.gmra.mrb[80].mxu1 %v887_v3  ;;  %15040 = vmatprep.subr.bf16.mxu0 %v16314_v4  ;;  %v16353_v3 = vld [vmem:[%s20575_s1 + $0x16d0] sm:$0xff]   ;;  %v16383_v56 = vld [vmem:[%s20575_s1 + $0x1788] sm:$0xff]  }
 0x2a5   :  { %15061 = vmatpush3.bf16.msra.mxu1 %v16313_v2  ;;  %v16352_v2 = vld [vmem:[%s20575_s1 + $0x1610] sm:$0xff]  }
 0x2a6   :  { %15062 = vmatprep.subr.bf16.mxu1 %v16316_v7  ;;  %v16354_v4 = vld [vmem:[%s20575_s1 + $0x1690] sm:$0xff]   ;;  %v16357_v7 = vld [vmem:[%s20575_s1 + $0x16d8] sm:$0xff]  }
 0x2a7   :  { %15041 = vmatpush3.bf16.msra.mxu0 %v16315_v6  ;;  %v16356_v6 = vld [vmem:[%s20575_s1 + $0x1618] sm:$0xff]  }
 0x2a8   :  { %15042 = vmatprep.subr.bf16.mxu0 %v16318_v9  ;;  %v16359_v9 = vld [vmem:[%s20575_s1 + $0x1660] sm:$0xff]  }
 0x2a9   :  { %15063 = vmatpush3.bf16.msra.mxu1 %v16317_v8  ;;  %v16358_v8 = vld [vmem:[%s20575_s1 + $0x1698] sm:$0xff]  }
 0x2aa   :  { %15064 = vmatprep.subr.bf16.mxu1 %v16320_v11  ;;  %v16361_v11 = vld [vmem:[%s20575_s1 + $0x16e0] sm:$0xff]  }
 0x2ab   :  { %15043 = vmatpush3.bf16.msra.mxu0 %v16319_v10  ;;  %v16360_v10 = vld [vmem:[%s20575_s1 + $0x1620] sm:$0xff]  }
 0x2ac   :  { %15044 = vmatprep.subr.bf16.mxu0 %v16322_v13  ;;  %v16363_v13 = vld [vmem:[%s20575_s1 + $0x1668] sm:$0xff]  }
 0x2ad   :  { %15065 = vmatpush3.bf16.msra.mxu1 %v16321_v12  ;;  %v16362_v12 = vld [vmem:[%s20575_s1 + $0x16a0] sm:$0xff]  }
 0x2ae   :  { %15066 = vmatprep.subr.bf16.mxu1 %v16324_v15  ;;  %v16364_v15 = vld [vmem:[%s20575_s1 + $0x1628] sm:$0xff]  }
 0x2af   :  { %15045 = vmatpush3.bf16.msra.mxu0 %v16323_v14 }
 0x2b0   :  { %15046 = vmatprep.subr.bf16.mxu0 %v16326_v17  ;;  %v16365_v17 = vld [vmem:[%s20575_s1 + $0x16e8] sm:$0xff]  }
 0x2b1   :  { %15067 = vmatpush3.bf16.msra.mxu1 %v16325_v16 }
 0x2b2   :  { %15068 = vmatprep.subr.bf16.mxu1 %v16328_v19 }
 0x2b3   :  { %15047 = vmatpush3.bf16.msra.mxu0 %v16327_v18 }
 0x2b4   :  { %15048 = vmatprep.subr.bf16.mxu0 %v16330_v21  ;;  %v16366_v21 = vld [vmem:[%s20575_s1 + $0x16a8] sm:$0xff]  }
 0x2b5   :  { %v14746_v22 = vpop.f32.mrb[56].mxu0  ;;  %15069 = vmatpush3.bf16.msra.mxu1 %v16329_v20 }
 0x2b6   :  { %v14747_v24 = vpop.f32.mrb[57].mxu0  ;;  %15070 = vmatprep.subr.bf16.mxu1 %v16332_v25 }
 0x2b7   :  { %v14748_v26 = vadd.f32 %v14747_v24, %v14746_v22  ;;  %v14749_v27 = vpop.f32.mrb[58].mxu0  ;;  %v14768_v28 = vpop.f32.mrb[56].mxu1  ;;  %15049 = vmatpush3.bf16.msra.mxu0 %v16331_v23  ;;  %v16367_v22 = vld [vmem:[%s20575_s1 + $0x1670] sm:$0xff]  }
 0x2b8   :  { %v14750_v29 = vpop.f32.mrb[59].mxu0  ;;  %v14769_v30 = vpop.f32.mrb[57].mxu1  ;;  %15050 = vmatprep.subr.bf16.mxu0 %v16334_v33  ;;  %v16368_v27 = vld [vmem:[%s20575_s1 + $0x1630] sm:$0xff]  }
 0x2b9   :  { %v10730_v34 = vadd.f32 %v14748_v26, %v18966_v49  ;;  %v14770_v35 = vadd.f32 %v14769_v30, %v14768_v28  ;;  %v14771_v37 = vpop.f32.mrb[58].mxu1  ;;  %15071 = vmatpush3.bf16.msra.mxu1 %v16333_v31  ;;  %v450_v49 = vcombine.high %v46_v46, %v46_v46  ;;  %v16369_v29 = vld [vmem:[%s20575_s1 + $0x16f0] sm:$0xff]  }
 0x2ba   :  { %v14772_v40 = vpop.f32.mrb[59].mxu1  ;;  %15072 = vmatprep.subr.bf16.mxu1 %v16336_v39  ;;  %v16370_v33 = vld [vmem:[%s20575_s1 + $0x16b0] sm:$0xff]   ;;  %v16374_v39 = vld [vmem:[%s20575_s1 + $0x16b8] sm:$0xff]  }
 0x2bb   :  { %v19067_v38 = vadd.f32 %v14770_v35, %v10730_v34  ;;  %15051 = vmatpush3.bf16.msra.mxu0 %v16335_v36  ;;  %v464_v52 = vrot.slane %v450_v49, %v16926_v41  ;;  %v16371_v34 = vld [vmem:[%s20575_s1 + $0x1678] sm:$0xff]   ;;  %v47_v37 = vld [vmem:[%s20574_s0 + $0xb0] sm:$0xff] }
 0x2bc   :  { %15052 = vmatprep.subr.bf16.mxu0 %v16338_v43  ;;  %v16372_v35 = vld [vmem:[%s20575_s1 + $0x1638] sm:$0xff]   ;;  %v467_v40 = vcombine.high %v47_v37, %v47_v37 }
 0x2bd   :  { %15073 = vmatpush3.bf16.msra.mxu1 %v16337_v42  ;;  %v466_v57 = vcombine.high %v464_v52, %v464_v52  ;;  %v891_v59 = vpack.c.bf16 %v464_v52, %v464_v52  ;;  %v16373_v36 = vld [vmem:[%s20575_s1 + $0x16f8] sm:$0xff]   ;;  %v16375_v42 = vld [vmem:[%s20575_s1 + $0x1740] sm:$0xff]   ;;  %v16380_v52 = vld [vmem:[%s20575_s1 + $0x1748] sm:$0xff]  }
 0x2be   :  { %15074 = vmatprep.subr.bf16.mxu1 %v16340_v45  ;;  %v16377_v45 = vld [vmem:[%s20575_s1 + $0x1700] sm:$0xff]  }
 0x2bf   :  { %15053 = vmatpush3.bf16.msra.mxu0 %v16339_v44  ;;  %v892_v61 = vpack.c.bf16 %v466_v57, %v466_v57  ;;  %v481_v44 = vrot.slane %v467_v40, %v16926_v41  ;;  %v16384_v57 = vld [vmem:[%s20575_s1 + $0x1750] sm:$0xff]  }
 0x2c0   :  { %15082 = vmatprep.subr.bf16.mxu0 %v16342_v50  ;;  %v16379_v50 = vld [vmem:[%s20575_s1 + $0x1780] sm:$0xff]  }
 0x2c1   :  { %15075 = vmatpush3.bf16.msra.mxu1 %v16341_v48  ;;  %11327 = vmatprep.mubr.bf16.mxu1 %v892_v61  ;;  %v483_v49 = vcombine.high %v481_v44, %v481_v44  ;;  %v895_v51 = vpack.c.bf16 %v481_v44, %v481_v44  ;;  %v16388_v61 = vld [vmem:[%s20575_s1 + $0x1758] sm:$0xff]   ;;  %v16413_v44 = vld [vmem:[%s20575_s1 + $0x1848] sm:$0xff]  }
 0x2c2   :  { %15104 = vmatprep.subr.bf16.mxu1 %v16345_v55  ;;  %11288 = vmatmul.mubr.bf16.vlgmr.msra.gmra.mrb[84].mxu0 %v889_v54  ;;  %v16381_v54 = vld [vmem:[%s20575_s1 + $0x1708] sm:$0xff]  }
 0x2c3   :  { %15083 = vmatpush3.bf16.msra.mxu0 %v16344_v53  ;;  %v896_v53 = vpack.c.bf16 %v483_v49, %v483_v49  ;;  %v16382_v55 = vld [vmem:[%s20575_s1 + $0x17c8] sm:$0xff]   ;;  %v16417_v49 = vld [vmem:[%s20575_s1 + $0x1850] sm:$0xff]  }
 0x2c4   :  { %11328 = vmatmul.mubr.bf16.vlgmr.msra.gmra.mrb[84].mxu1 %v891_v59  ;;  %15084 = vmatprep.subr.bf16.mxu0 %v16347_v60  ;;  %v16386_v59 = vld [vmem:[%s20575_s1 + $0x17d0] sm:$0xff]  }
 0x2c5   :  { %15105 = vmatpush3.bf16.msra.mxu1 %v16346_v58  ;;  %11407 = vmatprep.mubr.bf16.mxu1 %v896_v53  ;;  %v16385_v58 = vld [vmem:[%s20575_s1 + $0x1710] sm:$0xff]   ;;  %v16421_v53 = vld [vmem:[%s20575_s1 + $0x1858] sm:$0xff]  }
 0x2c6   :  { %15106 = vmatprep.subr.bf16.mxu1 %v16349_v63  ;;  %v16387_v60 = vld [vmem:[%s20575_s1 + $0x1790] sm:$0xff]   ;;  %v16390_v63 = vld [vmem:[%s20575_s1 + $0x17d8] sm:$0xff]  }
 0x2c7   :  { %15085 = vmatpush3.bf16.msra.mxu0 %v16348_v62  ;;  %v16389_v62 = vld [vmem:[%s20575_s1 + $0x1718] sm:$0xff]  }
 0x2c8   :  { %15086 = vmatprep.subr.bf16.mxu0 %v16351_v1  ;;  %v16392_v1 = vld [vmem:[%s20575_s1 + $0x1760] sm:$0xff]  }
 0x2c9   :  { %15107 = vmatpush3.bf16.msra.mxu1 %v16350_v0  ;;  %v16391_v0 = vld [vmem:[%s20575_s1 + $0x1798] sm:$0xff]  }
 0x2ca   :  { %15108 = vmatprep.subr.bf16.mxu1 %v16353_v3  ;;  %v16394_v3 = vld [vmem:[%s20575_s1 + $0x17e0] sm:$0xff]  }
 0x2cb   :  { %15087 = vmatpush3.bf16.msra.mxu0 %v16352_v2  ;;  %v16393_v2 = vld [vmem:[%s20575_s1 + $0x1720] sm:$0xff]  }
 0x2cc   :  { %15088 = vmatprep.subr.bf16.mxu0 %v16355_v5  ;;  %v16396_v5 = vld [vmem:[%s20575_s1 + $0x1768] sm:$0xff]  }
 0x2cd   :  { %15109 = vmatpush3.bf16.msra.mxu1 %v16354_v4  ;;  %v16395_v4 = vld [vmem:[%s20575_s1 + $0x17a0] sm:$0xff]  }
 0x2ce   :  { %15110 = vmatprep.subr.bf16.mxu1 %v16357_v7  ;;  %v16397_v7 = vld [vmem:[%s20575_s1 + $0x1728] sm:$0xff]  }
 0x2cf   :  { %15089 = vmatpush3.bf16.msra.mxu0 %v16356_v6 }
 0x2d0   :  { %15090 = vmatprep.subr.bf16.mxu0 %v16359_v9  ;;  %v16398_v9 = vld [vmem:[%s20575_s1 + $0x17e8] sm:$0xff]  }
 0x2d1   :  { %15111 = vmatpush3.bf16.msra.mxu1 %v16358_v8 }
 0x2d2   :  { %15112 = vmatprep.subr.bf16.mxu1 %v16361_v11 }
 0x2d3   :  { %15091 = vmatpush3.bf16.msra.mxu0 %v16360_v10 }
 0x2d4   :  { %15092 = vmatprep.subr.bf16.mxu0 %v16363_v13  ;;  %v16399_v13 = vld [vmem:[%s20575_s1 + $0x17a8] sm:$0xff]  }
 0x2d5   :  { %v14790_v14 = vpop.f32.mrb[60].mxu0  ;;  %15113 = vmatpush3.bf16.msra.mxu1 %v16362_v12 }
 0x2d6   :  { %v14791_v16 = vpop.f32.mrb[61].mxu0  ;;  %15114 = vmatprep.subr.bf16.mxu1 %v16365_v17 }
 0x2d7   :  { %v14792_v18 = vadd.f32 %v14791_v16, %v14790_v14  ;;  %v14793_v19 = vpop.f32.mrb[62].mxu0  ;;  %v14812_v20 = vpop.f32.mrb[60].mxu1  ;;  %15093 = vmatpush3.bf16.msra.mxu0 %v16364_v15  ;;  %v16400_v14 = vld [vmem:[%s20575_s1 + $0x1770] sm:$0xff]  }
 0x2d8   :  { %v14794_v23 = vpop.f32.mrb[63].mxu0  ;;  %v14813_v24 = vpop.f32.mrb[61].mxu1  ;;  %15094 = vmatprep.subr.bf16.mxu0 %v16367_v22  ;;  %v16401_v19 = vld [vmem:[%s20575_s1 + $0x1730] sm:$0xff]  }
 0x2d9   :  { %v10810_v25 = vadd.f32 %v14792_v18, %v19067_v38  ;;  %v14814_v26 = vadd.f32 %v14813_v24, %v14812_v20  ;;  %v14815_v28 = vpop.f32.mrb[62].mxu1  ;;  %15115 = vmatpush3.bf16.msra.mxu1 %v16366_v21  ;;  %v474_v38 = vrot.slane %v47_v37, %v16926_v41  ;;  %v16402_v21 = vld [vmem:[%s20575_s1 + $0x17f0] sm:$0xff]  }
 0x2da   :  { %v14816_v30 = vpop.f32.mrb[63].mxu1  ;;  %15116 = vmatprep.subr.bf16.mxu1 %v16369_v29  ;;  %v16403_v24 = vld [vmem:[%s20575_s1 + $0x17b0] sm:$0xff]   ;;  %v48_v28 = vld [vmem:[%s20574_s0 + $0xb8] sm:$0xff] }
 0x2db   :  { %v19174_v31 = vadd.f32 %v14814_v26, %v10810_v25  ;;  %15095 = vmatpush3.bf16.msra.mxu0 %v16368_v27  ;;  %v482_v43 = vcombine.high %v474_v38, %v474_v38  ;;  %v893_v46 = vpack.c.bf16 %v474_v38, %v474_v38  ;;  %v16404_v25 = vld [vmem:[%s20575_s1 + $0x1778] sm:$0xff]   ;;  %v491_v29 = vrot.slane %v48_v28, %v16926_v41  ;;  %v16411_v38 = vld [vmem:[%s20575_s1 + $0x18c0] sm:$0xff]  }
 0x2dc   :  { %15096 = vmatprep.subr.bf16.mxu0 %v16371_v34  ;;  %v16405_v26 = vld [vmem:[%s20575_s1 + $0x1738] sm:$0xff]  }
 0x2dd   :  { %15117 = vmatpush3.bf16.msra.mxu1 %v16370_v33  ;;  %v894_v48 = vpack.c.bf16 %v482_v43, %v482_v43  ;;  %v16406_v27 = vld [vmem:[%s20575_s1 + $0x17f8] sm:$0xff]   ;;  %v16408_v33 = vld [vmem:[%s20575_s1 + $0x1840] sm:$0xff]   ;;  %v499_v34 = vcombine.high %v491_v29, %v491_v29  ;;  %v897_v37 = vpack.c.bf16 %v491_v29, %v491_v29 }
 0x2de   :  { %15118 = vmatprep.subr.bf16.mxu1 %v16373_v36  ;;  %v16407_v30 = vld [vmem:[%s20575_s1 + $0x17b8] sm:$0xff]   ;;  %v16410_v36 = vld [vmem:[%s20575_s1 + $0x1800] sm:$0xff]  }
 0x2df   :  { %15097 = vmatpush3.bf16.msra.mxu0 %v16372_v35  ;;  %11367 = vmatprep.mubr.bf16.mxu0 %v894_v48  ;;  %v16416_v48 = vld [vmem:[%s20575_s1 + $0x1888] sm:$0xff]   ;;  %v16444_v29 = vld [vmem:[%s20575_s1 + $0x19c0] sm:$0xff]  }
 0x2e0   :  { %15126 = vmatprep.subr.bf16.mxu0 %v16375_v42  ;;  %v16412_v42 = vld [vmem:[%s20575_s1 + $0x1880] sm:$0xff]  }
 0x2e1   :  { %15119 = vmatpush3.bf16.msra.mxu1 %v16374_v39  ;;  %v898_v39 = vpack.c.bf16 %v499_v34, %v499_v34 }
 0x2e2   :  { %15148 = vmatprep.subr.bf16.mxu1 %v16378_v47  ;;  %11368 = vmatmul.mubr.bf16.vlgmr.msra.gmra.mrb[88].mxu0 %v893_v46  ;;  %v16414_v46 = vld [vmem:[%s20575_s1 + $0x1808] sm:$0xff]  }
 0x2e3   :  { %15127 = vmatpush3.bf16.msra.mxu0 %v16377_v45  ;;  %11447 = vmatprep.mubr.bf16.mxu0 %v898_v39  ;;  %v16415_v47 = vld [vmem:[%s20575_s1 + $0x18c8] sm:$0xff]  }
 0x2e4   :  { %11408 = vmatmul.mubr.bf16.vlgmr.msra.gmra.mrb[88].mxu1 %v895_v51  ;;  %15128 = vmatprep.subr.bf16.mxu0 %v16380_v52  ;;  %v16419_v51 = vld [vmem:[%s20575_s1 + $0x18d0] sm:$0xff]   ;;  %v16449_v39 = vld [vmem:[%s20575_s1 + $0x1988] sm:$0xff]  }
 0x2e5   :  { %15149 = vmatpush3.bf16.msra.mxu1 %v16379_v50  ;;  %v16418_v50 = vld [vmem:[%s20575_s1 + $0x1810] sm:$0xff]  }
 0x2e6   :  { %15150 = vmatprep.subr.bf16.mxu1 %v16382_v55  ;;  %v16420_v52 = vld [vmem:[%s20575_s1 + $0x1890] sm:$0xff]   ;;  %v16423_v55 = vld [vmem:[%s20575_s1 + $0x18d8] sm:$0xff]  }
 0x2e7   :  { %15129 = vmatpush3.bf16.msra.mxu0 %v16381_v54  ;;  %v16422_v54 = vld [vmem:[%s20575_s1 + $0x1818] sm:$0xff]  }
 0x2e8   :  { %15130 = vmatprep.subr.bf16.mxu0 %v16384_v57  ;;  %v16425_v57 = vld [vmem:[%s20575_s1 + $0x1860] sm:$0xff]  }
 0x2e9   :  { %15151 = vmatpush3.bf16.msra.mxu1 %v16383_v56  ;;  %v16424_v56 = vld [vmem:[%s20575_s1 + $0x1898] sm:$0xff]  }
 0x2ea   :  { %15152 = vmatprep.subr.bf16.mxu1 %v16386_v59  ;;  %v16427_v59 = vld [vmem:[%s20575_s1 + $0x18e0] sm:$0xff]  }
 0x2eb   :  { %15131 = vmatpush3.bf16.msra.mxu0 %v16385_v58  ;;  %v16426_v58 = vld [vmem:[%s20575_s1 + $0x1820] sm:$0xff]  }
 0x2ec   :  { %15132 = vmatprep.subr.bf16.mxu0 %v16388_v61  ;;  %v16429_v61 = vld [vmem:[%s20575_s1 + $0x1868] sm:$0xff]  }
 0x2ed   :  { %15153 = vmatpush3.bf16.msra.mxu1 %v16387_v60  ;;  %v16428_v60 = vld [vmem:[%s20575_s1 + $0x18a0] sm:$0xff]  }
 0x2ee   :  { %15154 = vmatprep.subr.bf16.mxu1 %v16390_v63  ;;  %v16430_v63 = vld [vmem:[%s20575_s1 + $0x1828] sm:$0xff]  }
 0x2ef   :  { %15133 = vmatpush3.bf16.msra.mxu0 %v16389_v62 }
 0x2f0   :  { %15134 = vmatprep.subr.bf16.mxu0 %v16392_v1  ;;  %v16431_v1 = vld [vmem:[%s20575_s1 + $0x18e8] sm:$0xff]  }
 0x2f1   :  { %15155 = vmatpush3.bf16.msra.mxu1 %v16391_v0 }
 0x2f2   :  { %15156 = vmatprep.subr.bf16.mxu1 %v16394_v3 }
 0x2f3   :  { %15135 = vmatpush3.bf16.msra.mxu0 %v16393_v2 }
 0x2f4   :  { %15136 = vmatprep.subr.bf16.mxu0 %v16396_v5 }
 0x2f5   :  { %v14834_v6 = vpop.f32.mrb[64].mxu0  ;;  %15157 = vmatpush3.bf16.msra.mxu1 %v16395_v4 }
 0x2f6   :  { %v14835_v8 = vpop.f32.mrb[65].mxu0  ;;  %15158 = vmatprep.subr.bf16.mxu1 %v16398_v9 }
 0x2f7   :  { %v14836_v10 = vadd.f32 %v14835_v8, %v14834_v6  ;;  %v14837_v11 = vpop.f32.mrb[66].mxu0  ;;  %v14856_v12 = vpop.f32.mrb[64].mxu1  ;;  %15137 = vmatpush3.bf16.msra.mxu0 %v16397_v7  ;;  %v16432_v7 = vld [vmem:[%s20575_s1 + $0x18a8] sm:$0xff]   ;;  %v16433_v8 = vld [vmem:[%s20575_s1 + $0x1870] sm:$0xff]  }
 0x2f8   :  { %v14838_v15 = vpop.f32.mrb[67].mxu0  ;;  %v14857_v16 = vpop.f32.mrb[65].mxu1  ;;  %15138 = vmatprep.subr.bf16.mxu0 %v16400_v14  ;;  %v16434_v11 = vld [vmem:[%s20575_s1 + $0x1830] sm:$0xff]  }
 0x2f9   :  { %v10890_v17 = vadd.f32 %v14836_v10, %v19174_v31  ;;  %v14858_v18 = vadd.f32 %v14857_v16, %v14856_v12  ;;  %v14859_v20 = vpop.f32.mrb[66].mxu1  ;;  %15159 = vmatpush3.bf16.msra.mxu1 %v16399_v13  ;;  %v484_v31 = vcombine.high %v48_v28, %v48_v28  ;;  %v16435_v14 = vld [vmem:[%s20575_s1 + $0x18f0] sm:$0xff]  }
 0x2fa   :  { %v14860_v22 = vpop.f32.mrb[67].mxu1  ;;  %15160 = vmatprep.subr.bf16.mxu1 %v16402_v21  ;;  %v16436_v16 = vld [vmem:[%s20575_s1 + $0x18b0] sm:$0xff]   ;;  %v49_v20 = vld [vmem:[%s20574_s0 + $0xc0] sm:$0xff] }
 0x2fb   :  { %v19278_v23 = vadd.f32 %v14858_v18, %v10890_v17  ;;  %15139 = vmatpush3.bf16.msra.mxu0 %v16401_v19  ;;  %v498_v35 = vrot.slane %v484_v31, %v16926_v41  ;;  %v16437_v17 = vld [vmem:[%s20575_s1 + $0x1878] sm:$0xff]   ;;  %v508_v21 = vrot.slane %v49_v20, %v16926_v41 }
 0x2fc   :  { %15140 = vmatprep.subr.bf16.mxu0 %v16404_v25  ;;  %v16438_v18 = vld [vmem:[%s20575_s1 + $0x1838] sm:$0xff]  }
 0x2fd   :  { %15161 = vmatpush3.bf16.msra.mxu1 %v16403_v24  ;;  %v500_v40 = vcombine.high %v498_v35, %v498_v35  ;;  %v899_v43 = vpack.c.bf16 %v498_v35, %v498_v35  ;;  %v16439_v19 = vld [vmem:[%s20575_s1 + $0x18f8] sm:$0xff]   ;;  %v16441_v24 = vld [vmem:[%s20575_s1 + $0x1940] sm:$0xff]   ;;  %v516_v25 = vcombine.high %v508_v21, %v508_v21  ;;  %v901_v28 = vpack.c.bf16 %v508_v21, %v508_v21  ;;  %v16446_v35 = vld [vmem:[%s20575_s1 + $0x1948] sm:$0xff]  }
 0x2fe   :  { %15162 = vmatprep.subr.bf16.mxu1 %v16406_v27  ;;  %v16440_v22 = vld [vmem:[%s20575_s1 + $0x18b8] sm:$0xff]   ;;  %v16443_v27 = vld [vmem:[%s20575_s1 + $0x1900] sm:$0xff]  }
 0x2ff   :  { %15141 = vmatpush3.bf16.msra.mxu0 %v16405_v26  ;;  %v900_v45 = vpack.c.bf16 %v500_v40, %v500_v40  ;;  %v16450_v40 = vld [vmem:[%s20575_s1 + $0x1950] sm:$0xff]   ;;  %v16477_v21 = vld [vmem:[%s20575_s1 + $0x1ac0] sm:$0xff]  }
 0x300   :  { %15170 = vmatprep.subr.bf16.mxu0 %v16408_v33  ;;  %v16445_v33 = vld [vmem:[%s20575_s1 + $0x1980] sm:$0xff]  }
 0x301   :  { %15163 = vmatpush3.bf16.msra.mxu1 %v16407_v30  ;;  %11487 = vmatprep.mubr.bf16.mxu1 %v900_v45  ;;  %v902_v30 = vpack.c.bf16 %v516_v25, %v516_v25  ;;  %v16454_v45 = vld [vmem:[%s20575_s1 + $0x1958] sm:$0xff]  }
 0x302   :  { %11448 = vmatmul.mubr.bf16.vlgmr.msra.gmra.mrb[92].mxu0 %v897_v37  ;;  %15192 = vmatprep.subr.bf16.mxu1 %v16411_v38  ;;  %v16447_v37 = vld [vmem:[%s20575_s1 + $0x1908] sm:$0xff]  }
 0x303   :  { %15171 = vmatpush3.bf16.msra.mxu0 %v16410_v36  ;;  %11527 = vmatprep.mubr.bf16.mxu0 %v902_v30  ;;  %v16448_v38 = vld [vmem:[%s20575_s1 + $0x19c8] sm:$0xff]  }
 0x304   :  { %11488 = vmatmul.mubr.bf16.vlgmr.msra.gmra.mrb[92].mxu1 %v899_v43  ;;  %15172 = vmatprep.subr.bf16.mxu0 %v16413_v44  ;;  %v16452_v43 = vld [vmem:[%s20575_s1 + $0x19d0] sm:$0xff]   ;;  %v16482_v30 = vld [vmem:[%s20575_s1 + $0x1a88] sm:$0xff]  }
 0x305   :  { %15193 = vmatpush3.bf16.msra.mxu1 %v16412_v42  ;;  %v16451_v42 = vld [vmem:[%s20575_s1 + $0x1910] sm:$0xff]  }
 0x306   :  { %15194 = vmatprep.subr.bf16.mxu1 %v16415_v47  ;;  %v16453_v44 = vld [vmem:[%s20575_s1 + $0x1990] sm:$0xff]   ;;  %v16456_v47 = vld [vmem:[%s20575_s1 + $0x19d8] sm:$0xff]  }
 0x307   :  { %15173 = vmatpush3.bf16.msra.mxu0 %v16414_v46  ;;  %v16455_v46 = vld [vmem:[%s20575_s1 + $0x1918] sm:$0xff]  }
 0x308   :  { %15174 = vmatprep.subr.bf16.mxu0 %v16417_v49  ;;  %v16458_v49 = vld [vmem:[%s20575_s1 + $0x1960] sm:$0xff]  }
 0x309   :  { %15195 = vmatpush3.bf16.msra.mxu1 %v16416_v48  ;;  %v16457_v48 = vld [vmem:[%s20575_s1 + $0x1998] sm:$0xff]  }
 0x30a   :  { %15196 = vmatprep.subr.bf16.mxu1 %v16419_v51  ;;  %v16460_v51 = vld [vmem:[%s20575_s1 + $0x19e0] sm:$0xff]  }
 0x30b   :  { %15175 = vmatpush3.bf16.msra.mxu0 %v16418_v50  ;;  %v16459_v50 = vld [vmem:[%s20575_s1 + $0x1920] sm:$0xff]  }
 0x30c   :  { %15176 = vmatprep.subr.bf16.mxu0 %v16421_v53  ;;  %v16462_v53 = vld [vmem:[%s20575_s1 + $0x1968] sm:$0xff]  }
 0x30d   :  { %15197 = vmatpush3.bf16.msra.mxu1 %v16420_v52  ;;  %v16461_v52 = vld [vmem:[%s20575_s1 + $0x19a0] sm:$0xff]  }
 0x30e   :  { %15198 = vmatprep.subr.bf16.mxu1 %v16423_v55  ;;  %v16463_v55 = vld [vmem:[%s20575_s1 + $0x1928] sm:$0xff]  }
 0x30f   :  { %15177 = vmatpush3.bf16.msra.mxu0 %v16422_v54 }
 0x310   :  { %15178 = vmatprep.subr.bf16.mxu0 %v16425_v57  ;;  %v16464_v57 = vld [vmem:[%s20575_s1 + $0x19e8] sm:$0xff]  }
 0x311   :  { %15199 = vmatpush3.bf16.msra.mxu1 %v16424_v56 }
 0x312   :  { %15200 = vmatprep.subr.bf16.mxu1 %v16427_v59 }
 0x313   :  { %15179 = vmatpush3.bf16.msra.mxu0 %v16426_v58 }
 0x314   :  { %15180 = vmatprep.subr.bf16.mxu0 %v16429_v61  ;;  %v16465_v61 = vld [vmem:[%s20575_s1 + $0x19a8] sm:$0xff]  }
 0x315   :  { %v14878_v62 = vpop.f32.mrb[68].mxu0  ;;  %15201 = vmatpush3.bf16.msra.mxu1 %v16428_v60 }
 0x316   :  { %v14879_v0 = vpop.f32.mrb[69].mxu0  ;;  %15202 = vmatprep.subr.bf16.mxu1 %v16431_v1 }
 0x317   :  { %v14880_v2 = vadd.f32 %v14879_v0, %v14878_v62  ;;  %v14881_v3 = vpop.f32.mrb[70].mxu0  ;;  %v14900_v4 = vpop.f32.mrb[68].mxu1  ;;  %15181 = vmatpush3.bf16.msra.mxu0 %v16430_v63  ;;  %v16466_v62 = vld [vmem:[%s20575_s1 + $0x1970] sm:$0xff]  }
 0x318   :  { %v14882_v5 = vpop.f32.mrb[71].mxu0  ;;  %v14901_v6 = vpop.f32.mrb[69].mxu1  ;;  %15182 = vmatprep.subr.bf16.mxu0 %v16433_v8  ;;  %v16467_v3 = vld [vmem:[%s20575_s1 + $0x1930] sm:$0xff]  }
 0x319   :  { %v10970_v9 = vadd.f32 %v14880_v2, %v19278_v23  ;;  %v14902_v10 = vadd.f32 %v14901_v6, %v14900_v4  ;;  %v14903_v12 = vpop.f32.mrb[70].mxu1  ;;  %15203 = vmatpush3.bf16.msra.mxu1 %v16432_v7  ;;  %v501_v23 = vcombine.high %v49_v20, %v49_v20  ;;  %v16468_v5 = vld [vmem:[%s20575_s1 + $0x19f0] sm:$0xff]  }
 0x31a   :  { %v14904_v15 = vpop.f32.mrb[71].mxu1  ;;  %15204 = vmatprep.subr.bf16.mxu1 %v16435_v14  ;;  %v16469_v8 = vld [vmem:[%s20575_s1 + $0x19b0] sm:$0xff]   ;;  %v50_v12 = vld [vmem:[%s20574_s0 + $0xc8] sm:$0xff]  ;;  %v16473_v14 = vld [vmem:[%s20575_s1 + $0x19b8] sm:$0xff]  }
 0x31b   :  { %v19379_v13 = vadd.f32 %v14902_v10, %v10970_v9  ;;  %15183 = vmatpush3.bf16.msra.mxu0 %v16434_v11  ;;  %v515_v26 = vrot.slane %v501_v23, %v16926_v41  ;;  %v16470_v9 = vld [vmem:[%s20575_s1 + $0x1978] sm:$0xff]   ;;  %v518_v15 = vcombine.high %v50_v12, %v50_v12 }
 0x31c   :  { %15184 = vmatprep.subr.bf16.mxu0 %v16437_v17  ;;  %v16471_v10 = vld [vmem:[%s20575_s1 + $0x1938] sm:$0xff]  }
 0x31d   :  { %15205 = vmatpush3.bf16.msra.mxu1 %v16436_v16  ;;  %v517_v31 = vcombine.high %v515_v26, %v515_v26  ;;  %v903_v34 = vpack.c.bf16 %v515_v26, %v515_v26  ;;  %v16472_v11 = vld [vmem:[%s20575_s1 + $0x19f8] sm:$0xff]   ;;  %v16474_v16 = vld [vmem:[%s20575_s1 + $0x1a40] sm:$0xff]   ;;  %v16479_v26 = vld [vmem:[%s20575_s1 + $0x1a48] sm:$0xff]  }
 0x31e   :  { %15206 = vmatprep.subr.bf16.mxu1 %v16439_v19  ;;  %v16476_v19 = vld [vmem:[%s20575_s1 + $0x1a00] sm:$0xff]  }
 0x31f   :  { %15185 = vmatpush3.bf16.msra.mxu0 %v16438_v18  ;;  %v904_v36 = vpack.c.bf16 %v517_v31, %v517_v31  ;;  %v532_v18 = vrot.slane %v518_v15, %v16926_v41  ;;  %v16483_v31 = vld [vmem:[%s20575_s1 + $0x1a50] sm:$0xff]  }
 0x320   :  { %15214 = vmatprep.subr.bf16.mxu0 %v16441_v24  ;;  %v16478_v24 = vld [vmem:[%s20575_s1 + $0x1a80] sm:$0xff]  }
 0x321   :  { %15207 = vmatpush3.bf16.msra.mxu1 %v16440_v22  ;;  %11567 = vmatprep.mubr.bf16.mxu1 %v904_v36  ;;  %v534_v23 = vcombine.high %v532_v18, %v532_v18  ;;  %v907_v25 = vpack.c.bf16 %v532_v18, %v532_v18  ;;  %v16487_v36 = vld [vmem:[%s20575_s1 + $0x1a58] sm:$0xff]   ;;  %v16512_v18 = vld [vmem:[%s20575_s1 + $0x1b48] sm:$0xff]  }
 0x322   :  { %15236 = vmatprep.subr.bf16.mxu1 %v16444_v29  ;;  %11528 = vmatmul.mubr.bf16.vlgmr.msra.gmra.mrb[96].mxu0 %v901_v28  ;;  %v16480_v28 = vld [vmem:[%s20575_s1 + $0x1a08] sm:$0xff]  }
 0x323   :  { %15215 = vmatpush3.bf16.msra.mxu0 %v16443_v27  ;;  %v908_v27 = vpack.c.bf16 %v534_v23, %v534_v23  ;;  %v16481_v29 = vld [vmem:[%s20575_s1 + $0x1ac8] sm:$0xff]   ;;  %v16516_v23 = vld [vmem:[%s20575_s1 + $0x1b50] sm:$0xff]  }
 0x324   :  { %11568 = vmatmul.mubr.bf16.vlgmr.msra.gmra.mrb[96].mxu1 %v903_v34  ;;  %15216 = vmatprep.subr.bf16.mxu0 %v16446_v35  ;;  %v16485_v34 = vld [vmem:[%s20575_s1 + $0x1ad0] sm:$0xff]  }
 0x325   :  { %15237 = vmatpush3.bf16.msra.mxu1 %v16445_v33  ;;  %11647 = vmatprep.mubr.bf16.mxu1 %v908_v27  ;;  %v16484_v33 = vld [vmem:[%s20575_s1 + $0x1a10] sm:$0xff]   ;;  %v16520_v27 = vld [vmem:[%s20575_s1 + $0x1b58] sm:$0xff]  }
 0x326   :  { %15238 = vmatprep.subr.bf16.mxu1 %v16448_v38  ;;  %v16486_v35 = vld [vmem:[%s20575_s1 + $0x1a90] sm:$0xff]   ;;  %v16489_v38 = vld [vmem:[%s20575_s1 + $0x1ad8] sm:$0xff]  }
 0x327   :  { %15217 = vmatpush3.bf16.msra.mxu0 %v16447_v37  ;;  %v16488_v37 = vld [vmem:[%s20575_s1 + $0x1a18] sm:$0xff]  }
 0x328   :  { %15218 = vmatprep.subr.bf16.mxu0 %v16450_v40  ;;  %v16491_v40 = vld [vmem:[%s20575_s1 + $0x1a60] sm:$0xff]  }
 0x329   :  { %15239 = vmatpush3.bf16.msra.mxu1 %v16449_v39  ;;  %v16490_v39 = vld [vmem:[%s20575_s1 + $0x1a98] sm:$0xff]  }
 0x32a   :  { %15240 = vmatprep.subr.bf16.mxu1 %v16452_v43  ;;  %v16493_v43 = vld [vmem:[%s20575_s1 + $0x1ae0] sm:$0xff]  }
 0x32b   :  { %15219 = vmatpush3.bf16.msra.mxu0 %v16451_v42  ;;  %v16492_v42 = vld [vmem:[%s20575_s1 + $0x1a20] sm:$0xff]  }
 0x32c   :  { %15220 = vmatprep.subr.bf16.mxu0 %v16454_v45  ;;  %v16495_v45 = vld [vmem:[%s20575_s1 + $0x1a68] sm:$0xff]  }
 0x32d   :  { %15241 = vmatpush3.bf16.msra.mxu1 %v16453_v44  ;;  %v16494_v44 = vld [vmem:[%s20575_s1 + $0x1aa0] sm:$0xff]  }
 0x32e   :  { %15242 = vmatprep.subr.bf16.mxu1 %v16456_v47  ;;  %v16496_v47 = vld [vmem:[%s20575_s1 + $0x1a28] sm:$0xff]  }
 0x32f   :  { %15221 = vmatpush3.bf16.msra.mxu0 %v16455_v46 }
 0x330   :  { %15222 = vmatprep.subr.bf16.mxu0 %v16458_v49  ;;  %v16497_v49 = vld [vmem:[%s20575_s1 + $0x1ae8] sm:$0xff]  }
 0x331   :  { %15243 = vmatpush3.bf16.msra.mxu1 %v16457_v48 }
 0x332   :  { %15244 = vmatprep.subr.bf16.mxu1 %v16460_v51 }
 0x333   :  { %15223 = vmatpush3.bf16.msra.mxu0 %v16459_v50 }
 0x334   :  { %15224 = vmatprep.subr.bf16.mxu0 %v16462_v53  ;;  %v16498_v53 = vld [vmem:[%s20575_s1 + $0x1aa8] sm:$0xff]  }
 0x335   :  { %v14922_v54 = vpop.f32.mrb[72].mxu0  ;;  %15245 = vmatpush3.bf16.msra.mxu1 %v16461_v52 }
 0x336   :  { %v14923_v56 = vpop.f32.mrb[73].mxu0  ;;  %15246 = vmatprep.subr.bf16.mxu1 %v16464_v57 }
 0x337   :  { %v14924_v58 = vadd.f32 %v14923_v56, %v14922_v54  ;;  %v14925_v59 = vpop.f32.mrb[74].mxu0  ;;  %v14944_v60 = vpop.f32.mrb[72].mxu1  ;;  %15225 = vmatpush3.bf16.msra.mxu0 %v16463_v55  ;;  %v16499_v54 = vld [vmem:[%s20575_s1 + $0x1a70] sm:$0xff]  }
 0x338   :  { %v14926_v63 = vpop.f32.mrb[75].mxu0  ;;  %v14945_v0 = vpop.f32.mrb[73].mxu1  ;;  %15226 = vmatprep.subr.bf16.mxu0 %v16466_v62  ;;  %v16500_v59 = vld [vmem:[%s20575_s1 + $0x1a30] sm:$0xff]  }
 0x339   :  { %v11050_v1 = vadd.f32 %v14924_v58, %v19379_v13  ;;  %v14946_v2 = vadd.f32 %v14945_v0, %v14944_v60  ;;  %v14947_v4 = vpop.f32.mrb[74].mxu1  ;;  %15247 = vmatpush3.bf16.msra.mxu1 %v16465_v61  ;;  %v525_v13 = vrot.slane %v50_v12, %v16926_v41  ;;  %v16501_v61 = vld [vmem:[%s20575_s1 + $0x1af0] sm:$0xff]  }
 0x33a   :  { %v14948_v6 = vpop.f32.mrb[75].mxu1  ;;  %15248 = vmatprep.subr.bf16.mxu1 %v16468_v5  ;;  %v16502_v0 = vld [vmem:[%s20575_s1 + $0x1ab0] sm:$0xff]  }
 0x33b   :  { %v19486_v7 = vadd.f32 %v14946_v2, %v11050_v1  ;;  %15227 = vmatpush3.bf16.msra.mxu0 %v16467_v3  ;;  %v533_v17 = vcombine.high %v525_v13, %v525_v13  ;;  %v905_v20 = vpack.c.bf16 %v525_v13, %v525_v13  ;;  %v16503_v1 = vld [vmem:[%s20575_s1 + $0x1a78] sm:$0xff]   ;;  %v51_v4 = vld [vmem:[%s20574_s0 + $0xd0] sm:$0xff]  ;;  %v16510_v13 = vld [vmem:[%s20575_s1 + $0x1bc0] sm:$0xff]  }
 0x33c   :  { %15228 = vmatprep.subr.bf16.mxu0 %v16470_v9  ;;  %v16504_v2 = vld [vmem:[%s20575_s1 + $0x1a38] sm:$0xff]   ;;  %v542_v5 = vrot.slane %v51_v4, %v16926_v41 }
 0x33d   :  { %15249 = vmatpush3.bf16.msra.mxu1 %v16469_v8  ;;  %v906_v22 = vpack.c.bf16 %v533_v17, %v533_v17  ;;  %v16505_v3 = vld [vmem:[%s20575_s1 + $0x1af8] sm:$0xff]   ;;  %v16507_v8 = vld [vmem:[%s20575_s1 + $0x1b40] sm:$0xff]  }
 0x33e   :  { %15250 = vmatprep.subr.bf16.mxu1 %v16472_v11  ;;  %v16506_v6 = vld [vmem:[%s20575_s1 + $0x1ab8] sm:$0xff]   ;;  %v550_v9 = vcombine.high %v542_v5, %v542_v5  ;;  %v16509_v11 = vld [vmem:[%s20575_s1 + $0x1b00] sm:$0xff]   ;;  %v909_v12 = vpack.c.bf16 %v542_v5, %v542_v5 }
 0x33f   :  { %15229 = vmatpush3.bf16.msra.mxu0 %v16471_v10  ;;  %11607 = vmatprep.mubr.bf16.mxu0 %v906_v22  ;;  %v16515_v22 = vld [vmem:[%s20575_s1 + $0x1b88] sm:$0xff]   ;;  %v16543_v5 = vld [vmem:[%s20575_s1 + $0x1cc0] sm:$0xff]  }
 0x340   :  { %15258 = vmatprep.subr.bf16.mxu0 %v16474_v16  ;;  %v16511_v16 = vld [vmem:[%s20575_s1 + $0x1b80] sm:$0xff]  }
 0x341   :  { %15251 = vmatpush3.bf16.msra.mxu1 %v16473_v14  ;;  %v910_v14 = vpack.c.bf16 %v550_v9, %v550_v9 }
 0x342   :  { %15280 = vmatprep.subr.bf16.mxu1 %v16477_v21  ;;  %11608 = vmatmul.mubr.bf16.vlgmr.msra.gmra.mrb[100].mxu0 %v905_v20  ;;  %v16513_v20 = vld [vmem:[%s20575_s1 + $0x1b08] sm:$0xff]  }
 0x343   :  { %15259 = vmatpush3.bf16.msra.mxu0 %v16476_v19  ;;  %11687 = vmatprep.mubr.bf16.mxu0 %v910_v14  ;;  %v16514_v21 = vld [vmem:[%s20575_s1 + $0x1bc8] sm:$0xff]  }
 0x344   :  { %11648 = vmatmul.mubr.bf16.vlgmr.msra.gmra.mrb[100].mxu1 %v907_v25  ;;  %15260 = vmatprep.subr.bf16.mxu0 %v16479_v26  ;;  %v16518_v25 = vld [vmem:[%s20575_s1 + $0x1bd0] sm:$0xff]   ;;  %v16548_v14 = vld [vmem:[%s20575_s1 + $0x1c88] sm:$0xff]  }
 0x345   :  { %15281 = vmatpush3.bf16.msra.mxu1 %v16478_v24  ;;  %v16517_v24 = vld [vmem:[%s20575_s1 + $0x1b10] sm:$0xff]  }
 0x346   :  { %15282 = vmatprep.subr.bf16.mxu1 %v16481_v29  ;;  %v16519_v26 = vld [vmem:[%s20575_s1 + $0x1b90] sm:$0xff]   ;;  %v16522_v29 = vld [vmem:[%s20575_s1 + $0x1bd8] sm:$0xff]  }
 0x347   :  { %15261 = vmatpush3.bf16.msra.mxu0 %v16480_v28  ;;  %v16521_v28 = vld [vmem:[%s20575_s1 + $0x1b18] sm:$0xff]  }
 0x348   :  { %15262 = vmatprep.subr.bf16.mxu0 %v16483_v31  ;;  %v16524_v31 = vld [vmem:[%s20575_s1 + $0x1b60] sm:$0xff]  }
 0x349   :  { %15283 = vmatpush3.bf16.msra.mxu1 %v16482_v30  ;;  %v16523_v30 = vld [vmem:[%s20575_s1 + $0x1b98] sm:$0xff]  }
 0x34a   :  { %15284 = vmatprep.subr.bf16.mxu1 %v16485_v34  ;;  %v16526_v34 = vld [vmem:[%s20575_s1 + $0x1be0] sm:$0xff]  }
 0x34b   :  { %15263 = vmatpush3.bf16.msra.mxu0 %v16484_v33  ;;  %v16525_v33 = vld [vmem:[%s20575_s1 + $0x1b20] sm:$0xff]  }
 0x34c   :  { %15264 = vmatprep.subr.bf16.mxu0 %v16487_v36  ;;  %v16528_v36 = vld [vmem:[%s20575_s1 + $0x1b68] sm:$0xff]  }
 0x34d   :  { %15285 = vmatpush3.bf16.msra.mxu1 %v16486_v35  ;;  %v16527_v35 = vld [vmem:[%s20575_s1 + $0x1ba0] sm:$0xff]  }
 0x34e   :  { %15286 = vmatprep.subr.bf16.mxu1 %v16489_v38  ;;  %v16529_v38 = vld [vmem:[%s20575_s1 + $0x1b28] sm:$0xff]  }
 0x34f   :  { %15265 = vmatpush3.bf16.msra.mxu0 %v16488_v37 }
 0x350   :  { %15266 = vmatprep.subr.bf16.mxu0 %v16491_v40  ;;  %v16530_v40 = vld [vmem:[%s20575_s1 + $0x1be8] sm:$0xff]  }
 0x351   :  { %15287 = vmatpush3.bf16.msra.mxu1 %v16490_v39 }
 0x352   :  { %15288 = vmatprep.subr.bf16.mxu1 %v16493_v43 }
 0x353   :  { %15267 = vmatpush3.bf16.msra.mxu0 %v16492_v42 }
 0x354   :  { %15268 = vmatprep.subr.bf16.mxu0 %v16495_v45 }
 0x355   :  { %v14966_v46 = vpop.f32.mrb[76].mxu0  ;;  %15289 = vmatpush3.bf16.msra.mxu1 %v16494_v44 }
 0x356   :  { %v14967_v48 = vpop.f32.mrb[77].mxu0  ;;  %15290 = vmatprep.subr.bf16.mxu1 %v16497_v49 }
 0x357   :  { %v14968_v50 = vadd.f32 %v14967_v48, %v14966_v46  ;;  %v14969_v51 = vpop.f32.mrb[78].mxu0  ;;  %v14988_v52 = vpop.f32.mrb[76].mxu1  ;;  %15269 = vmatpush3.bf16.msra.mxu0 %v16496_v47  ;;  %v16531_v47 = vld [vmem:[%s20575_s1 + $0x1ba8] sm:$0xff]   ;;  %v16532_v48 = vld [vmem:[%s20575_s1 + $0x1b70] sm:$0xff]  }
 0x358   :  { %v14970_v55 = vpop.f32.mrb[79].mxu0  ;;  %v14989_v56 = vpop.f32.mrb[77].mxu1  ;;  %15270 = vmatprep.subr.bf16.mxu0 %v16499_v54  ;;  %v16533_v51 = vld [vmem:[%s20575_s1 + $0x1b30] sm:$0xff]  }
 0x359   :  { %v11130_v57 = vadd.f32 %v14968_v50, %v19486_v7  ;;  %v14990_v58 = vadd.f32 %v14989_v56, %v14988_v52  ;;  %v14991_v60 = vpop.f32.mrb[78].mxu1  ;;  %15291 = vmatpush3.bf16.msra.mxu1 %v16498_v53  ;;  %v535_v7 = vcombine.high %v51_v4, %v51_v4  ;;  %v16534_v54 = vld [vmem:[%s20575_s1 + $0x1bf0] sm:$0xff]  }
 0x35a   :  { %v14992_v62 = vpop.f32.mrb[79].mxu1  ;;  %15292 = vmatprep.subr.bf16.mxu1 %v16501_v61  ;;  %v16535_v56 = vld [vmem:[%s20575_s1 + $0x1bb0] sm:$0xff]   ;;  %v52_v60 = vld [vmem:[%s20574_s0 + $0xd8] sm:$0xff] }
 0x35b   :  { %v19590_v63 = vadd.f32 %v14990_v58, %v11130_v57  ;;  %15271 = vmatpush3.bf16.msra.mxu0 %v16500_v59  ;;  %v549_v10 = vrot.slane %v535_v7, %v16926_v41  ;;  %v16536_v57 = vld [vmem:[%s20575_s1 + $0x1b78] sm:$0xff]   ;;  %v559_v61 = vrot.slane %v52_v60, %v16926_v41 }
 0x35c   :  { %15272 = vmatprep.subr.bf16.mxu0 %v16503_v1  ;;  %v16537_v58 = vld [vmem:[%s20575_s1 + $0x1b38] sm:$0xff]  }
 0x35d   :  { %15293 = vmatpush3.bf16.msra.mxu1 %v16502_v0  ;;  %v551_v15 = vcombine.high %v549_v10, %v549_v10  ;;  %v911_v17 = vpack.c.bf16 %v549_v10, %v549_v10  ;;  %v16538_v59 = vld [vmem:[%s20575_s1 + $0x1bf8] sm:$0xff]   ;;  %v16540_v0 = vld [vmem:[%s20575_s1 + $0x1c40] sm:$0xff]   ;;  %v567_v1 = vcombine.high %v559_v61, %v559_v61  ;;  %v913_v4 = vpack.c.bf16 %v559_v61, %v559_v61  ;;  %v16545_v10 = vld [vmem:[%s20575_s1 + $0x1c48] sm:$0xff]  }
 0x35e   :  { %15294 = vmatprep.subr.bf16.mxu1 %v16505_v3  ;;  %v16539_v62 = vld [vmem:[%s20575_s1 + $0x1bb8] sm:$0xff]   ;;  %v16542_v3 = vld [vmem:[%s20575_s1 + $0x1c00] sm:$0xff]  }
 0x35f   :  { %15273 = vmatpush3.bf16.msra.mxu0 %v16504_v2  ;;  %v912_v19 = vpack.c.bf16 %v551_v15, %v551_v15  ;;  %v16549_v15 = vld [vmem:[%s20575_s1 + $0x1c50] sm:$0xff]   ;;  %v16576_v61 = vld [vmem:[%s20575_s1 + $0x1dc0] sm:$0xff]  }
 0x360   :  { %15302 = vmatprep.subr.bf16.mxu0 %v16507_v8  ;;  %v16544_v8 = vld [vmem:[%s20575_s1 + $0x1c80] sm:$0xff]  }
 0x361   :  { %15295 = vmatpush3.bf16.msra.mxu1 %v16506_v6  ;;  %11727 = vmatprep.mubr.bf16.mxu1 %v912_v19  ;;  %v914_v6 = vpack.c.bf16 %v567_v1, %v567_v1  ;;  %v16553_v19 = vld [vmem:[%s20575_s1 + $0x1c58] sm:$0xff]  }
 0x362   :  { %11688 = vmatmul.mubr.bf16.vlgmr.msra.gmra.mrb[104].mxu0 %v909_v12  ;;  %15324 = vmatprep.subr.bf16.mxu1 %v16510_v13  ;;  %v16546_v12 = vld [vmem:[%s20575_s1 + $0x1c08] sm:$0xff]  }
 0x363   :  { %15303 = vmatpush3.bf16.msra.mxu0 %v16509_v11  ;;  %11767 = vmatprep.mubr.bf16.mxu0 %v914_v6  ;;  %v16547_v13 = vld [vmem:[%s20575_s1 + $0x1cc8] sm:$0xff]  }
 0x364   :  { %11728 = vmatmul.mubr.bf16.vlgmr.msra.gmra.mrb[104].mxu1 %v911_v17  ;;  %15304 = vmatprep.subr.bf16.mxu0 %v16512_v18  ;;  %v16551_v17 = vld [vmem:[%s20575_s1 + $0x1cd0] sm:$0xff]   ;;  %v16581_v6 = vld [vmem:[%s20575_s1 + $0x1d88] sm:$0xff]  }
 0x365   :  { %15325 = vmatpush3.bf16.msra.mxu1 %v16511_v16  ;;  %v16550_v16 = vld [vmem:[%s20575_s1 + $0x1c10] sm:$0xff]  }
 0x366   :  { %15326 = vmatprep.subr.bf16.mxu1 %v16514_v21  ;;  %v16552_v18 = vld [vmem:[%s20575_s1 + $0x1c90] sm:$0xff]   ;;  %v16555_v21 = vld [vmem:[%s20575_s1 + $0x1cd8] sm:$0xff]  }
 0x367   :  { %15305 = vmatpush3.bf16.msra.mxu0 %v16513_v20  ;;  %v16554_v20 = vld [vmem:[%s20575_s1 + $0x1c18] sm:$0xff]  }
 0x368   :  { %15306 = vmatprep.subr.bf16.mxu0 %v16516_v23  ;;  %v16557_v23 = vld [vmem:[%s20575_s1 + $0x1c60] sm:$0xff]  }
 0x369   :  { %15327 = vmatpush3.bf16.msra.mxu1 %v16515_v22  ;;  %v16556_v22 = vld [vmem:[%s20575_s1 + $0x1c98] sm:$0xff]  }
 0x36a   :  { %15328 = vmatprep.subr.bf16.mxu1 %v16518_v25  ;;  %v16559_v25 = vld [vmem:[%s20575_s1 + $0x1ce0] sm:$0xff]  }
 0x36b   :  { %15307 = vmatpush3.bf16.msra.mxu0 %v16517_v24  ;;  %v16558_v24 = vld [vmem:[%s20575_s1 + $0x1c20] sm:$0xff]  }
 0x36c   :  { %15308 = vmatprep.subr.bf16.mxu0 %v16520_v27  ;;  %v16561_v27 = vld [vmem:[%s20575_s1 + $0x1c68] sm:$0xff]  }
 0x36d   :  { %15329 = vmatpush3.bf16.msra.mxu1 %v16519_v26  ;;  %v16560_v26 = vld [vmem:[%s20575_s1 + $0x1ca0] sm:$0xff]  }
 0x36e   :  { %15330 = vmatprep.subr.bf16.mxu1 %v16522_v29  ;;  %v16562_v29 = vld [vmem:[%s20575_s1 + $0x1c28] sm:$0xff]  }
 0x36f   :  { %15309 = vmatpush3.bf16.msra.mxu0 %v16521_v28 }
 0x370   :  { %15310 = vmatprep.subr.bf16.mxu0 %v16524_v31  ;;  %v16563_v31 = vld [vmem:[%s20575_s1 + $0x1ce8] sm:$0xff]  }
 0x371   :  { %15331 = vmatpush3.bf16.msra.mxu1 %v16523_v30 }
 0x372   :  { %15332 = vmatprep.subr.bf16.mxu1 %v16526_v34 }
 0x373   :  { %15311 = vmatpush3.bf16.msra.mxu0 %v16525_v33 }
 0x374   :  { %15312 = vmatprep.subr.bf16.mxu0 %v16528_v36  ;;  %v16564_v36 = vld [vmem:[%s20575_s1 + $0x1ca8] sm:$0xff]  }
 0x375   :  { %v15010_v37 = vpop.f32.mrb[80].mxu0  ;;  %15333 = vmatpush3.bf16.msra.mxu1 %v16527_v35 }
 0x376   :  { %v15011_v39 = vpop.f32.mrb[81].mxu0  ;;  %15334 = vmatprep.subr.bf16.mxu1 %v16530_v40 }
 0x377   :  { %v15012_v42 = vadd.f32 %v15011_v39, %v15010_v37  ;;  %v15013_v43 = vpop.f32.mrb[82].mxu0  ;;  %v15032_v44 = vpop.f32.mrb[80].mxu1  ;;  %15313 = vmatpush3.bf16.msra.mxu0 %v16529_v38  ;;  %v16565_v37 = vld [vmem:[%s20575_s1 + $0x1c70] sm:$0xff]  }
 0x378   :  { %v15014_v45 = vpop.f32.mrb[83].mxu0  ;;  %v15033_v46 = vpop.f32.mrb[81].mxu1  ;;  %15314 = vmatprep.subr.bf16.mxu0 %v16532_v48  ;;  %v16566_v43 = vld [vmem:[%s20575_s1 + $0x1c30] sm:$0xff]  }
 0x379   :  { %v11210_v49 = vadd.f32 %v15012_v42, %v19590_v63  ;;  %v15034_v50 = vadd.f32 %v15033_v46, %v15032_v44  ;;  %v15035_v52 = vpop.f32.mrb[82].mxu1  ;;  %15335 = vmatpush3.bf16.msra.mxu1 %v16531_v47  ;;  %v552_v63 = vcombine.high %v52_v60, %v52_v60  ;;  %v16567_v45 = vld [vmem:[%s20575_s1 + $0x1cf0] sm:$0xff]  }
 0x37a   :  { %v15036_v55 = vpop.f32.mrb[83].mxu1  ;;  %15336 = vmatprep.subr.bf16.mxu1 %v16534_v54  ;;  %v16568_v48 = vld [vmem:[%s20575_s1 + $0x1cb0] sm:$0xff]   ;;  %v53_v52 = vld [vmem:[%s20574_s0 + $0xe0] sm:$0xff]  ;;  %v16572_v54 = vld [vmem:[%s20575_s1 + $0x1cb8] sm:$0xff]  }
 0x37b   :  { %v19691_v53 = vadd.f32 %v15034_v50, %v11210_v49  ;;  %15315 = vmatpush3.bf16.msra.mxu0 %v16533_v51  ;;  %v566_v2 = vrot.slane %v552_v63, %v16926_v41  ;;  %v16569_v49 = vld [vmem:[%s20575_s1 + $0x1c78] sm:$0xff]   ;;  %v569_v55 = vcombine.high %v53_v52, %v53_v52 }
 0x37c   :  { %15316 = vmatprep.subr.bf16.mxu0 %v16536_v57  ;;  %v16570_v50 = vld [vmem:[%s20575_s1 + $0x1c38] sm:$0xff]  }
 0x37d   :  { %15337 = vmatpush3.bf16.msra.mxu1 %v16535_v56  ;;  %v568_v7 = vcombine.high %v566_v2, %v566_v2  ;;  %v915_v9 = vpack.c.bf16 %v566_v2, %v566_v2  ;;  %v16571_v51 = vld [vmem:[%s20575_s1 + $0x1cf8] sm:$0xff]   ;;  %v16573_v56 = vld [vmem:[%s20575_s1 + $0x1d40] sm:$0xff]   ;;  %v16578_v2 = vld [vmem:[%s20575_s1 + $0x1d48] sm:$0xff]  }
 0x37e   :  { %15338 = vmatprep.subr.bf16.mxu1 %v16538_v59  ;;  %v16575_v59 = vld [vmem:[%s20575_s1 + $0x1d00] sm:$0xff]  }
 0x37f   :  { %15317 = vmatpush3.bf16.msra.mxu0 %v16537_v58  ;;  %v916_v11 = vpack.c.bf16 %v568_v7, %v568_v7  ;;  %v583_v58 = vrot.slane %v569_v55, %v16926_v41  ;;  %v16582_v7 = vld [vmem:[%s20575_s1 + $0x1d50] sm:$0xff]  }
 0x380   :  { %15346 = vmatprep.subr.bf16.mxu0 %v16540_v0  ;;  %v16577_v0 = vld [vmem:[%s20575_s1 + $0x1d80] sm:$0xff]  }
 0x381   :  { %15339 = vmatpush3.bf16.msra.mxu1 %v16539_v62  ;;  %11807 = vmatprep.mubr.bf16.mxu1 %v916_v11  ;;  %v585_v63 = vcombine.high %v583_v58, %v583_v58  ;;  %v919_v1 = vpack.c.bf16 %v583_v58, %v583_v58  ;;  %v16586_v11 = vld [vmem:[%s20575_s1 + $0x1d58] sm:$0xff]   ;;  %v16611_v58 = vld [vmem:[%s20575_s1 + $0x1e48] sm:$0xff]  }
 0x382   :  { %15368 = vmatprep.subr.bf16.mxu1 %v16543_v5  ;;  %11768 = vmatmul.mubr.bf16.vlgmr.msra.gmra.mrb[108].mxu0 %v913_v4  ;;  %v16579_v4 = vld [vmem:[%s20575_s1 + $0x1d08] sm:$0xff]  }
 0x383   :  { %15347 = vmatpush3.bf16.msra.mxu0 %v16542_v3  ;;  %v920_v3 = vpack.c.bf16 %v585_v63, %v585_v63  ;;  %v16580_v5 = vld [vmem:[%s20575_s1 + $0x1dc8] sm:$0xff]   ;;  %v16615_v63 = vld [vmem:[%s20575_s1 + $0x1e50] sm:$0xff]  }
 0x384   :  { %11808 = vmatmul.mubr.bf16.vlgmr.msra.gmra.mrb[108].mxu1 %v915_v9  ;;  %15348 = vmatprep.subr.bf16.mxu0 %v16545_v10  ;;  %v16584_v9 = vld [vmem:[%s20575_s1 + $0x1dd0] sm:$0xff]  }
 0x385   :  { %15369 = vmatpush3.bf16.msra.mxu1 %v16544_v8  ;;  %11887 = vmatprep.mubr.bf16.mxu1 %v920_v3  ;;  %v16583_v8 = vld [vmem:[%s20575_s1 + $0x1d10] sm:$0xff]   ;;  %v16619_v3 = vld [vmem:[%s20575_s1 + $0x1e58] sm:$0xff]  }
 0x386   :  { %15370 = vmatprep.subr.bf16.mxu1 %v16547_v13  ;;  %v16585_v10 = vld [vmem:[%s20575_s1 + $0x1d90] sm:$0xff]   ;;  %v16588_v13 = vld [vmem:[%s20575_s1 + $0x1dd8] sm:$0xff]  }
 0x387   :  { %15349 = vmatpush3.bf16.msra.mxu0 %v16546_v12  ;;  %v16587_v12 = vld [vmem:[%s20575_s1 + $0x1d18] sm:$0xff]  }
 0x388   :  { %15350 = vmatprep.subr.bf16.mxu0 %v16549_v15  ;;  %v16590_v15 = vld [vmem:[%s20575_s1 + $0x1d60] sm:$0xff]  }
 0x389   :  { %15371 = vmatpush3.bf16.msra.mxu1 %v16548_v14  ;;  %v16589_v14 = vld [vmem:[%s20575_s1 + $0x1d98] sm:$0xff]  }
 0x38a   :  { %15372 = vmatprep.subr.bf16.mxu1 %v16551_v17  ;;  %v16592_v17 = vld [vmem:[%s20575_s1 + $0x1de0] sm:$0xff]  }
 0x38b   :  { %15351 = vmatpush3.bf16.msra.mxu0 %v16550_v16  ;;  %v16591_v16 = vld [vmem:[%s20575_s1 + $0x1d20] sm:$0xff]  }
 0x38c   :  { %15352 = vmatprep.subr.bf16.mxu0 %v16553_v19  ;;  %v16594_v19 = vld [vmem:[%s20575_s1 + $0x1d68] sm:$0xff]  }
 0x38d   :  { %15373 = vmatpush3.bf16.msra.mxu1 %v16552_v18  ;;  %v16593_v18 = vld [vmem:[%s20575_s1 + $0x1da0] sm:$0xff]  }
 0x38e   :  { %15374 = vmatprep.subr.bf16.mxu1 %v16555_v21  ;;  %v16595_v21 = vld [vmem:[%s20575_s1 + $0x1d28] sm:$0xff]  }
 0x38f   :  { %15353 = vmatpush3.bf16.msra.mxu0 %v16554_v20 }
 0x390   :  { %15354 = vmatprep.subr.bf16.mxu0 %v16557_v23  ;;  %v16596_v23 = vld [vmem:[%s20575_s1 + $0x1de8] sm:$0xff]  }
 0x391   :  { %15375 = vmatpush3.bf16.msra.mxu1 %v16556_v22 }
 0x392   :  { %15376 = vmatprep.subr.bf16.mxu1 %v16559_v25 }
 0x393   :  { %15355 = vmatpush3.bf16.msra.mxu0 %v16558_v24 }
 0x394   :  { %15356 = vmatprep.subr.bf16.mxu0 %v16561_v27  ;;  %v16597_v27 = vld [vmem:[%s20575_s1 + $0x1da8] sm:$0xff]  }
 0x395   :  { %v15054_v28 = vpop.f32.mrb[84].mxu0  ;;  %15377 = vmatpush3.bf16.msra.mxu1 %v16560_v26 }
 0x396   :  { %v15055_v30 = vpop.f32.mrb[85].mxu0  ;;  %15378 = vmatprep.subr.bf16.mxu1 %v16563_v31 }
 0x397   :  { %v15056_v33 = vadd.f32 %v15055_v30, %v15054_v28  ;;  %v15057_v34 = vpop.f32.mrb[86].mxu0  ;;  %v15076_v35 = vpop.f32.mrb[84].mxu1  ;;  %15357 = vmatpush3.bf16.msra.mxu0 %v16562_v29  ;;  %v16598_v28 = vld [vmem:[%s20575_s1 + $0x1d70] sm:$0xff]  }
 0x398   :  { %v15058_v38 = vpop.f32.mrb[87].mxu0  ;;  %v15077_v39 = vpop.f32.mrb[85].mxu1  ;;  %15358 = vmatprep.subr.bf16.mxu0 %v16565_v37  ;;  %v16599_v34 = vld [vmem:[%s20575_s1 + $0x1d30] sm:$0xff]  }
 0x399   :  { %v11290_v40 = vadd.f32 %v15056_v33, %v19691_v53  ;;  %v15078_v42 = vadd.f32 %v15077_v39, %v15076_v35  ;;  %v15079_v44 = vpop.f32.mrb[86].mxu1  ;;  %15379 = vmatpush3.bf16.msra.mxu1 %v16564_v36  ;;  %v576_v53 = vrot.slane %v53_v52, %v16926_v41  ;;  %v16600_v36 = vld [vmem:[%s20575_s1 + $0x1df0] sm:$0xff]  }
 0x39a   :  { %v15080_v46 = vpop.f32.mrb[87].mxu1  ;;  %15380 = vmatprep.subr.bf16.mxu1 %v16567_v45  ;;  %v16601_v39 = vld [vmem:[%s20575_s1 + $0x1db0] sm:$0xff]   ;;  %v54_v44 = vld [vmem:[%s20574_s0 + $0xe8] sm:$0xff] }
 0x39b   :  { %v19798_v47 = vadd.f32 %v15078_v42, %v11290_v40  ;;  %15359 = vmatpush3.bf16.msra.mxu0 %v16566_v43  ;;  %v584_v57 = vcombine.high %v576_v53, %v576_v53  ;;  %v917_v60 = vpack.c.bf16 %v576_v53, %v576_v53  ;;  %v16602_v40 = vld [vmem:[%s20575_s1 + $0x1d78] sm:$0xff]   ;;  %v593_v45 = vrot.slane %v54_v44, %v16926_v41  ;;  %v16609_v53 = vld [vmem:[%s20575_s1 + $0x1ec0] sm:$0xff]  }
 0x39c   :  { %15360 = vmatprep.subr.bf16.mxu0 %v16569_v49  ;;  %v16603_v42 = vld [vmem:[%s20575_s1 + $0x1d38] sm:$0xff]  }
 0x39d   :  { %15381 = vmatpush3.bf16.msra.mxu1 %v16568_v48  ;;  %v918_v62 = vpack.c.bf16 %v584_v57, %v584_v57  ;;  %v16604_v43 = vld [vmem:[%s20575_s1 + $0x1df8] sm:$0xff]   ;;  %v16606_v48 = vld [vmem:[%s20575_s1 + $0x1e40] sm:$0xff]   ;;  %v601_v49 = vcombine.high %v593_v45, %v593_v45  ;;  %v921_v52 = vpack.c.bf16 %v593_v45, %v593_v45 }
 0x39e   :  { %15382 = vmatprep.subr.bf16.mxu1 %v16571_v51  ;;  %v16605_v46 = vld [vmem:[%s20575_s1 + $0x1db8] sm:$0xff]   ;;  %v16608_v51 = vld [vmem:[%s20575_s1 + $0x1e00] sm:$0xff]  }
 0x39f   :  { %15361 = vmatpush3.bf16.msra.mxu0 %v16570_v50  ;;  %11847 = vmatprep.mubr.bf16.mxu0 %v918_v62  ;;  %v16614_v62 = vld [vmem:[%s20575_s1 + $0x1e88] sm:$0xff]   ;;  %v16642_v45 = vld [vmem:[%s20575_s1 + $0x1fc0] sm:$0xff]  }
 0x3a0   :  { %15390 = vmatprep.subr.bf16.mxu0 %v16573_v56  ;;  %v16610_v56 = vld [vmem:[%s20575_s1 + $0x1e80] sm:$0xff]  }
 0x3a1   :  { %15383 = vmatpush3.bf16.msra.mxu1 %v16572_v54  ;;  %v922_v54 = vpack.c.bf16 %v601_v49, %v601_v49 }
 0x3a2   :  { %15412 = vmatprep.subr.bf16.mxu1 %v16576_v61  ;;  %11848 = vmatmul.mubr.bf16.vlgmr.msra.gmra.mrb[112].mxu0 %v917_v60  ;;  %v16612_v60 = vld [vmem:[%s20575_s1 + $0x1e08] sm:$0xff]  }
 0x3a3   :  { %15391 = vmatpush3.bf16.msra.mxu0 %v16575_v59  ;;  %11927 = vmatprep.mubr.bf16.mxu0 %v922_v54  ;;  %v16613_v61 = vld [vmem:[%s20575_s1 + $0x1ec8] sm:$0xff]  }
 0x3a4   :  { %11888 = vmatmul.mubr.bf16.vlgmr.msra.gmra.mrb[112].mxu1 %v919_v1  ;;  %15392 = vmatprep.subr.bf16.mxu0 %v16578_v2  ;;  %v16617_v1 = vld [vmem:[%s20575_s1 + $0x1ed0] sm:$0xff]   ;;  %v16647_v54 = vld [vmem:[%s20575_s1 + $0x1f88] sm:$0xff]  }
 0x3a5   :  { %15413 = vmatpush3.bf16.msra.mxu1 %v16577_v0  ;;  %v16616_v0 = vld [vmem:[%s20575_s1 + $0x1e10] sm:$0xff]  }
 0x3a6   :  { %15414 = vmatprep.subr.bf16.mxu1 %v16580_v5  ;;  %v16618_v2 = vld [vmem:[%s20575_s1 + $0x1e90] sm:$0xff]   ;;  %v16621_v5 = vld [vmem:[%s20575_s1 + $0x1ed8] sm:$0xff]  }
 0x3a7   :  { %15393 = vmatpush3.bf16.msra.mxu0 %v16579_v4  ;;  %v16620_v4 = vld [vmem:[%s20575_s1 + $0x1e18] sm:$0xff]  }
 0x3a8   :  { %15394 = vmatprep.subr.bf16.mxu0 %v16582_v7  ;;  %v16623_v7 = vld [vmem:[%s20575_s1 + $0x1e60] sm:$0xff]  }
 0x3a9   :  { %15415 = vmatpush3.bf16.msra.mxu1 %v16581_v6  ;;  %v16622_v6 = vld [vmem:[%s20575_s1 + $0x1e98] sm:$0xff]  }
 0x3aa   :  { %15416 = vmatprep.subr.bf16.mxu1 %v16584_v9  ;;  %v16625_v9 = vld [vmem:[%s20575_s1 + $0x1ee0] sm:$0xff]  }
 0x3ab   :  { %15395 = vmatpush3.bf16.msra.mxu0 %v16583_v8  ;;  %v16624_v8 = vld [vmem:[%s20575_s1 + $0x1e20] sm:$0xff]  }
 0x3ac   :  { %15396 = vmatprep.subr.bf16.mxu0 %v16586_v11  ;;  %v16627_v11 = vld [vmem:[%s20575_s1 + $0x1e68] sm:$0xff]  }
 0x3ad   :  { %15417 = vmatpush3.bf16.msra.mxu1 %v16585_v10  ;;  %v16626_v10 = vld [vmem:[%s20575_s1 + $0x1ea0] sm:$0xff]  }
 0x3ae   :  { %15418 = vmatprep.subr.bf16.mxu1 %v16588_v13  ;;  %v16628_v13 = vld [vmem:[%s20575_s1 + $0x1e28] sm:$0xff]  }
 0x3af   :  { %15397 = vmatpush3.bf16.msra.mxu0 %v16587_v12 }
 0x3b0   :  { %15398 = vmatprep.subr.bf16.mxu0 %v16590_v15  ;;  %v16629_v15 = vld [vmem:[%s20575_s1 + $0x1ee8] sm:$0xff]  }
 0x3b1   :  { %15419 = vmatpush3.bf16.msra.mxu1 %v16589_v14 }
 0x3b2   :  { %15420 = vmatprep.subr.bf16.mxu1 %v16592_v17 }
 0x3b3   :  { %15399 = vmatpush3.bf16.msra.mxu0 %v16591_v16 }
 0x3b4   :  { %15400 = vmatprep.subr.bf16.mxu0 %v16594_v19 }
 0x3b5   :  { %v15098_v20 = vpop.f32.mrb[88].mxu0  ;;  %15421 = vmatpush3.bf16.msra.mxu1 %v16593_v18 }
 0x3b6   :  { %v15099_v22 = vpop.f32.mrb[89].mxu0  ;;  %15422 = vmatprep.subr.bf16.mxu1 %v16596_v23 }
 0x3b7   :  { %v15100_v24 = vadd.f32 %v15099_v22, %v15098_v20  ;;  %v15101_v25 = vpop.f32.mrb[90].mxu0  ;;  %v15120_v26 = vpop.f32.mrb[88].mxu1  ;;  %15401 = vmatpush3.bf16.msra.mxu0 %v16595_v21  ;;  %v16630_v21 = vld [vmem:[%s20575_s1 + $0x1ea8] sm:$0xff]   ;;  %v16631_v22 = vld [vmem:[%s20575_s1 + $0x1e70] sm:$0xff]  }
 0x3b8   :  { %v15102_v29 = vpop.f32.mrb[91].mxu0  ;;  %v15121_v30 = vpop.f32.mrb[89].mxu1  ;;  %15402 = vmatprep.subr.bf16.mxu0 %v16598_v28  ;;  %v16632_v25 = vld [vmem:[%s20575_s1 + $0x1e30] sm:$0xff]  }
 0x3b9   :  { %v11370_v31 = vadd.f32 %v15100_v24, %v19798_v47  ;;  %v15122_v33 = vadd.f32 %v15121_v30, %v15120_v26  ;;  %v15123_v35 = vpop.f32.mrb[90].mxu1  ;;  %15423 = vmatpush3.bf16.msra.mxu1 %v16597_v27  ;;  %v586_v47 = vcombine.high %v54_v44, %v54_v44  ;;  %v16633_v28 = vld [vmem:[%s20575_s1 + $0x1ef0] sm:$0xff]  }
 0x3ba   :  { %v15124_v37 = vpop.f32.mrb[91].mxu1  ;;  %15424 = vmatprep.subr.bf16.mxu1 %v16600_v36  ;;  %v16634_v30 = vld [vmem:[%s20575_s1 + $0x1eb0] sm:$0xff]  }
 0x3bb   :  { %v19902_v38 = vadd.f32 %v15122_v33, %v11370_v31  ;;  %15403 = vmatpush3.bf16.msra.mxu0 %v16599_v34  ;;  %v600_v50 = vrot.slane %v586_v47, %v16926_v41  ;;  %v16635_v31 = vld [vmem:[%s20575_s1 + $0x1e78] sm:$0xff]   ;;  %v55_v35 = vld [vmem:[%s20574_s0 + $0xf0] sm:$0xff] }
 0x3bc   :  { %15404 = vmatprep.subr.bf16.mxu0 %v16602_v40  ;;  %v16636_v33 = vld [vmem:[%s20575_s1 + $0x1e38] sm:$0xff]   ;;  %v610_v36 = vrot.slane %v55_v35, %v16926_v41 }
 0x3bd   :  { %15425 = vmatpush3.bf16.msra.mxu1 %v16601_v39  ;;  %v602_v55 = vcombine.high %v600_v50, %v600_v50  ;;  %v923_v57 = vpack.c.bf16 %v600_v50, %v600_v50  ;;  %v16637_v34 = vld [vmem:[%s20575_s1 + $0x1ef8] sm:$0xff]   ;;  %v16639_v39 = vld [vmem:[%s20575_s1 + $0x1f40] sm:$0xff]   ;;  %v16644_v50 = vld [vmem:[%s20575_s1 + $0x1f48] sm:$0xff]  }
 0x3be   :  { %15426 = vmatprep.subr.bf16.mxu1 %v16604_v43  ;;  %v16638_v37 = vld [vmem:[%s20575_s1 + $0x1eb8] sm:$0xff]   ;;  %v618_v40 = vcombine.high %v610_v36, %v610_v36  ;;  %v16641_v43 = vld [vmem:[%s20575_s1 + $0x1f00] sm:$0xff]   ;;  %v925_v44 = vpack.c.bf16 %v610_v36, %v610_v36 }
 0x3bf   :  { %15405 = vmatpush3.bf16.msra.mxu0 %v16603_v42  ;;  %v924_v59 = vpack.c.bf16 %v602_v55, %v602_v55  ;;  %v16648_v55 = vld [vmem:[%s20575_s1 + $0x1f50] sm:$0xff]  }
 0x3c0   :  { %15434 = vmatprep.subr.bf16.mxu0 %v16606_v48  ;;  %v16643_v48 = vld [vmem:[%s20575_s1 + $0x1f80] sm:$0xff]  }
 0x3c1   :  { %15427 = vmatpush3.bf16.msra.mxu1 %v16605_v46  ;;  %11967 = vmatprep.mubr.bf16.mxu1 %v924_v59  ;;  %v926_v46 = vpack.c.bf16 %v618_v40, %v618_v40  ;;  %v16652_v59 = vld [vmem:[%s20575_s1 + $0x1f58] sm:$0xff]   ;;  %v16677_v40 = vld [vmem:[%s20575_s1 + $0x2048] sm:$0xff]  }
 0x3c2   :  { %11928 = vmatmul.mubr.bf16.vlgmr.msra.gmra.mrb[116].mxu0 %v921_v52  ;;  %15456 = vmatprep.subr.bf16.mxu1 %v16609_v53  ;;  %v16645_v52 = vld [vmem:[%s20575_s1 + $0x1f08] sm:$0xff]  }
 0x3c3   :  { %15435 = vmatpush3.bf16.msra.mxu0 %v16608_v51  ;;  %12007 = vmatprep.mubr.bf16.mxu0 %v926_v46  ;;  %v16646_v53 = vld [vmem:[%s20575_s1 + $0x1fc8] sm:$0xff]   ;;  %v16681_v46 = vld [vmem:[%s20575_s1 + $0x2050] sm:$0xff]  }
 0x3c4   :  { %11968 = vmatmul.mubr.bf16.vlgmr.msra.gmra.mrb[116].mxu1 %v923_v57  ;;  %15436 = vmatprep.subr.bf16.mxu0 %v16611_v58  ;;  %v16650_v57 = vld [vmem:[%s20575_s1 + $0x1fd0] sm:$0xff]  }
 0x3c5   :  { %15457 = vmatpush3.bf16.msra.mxu1 %v16610_v56  ;;  %v16649_v56 = vld [vmem:[%s20575_s1 + $0x1f10] sm:$0xff]  }
 0x3c6   :  { %15458 = vmatprep.subr.bf16.mxu1 %v16613_v61  ;;  %v16651_v58 = vld [vmem:[%s20575_s1 + $0x1f90] sm:$0xff]   ;;  %v16654_v61 = vld [vmem:[%s20575_s1 + $0x1fd8] sm:$0xff]  }
 0x3c7   :  { %15437 = vmatpush3.bf16.msra.mxu0 %v16612_v60  ;;  %v16653_v60 = vld [vmem:[%s20575_s1 + $0x1f18] sm:$0xff]  }
 0x3c8   :  { %15438 = vmatprep.subr.bf16.mxu0 %v16615_v63  ;;  %v16656_v63 = vld [vmem:[%s20575_s1 + $0x1f60] sm:$0xff]  }
 0x3c9   :  { %15459 = vmatpush3.bf16.msra.mxu1 %v16614_v62  ;;  %v16655_v62 = vld [vmem:[%s20575_s1 + $0x1f98] sm:$0xff]  }
 0x3ca   :  { %15460 = vmatprep.subr.bf16.mxu1 %v16617_v1  ;;  %v16658_v1 = vld [vmem:[%s20575_s1 + $0x1fe0] sm:$0xff]  }
 0x3cb   :  { %15439 = vmatpush3.bf16.msra.mxu0 %v16616_v0  ;;  %v16657_v0 = vld [vmem:[%s20575_s1 + $0x1f20] sm:$0xff]  }
 0x3cc   :  { %15440 = vmatprep.subr.bf16.mxu0 %v16619_v3  ;;  %v16660_v3 = vld [vmem:[%s20575_s1 + $0x1f68] sm:$0xff]  }
 0x3cd   :  { %15461 = vmatpush3.bf16.msra.mxu1 %v16618_v2  ;;  %v16659_v2 = vld [vmem:[%s20575_s1 + $0x1fa0] sm:$0xff]  }
 0x3ce   :  { %15462 = vmatprep.subr.bf16.mxu1 %v16621_v5  ;;  %v16661_v5 = vld [vmem:[%s20575_s1 + $0x1f28] sm:$0xff]  }
 0x3cf   :  { %15441 = vmatpush3.bf16.msra.mxu0 %v16620_v4 }
 0x3d0   :  { %15442 = vmatprep.subr.bf16.mxu0 %v16623_v7  ;;  %v16662_v7 = vld [vmem:[%s20575_s1 + $0x1fe8] sm:$0xff]  }
 0x3d1   :  { %15463 = vmatpush3.bf16.msra.mxu1 %v16622_v6 }
 0x3d2   :  { %15464 = vmatprep.subr.bf16.mxu1 %v16625_v9 }
 0x3d3   :  { %15443 = vmatpush3.bf16.msra.mxu0 %v16624_v8 }
 0x3d4   :  { %15444 = vmatprep.subr.bf16.mxu0 %v16627_v11  ;;  %v16663_v11 = vld [vmem:[%s20575_s1 + $0x1fa8] sm:$0xff]  }
 0x3d5   :  { %v15142_v12 = vpop.f32.mrb[92].mxu0  ;;  %15465 = vmatpush3.bf16.msra.mxu1 %v16626_v10 }
 0x3d6   :  { %v15143_v14 = vpop.f32.mrb[93].mxu0  ;;  %15466 = vmatprep.subr.bf16.mxu1 %v16629_v15 }
 0x3d7   :  { %v15144_v16 = vadd.f32 %v15143_v14, %v15142_v12  ;;  %v15145_v17 = vpop.f32.mrb[94].mxu0  ;;  %v15164_v18 = vpop.f32.mrb[92].mxu1  ;;  %15445 = vmatpush3.bf16.msra.mxu0 %v16628_v13  ;;  %v16664_v12 = vld [vmem:[%s20575_s1 + $0x1f70] sm:$0xff]  }
 0x3d8   :  { %v15146_v19 = vpop.f32.mrb[95].mxu0  ;;  %v15165_v20 = vpop.f32.mrb[93].mxu1  ;;  %15446 = vmatprep.subr.bf16.mxu0 %v16631_v22  ;;  %v16665_v17 = vld [vmem:[%s20575_s1 + $0x1f30] sm:$0xff]  }
 0x3d9   :  { %v11450_v23 = vadd.f32 %v15144_v16, %v19902_v38  ;;  %v15166_v24 = vadd.f32 %v15165_v20, %v15164_v18  ;;  %v15167_v26 = vpop.f32.mrb[94].mxu1  ;;  %15467 = vmatpush3.bf16.msra.mxu1 %v16630_v21  ;;  %v603_v38 = vcombine.high %v55_v35, %v55_v35  ;;  %v16666_v19 = vld [vmem:[%s20575_s1 + $0x1ff0] sm:$0xff]   ;;  %v16675_v35 = vld [vmem:[%s20575_s1 + $0x20c0] sm:$0xff]  }
 0x3da   :  { %v15168_v29 = vpop.f32.mrb[95].mxu1  ;;  %15468 = vmatprep.subr.bf16.mxu1 %v16633_v28  ;;  %v16667_v22 = vld [vmem:[%s20575_s1 + $0x1fb0] sm:$0xff]   ;;  %v56_v26 = vld [vmem:[%s20574_s0 + $0xf8] sm:$0xff] }
 0x3db   :  { %v20003_v27 = vadd.f32 %v15166_v24, %v11450_v23  ;;  %15447 = vmatpush3.bf16.msra.mxu0 %v16632_v25  ;;  %v617_v42 = vrot.slane %v603_v38, %v16926_v41  ;;  %v16668_v23 = vld [vmem:[%s20575_s1 + $0x1f78] sm:$0xff]   ;;  %v620_v29 = vcombine.high %v56_v26, %v56_v26  ;;  %v16674_v38 = vld [vmem:[%s20575_s1 + $0x2000] sm:$0xff]  }
 0x3dc   :  { %15448 = vmatprep.subr.bf16.mxu0 %v16635_v31  ;;  %v16669_v24 = vld [vmem:[%s20575_s1 + $0x1f38] sm:$0xff]  }
 0x3dd   :  { %15469 = vmatpush3.bf16.msra.mxu1 %v16634_v30  ;;  %v619_v47 = vcombine.high %v617_v42, %v617_v42  ;;  %v927_v49 = vpack.c.bf16 %v617_v42, %v617_v42  ;;  %v16670_v25 = vld [vmem:[%s20575_s1 + $0x1ff8] sm:$0xff]   ;;  %v16672_v30 = vld [vmem:[%s20575_s1 + $0x2040] sm:$0xff]  }
 0x3de   :  { %15470 = vmatprep.subr.bf16.mxu1 %v16637_v34  ;;  %v16671_v28 = vld [vmem:[%s20575_s1 + $0x1fb8] sm:$0xff]  }
 0x3df   :  { %15449 = vmatpush3.bf16.msra.mxu0 %v16636_v33  ;;  %v928_v51 = vpack.c.bf16 %v619_v47, %v619_v47  ;;  %v634_v33 = vrot.slane %v620_v29, %v16926_v41  ;;  %v16680_v47 = vld [vmem:[%s20575_s1 + $0x2088] sm:$0xff]  }
 0x3e0   :  { %15478 = vmatprep.subr.bf16.mxu0 %v16639_v39 }
 0x3e1   :  { %15471 = vmatpush3.bf16.msra.mxu1 %v16638_v37  ;;  %12047 = vmatprep.mubr.bf16.mxu1 %v928_v51  ;;  %v636_v37 = vcombine.high %v634_v33, %v634_v33  ;;  %v931_v39 = vpack.c.bf16 %v634_v33, %v634_v33  ;;  %v16684_v51 = vld [vmem:[%s20575_s1 + $0x2090] sm:$0xff]   ;;  %v16778_v33 = vmov 0.0  }
 0x3e2   :  { %15500 = vmatprep.subr.bf16.mxu1 %v16642_v45  ;;  %12008 = vmatmul.mubr.bf16.vlgmr.msra.gmra.mrb[120].mxu0 %v925_v44  ;;  %v16679_v44 = vld [vmem:[%s20575_s1 + $0x20c8] sm:$0xff]  }
 0x3e3   :  { %15479 = vmatpush3.bf16.msra.mxu0 %v16641_v43  ;;  %v932_v42 = vpack.c.bf16 %v636_v37, %v636_v37  ;;  %v16676_v43 = vld [vmem:[%s20575_s1 + $0x2080] sm:$0xff]   ;;  %v16678_v45 = vld [vmem:[%s20575_s1 + $0x2008] sm:$0xff]  }
 0x3e4   :  { %12048 = vmatmul.mubr.bf16.vlgmr.msra.gmra.mrb[120].mxu1 %v927_v49  ;;  %15480 = vmatprep.subr.bf16.mxu0 %v16644_v50  ;;  %v16682_v49 = vld [vmem:[%s20575_s1 + $0x2010] sm:$0xff]   ;;  %v16685_v50 = vld [vmem:[%s20575_s1 + $0x2058] sm:$0xff]   ;;  %v16715_v37 = vld [vmem:[%s20575_s1 + $0x2188] sm:$0xff]  }
 0x3e5   :  { %15501 = vmatpush3.bf16.msra.mxu1 %v16643_v48  ;;  %12127 = vmatprep.mubr.bf16.mxu1 %v932_v42  ;;  %v16683_v48 = vld [vmem:[%s20575_s1 + $0x20d0] sm:$0xff]   ;;  %v16714_v42 = vld [vmem:[%s20575_s1 + $0x2118] sm:$0xff]  }
 0x3e6   :  { %15502 = vmatprep.subr.bf16.mxu1 %v16646_v53  ;;  %v16686_v53 = vld [vmem:[%s20575_s1 + $0x2018] sm:$0xff]  }
 0x3e7   :  { %15481 = vmatpush3.bf16.msra.mxu0 %v16645_v52  ;;  %v16687_v52 = vld [vmem:[%s20575_s1 + $0x20d8] sm:$0xff]  }
 0x3e8   :  { %15482 = vmatprep.subr.bf16.mxu0 %v16648_v55  ;;  %v16688_v55 = vld [vmem:[%s20575_s1 + $0x2098] sm:$0xff]  }
 0x3e9   :  { %15503 = vmatpush3.bf16.msra.mxu1 %v16647_v54  ;;  %v16689_v54 = vld [vmem:[%s20575_s1 + $0x2060] sm:$0xff]  }
 0x3ea   :  { %15504 = vmatprep.subr.bf16.mxu1 %v16650_v57  ;;  %v16690_v57 = vld [vmem:[%s20575_s1 + $0x2020] sm:$0xff]  }
 0x3eb   :  { %15483 = vmatpush3.bf16.msra.mxu0 %v16649_v56  ;;  %v16691_v56 = vld [vmem:[%s20575_s1 + $0x20e0] sm:$0xff]  }
 0x3ec   :  { %15484 = vmatprep.subr.bf16.mxu0 %v16652_v59 }
 0x3ed   :  { %15505 = vmatpush3.bf16.msra.mxu1 %v16651_v58  ;;  %v16693_v58 = vld [vmem:[%s20575_s1 + $0x2068] sm:$0xff]  }
 0x3ee   :  { %15506 = vmatprep.subr.bf16.mxu1 %v16654_v61 }
 0x3ef   :  { %15485 = vmatpush3.bf16.msra.mxu0 %v16653_v60  ;;  %v16692_v60 = vld [vmem:[%s20575_s1 + $0x20a0] sm:$0xff]  }
 0x3f0   :  { %15486 = vmatprep.subr.bf16.mxu0 %v16656_v63 }
 0x3f1   :  { %15507 = vmatpush3.bf16.msra.mxu1 %v16655_v62  ;;  %v16695_v62 = vld [vmem:[%s20575_s1 + $0x20e8] sm:$0xff]  }
 0x3f2   :  { %15508 = vmatprep.subr.bf16.mxu1 %v16658_v1 }
 0x3f3   :  { %15487 = vmatpush3.bf16.msra.mxu0 %v16657_v0 }
 0x3f4   :  { %15488 = vmatprep.subr.bf16.mxu0 %v16660_v3  ;;  %v16697_v3 = vld [vmem:[%s20575_s1 + $0x2070] sm:$0xff]  }
 0x3f5   :  { %v15186_v4 = vpop.f32.mrb[96].mxu0  ;;  %15509 = vmatpush3.bf16.msra.mxu1 %v16659_v2  ;;  %v16694_v2 = vld [vmem:[%s20575_s1 + $0x2028] sm:$0xff]  }
 0x3f6   :  { %v15187_v6 = vpop.f32.mrb[97].mxu0  ;;  %15510 = vmatprep.subr.bf16.mxu1 %v16662_v7 }
 0x3f7   :  { %v15188_v8 = vadd.f32 %v15187_v6, %v15186_v4  ;;  %v15189_v9 = vpop.f32.mrb[98].mxu0  ;;  %v15208_v10 = vpop.f32.mrb[96].mxu1  ;;  %15489 = vmatpush3.bf16.msra.mxu0 %v16661_v5 }
 0x3f8   :  { %v15190_v13 = vpop.f32.mrb[99].mxu0  ;;  %v15209_v14 = vpop.f32.mrb[97].mxu1  ;;  %15490 = vmatprep.subr.bf16.mxu0 %v16664_v12 }
 0x3f9   :  { %v11530_v15 = vadd.f32 %v15188_v8, %v20003_v27  ;;  %v15210_v16 = vadd.f32 %v15209_v14, %v15208_v10  ;;  %v15211_v18 = vpop.f32.mrb[98].mxu1  ;;  %15511 = vmatpush3.bf16.msra.mxu1 %v16663_v11  ;;  %v627_v27 = vrot.slane %v56_v26, %v16926_v41  ;;  %v16696_v8 = vld [vmem:[%s20575_s1 + $0x20a8] sm:$0xff]   ;;  %v16699_v10 = vld [vmem:[%s20575_s1 + $0x20f0] sm:$0xff]   ;;  %v16701_v14 = vld [vmem:[%s20575_s1 + $0x2078] sm:$0xff]  }
 0x3fa   :  { %v15212_v20 = vpop.f32.mrb[99].mxu1  ;;  %15512 = vmatprep.subr.bf16.mxu1 %v16666_v19  ;;  %v16698_v13 = vld [vmem:[%s20575_s1 + $0x2030] sm:$0xff]   ;;  %v16702_v18 = vld [vmem:[%s20575_s1 + $0x2038] sm:$0xff]  }
 0x3fb   :  { %v20110_v21 = vadd.f32 %v15210_v16, %v11530_v15  ;;  %15491 = vmatpush3.bf16.msra.mxu0 %v16665_v17  ;;  %v635_v31 = vcombine.high %v627_v27, %v627_v27  ;;  %v929_v34 = vpack.c.bf16 %v627_v27, %v627_v27  ;;  %v16700_v15 = vld [vmem:[%s20575_s1 + $0x20b0] sm:$0xff]   ;;  %v16703_v16 = vld [vmem:[%s20575_s1 + $0x20f8] sm:$0xff]   ;;  %v57_v17 = vld [vmem:[%s20574_s0 + $0x100] sm:$0xff] }
 0x3fc   :  { %15492 = vmatprep.subr.bf16.mxu0 %v16668_v23  ;;  %v644_v19 = vrot.slane %v57_v17, %v16926_v41  ;;  %v637_v20 = vcombine.high %v57_v17, %v57_v17  ;;  %v16704_v23 = vld [vmem:[%s20575_s1 + $0x20b8] sm:$0xff]  }
 0x3fd   :  { %15513 = vmatpush3.bf16.msra.mxu1 %v16667_v22  ;;  %v930_v36 = vpack.c.bf16 %v635_v31, %v635_v31 }
 0x3fe   :  { %15514 = vmatprep.subr.bf16.mxu1 %v16670_v25  ;;  %v652_v22 = vcombine.high %v644_v19, %v644_v19  ;;  %v933_v25 = vpack.c.bf16 %v644_v19, %v644_v19 }
 0x3ff   :  { %15493 = vmatpush3.bf16.msra.mxu0 %v16669_v24  ;;  %12087 = vmatprep.mubr.bf16.mxu0 %v930_v36  ;;  %v651_v24 = vrot.slane %v637_v20, %v16926_v41  ;;  %v16710_v36 = vld [vmem:[%s20575_s1 + $0x2150] sm:$0xff]  }
 0x400   :  { %15522 = vmatprep.subr.bf16.mxu0 %v16672_v30  ;;  %v934_v26 = vpack.c.bf16 %v652_v22, %v652_v22  ;;  %v16708_v30 = vld [vmem:[%s20575_s1 + $0x2148] sm:$0xff]  }
 0x401   :  { %15515 = vmatpush3.bf16.msra.mxu1 %v16671_v28  ;;  %v653_v27 = vcombine.high %v651_v24, %v651_v24  ;;  %v16707_v28 = vld [vmem:[%s20575_s1 + $0x2100] sm:$0xff]   ;;  %v935_v29 = vpack.c.bf16 %v651_v24, %v651_v24 }
 0x402   :  { %15544 = vmatprep.subr.bf16.mxu1 %v16675_v35  ;;  %12088 = vmatmul.mubr.bf16.vlgmr.msra.gmra.mrb[124].mxu0 %v929_v34  ;;  %v16712_v34 = vld [vmem:[%s20575_s1 + $0x2180] sm:$0xff]   ;;  %v16709_v35 = vld [vmem:[%s20575_s1 + $0x2108] sm:$0xff]  }
 0x403   :  { %15523 = vmatpush3.bf16.msra.mxu0 %v16674_v38  ;;  %12167 = vmatprep.mubr.bf16.mxu0 %v934_v26  ;;  %v936_v31 = vpack.c.bf16 %v653_v27, %v653_v27  ;;  %v16711_v38 = vld [vmem:[%s20575_s1 + $0x2110] sm:$0xff]  }
 0x404   :  { %12128 = vmatmul.mubr.bf16.vlgmr.msra.gmra.mrb[124].mxu1 %v931_v39  ;;  %15524 = vmatprep.subr.bf16.mxu0 %v16677_v40  ;;  %v16713_v39 = vld [vmem:[%s20575_s1 + $0x2158] sm:$0xff]   ;;  %v16718_v40 = vld [vmem:[%s20575_s1 + $0x2190] sm:$0xff]  }
 0x405   :  { %15545 = vmatpush3.bf16.msra.mxu1 %v16676_v43  ;;  %12207 = vmatprep.mubr.bf16.mxu1 %v936_v31  ;;  %v16716_v43 = vld [vmem:[%s20575_s1 + $0x2160] sm:$0xff]  }
 0x406   :  { %15546 = vmatprep.subr.bf16.mxu1 %v16679_v44  ;;  %v16721_v44 = vld [vmem:[%s20575_s1 + $0x2198] sm:$0xff]  }
 0x407   :  { %15525 = vmatpush3.bf16.msra.mxu0 %v16678_v45  ;;  %v16717_v45 = vld [vmem:[%s20575_s1 + $0x2120] sm:$0xff]  }
 0x408   :  { %15526 = vmatprep.subr.bf16.mxu0 %v16681_v46  ;;  %v16719_v46 = vld [vmem:[%s20575_s1 + $0x2168] sm:$0xff]  }
 0x409   :  { %15547 = vmatpush3.bf16.msra.mxu1 %v16680_v47 }
 0x40a   :  { %15548 = vmatprep.subr.bf16.mxu1 %v16683_v48  ;;  %v16724_v48 = vld [vmem:[%s20575_s1 + $0x21a0] sm:$0xff]  }
 0x40b   :  { %15527 = vmatpush3.bf16.msra.mxu0 %v16682_v49  ;;  %v58_v49 = vld [vmem:[%s20574_s0 + $0x108] sm:$0x3f] }
 0x40c   :  { %15528 = vmatprep.subr.bf16.mxu0 %v16685_v50 }
 0x40d   :  { %15549 = vmatpush3.bf16.msra.mxu1 %v16684_v51  ;;  %v654_v51 = vcombine.high %v58_v49, %v58_v49 }
 0x40e   :  { %15550 = vmatprep.subr.bf16.mxu1 %v16687_v52  ;;  %v661_v52 = vrot.slane %v58_v49, %v16926_v41 }
 0x40f   :  { %15529 = vmatpush3.bf16.msra.mxu0 %v16686_v53 }
 0x410   :  { %15530 = vmatprep.subr.bf16.mxu0 %v16689_v54 }
 0x411   :  { %15551 = vmatpush3.bf16.msra.mxu1 %v16688_v55 }
 0x412   :  { %15552 = vmatprep.subr.bf16.mxu1 %v16691_v56 }
 0x413   :  { %15531 = vmatpush3.bf16.msra.mxu0 %v16690_v57 }
 0x414   :  { %15532 = vmatprep.subr.bf16.mxu0 %v16693_v58 }
 0x415   :  { %v15230_v59 = vpop.f32.mrb[100].mxu0  ;;  %15553 = vmatpush3.bf16.msra.mxu1 %v16692_v60 }
 0x416   :  { %v15231_v61 = vpop.f32.mrb[101].mxu0  ;;  %15554 = vmatprep.subr.bf16.mxu1 %v16695_v62 }
 0x417   :  { %v15232_v63 = vadd.f32 %v15231_v61, %v15230_v59  ;;  %v15233_v0 = vpop.f32.mrb[102].mxu0  ;;  %v15252_v1 = vpop.f32.mrb[100].mxu1  ;;  %15533 = vmatpush3.bf16.msra.mxu0 %v16694_v2 }
 0x418   :  { %v15234_v4 = vpop.f32.mrb[103].mxu0  ;;  %v15253_v5 = vpop.f32.mrb[101].mxu1  ;;  %15534 = vmatprep.subr.bf16.mxu0 %v16697_v3 }
 0x419   :  { %v11610_v6 = vadd.f32 %v15232_v63, %v20110_v21  ;;  %v15254_v7 = vadd.f32 %v15253_v5, %v15252_v1  ;;  %v15255_v9 = vpop.f32.mrb[102].mxu1  ;;  %15555 = vmatpush3.bf16.msra.mxu1 %v16696_v8  ;;  %v16705_v21 = vld [vmem:[%s20575_s1 + $0x2140] sm:$0xff]  }
 0x41a   :  { %v15256_v11 = vpop.f32.mrb[103].mxu1  ;;  %15556 = vmatprep.subr.bf16.mxu1 %v16699_v10 }
 0x41b   :  { %v20211_v12 = vadd.f32 %v15254_v7, %v11610_v6  ;;  %15535 = vmatpush3.bf16.msra.mxu0 %v16698_v13 }
 0x41c   :  { %15536 = vmatprep.subr.bf16.mxu0 %v16701_v14 }
 0x41d   :  { %15557 = vmatpush3.bf16.msra.mxu1 %v16700_v15 }
 0x41e   :  { %15558 = vmatprep.subr.bf16.mxu1 %v16703_v16 }
 0x41f   :  { %15537 = vmatpush3.bf16.msra.mxu0 %v16702_v18 }
 0x420   :  { %15566 = vmatprep.subr.bf16.mxu0 %v16705_v21 }
 0x421   :  { %15559 = vmatpush3.bf16.msra.mxu1 %v16704_v23 }
 0x422   :  { %12168 = vmatmul.mubr.bf16.vlgmr.msra.gmra.mrb[128].mxu0 %v933_v25  ;;  %15595 = vmatprep.subr.bf16.mxu1 %v16778_v33 }
 0x423   :  { %15567 = vmatpush3.bf16.msra.mxu0 %v16707_v28 }
 0x424   :  { %12208 = vmatmul.mubr.bf16.vlgmr.msra.gmra.mrb[128].mxu1 %v935_v29  ;;  %15568 = vmatprep.subr.bf16.mxu0 %v16708_v30 }
 0x425   :  { %15596 = vmatpush3.bf16.msra.mxu1 %v16712_v34  ;;  %15607 = vmatprep.mubr.msk.bf16.mxu1 %vm16779_vm0, %v16778_v33 }
 0x426   :  { %15597 = vmatprep.subr.bf16.mxu1 %v16778_v33 }
 0x427   :  { %15569 = vmatpush3.bf16.msra.mxu0 %v16709_v35 }
 0x428   :  { %15570 = vmatprep.subr.bf16.mxu0 %v16710_v36 }
 0x429   :  { %15598 = vmatpush3.bf16.msra.mxu1 %v16715_v37 }
 0x42a   :  { %15599 = vmatprep.subr.bf16.mxu1 %v16778_v33 }
 0x42b   :  { %15571 = vmatpush3.bf16.msra.mxu0 %v16711_v38 }
 0x42c   :  { %15572 = vmatprep.subr.bf16.mxu0 %v16713_v39 }
 0x42d   :  { %15600 = vmatpush3.bf16.msra.mxu1 %v16718_v40 }
 0x42e   :  { %15601 = vmatprep.subr.bf16.mxu1 %v16778_v33 }
 0x42f   :  { %15573 = vmatpush3.bf16.msra.mxu0 %v16714_v42 }
 0x430   :  { %15574 = vmatprep.subr.bf16.mxu0 %v16716_v43 }
 0x431   :  { %15602 = vmatpush3.bf16.msra.mxu1 %v16721_v44 }
 0x432   :  { %15603 = vmatprep.subr.bf16.mxu1 %v16778_v33 }
 0x435   :  { %v15274_v47 = vpop.f32.mrb[104].mxu0 }
 0x436   :  { %v15275_v50 = vpop.f32.mrb[105].mxu0 }
 0x437   :  { %13 = vsyncpa [#allocation5], 0  ;;  %15575 = vmatpush3.bf16.msra.mxu0 %v16717_v45  ;;  %v15276_v53 = vadd.f32 %v15275_v50, %v15274_v47  ;;  %v15277_v54 = vpop.f32.mrb[106].mxu0  ;;  %v15296_v55 = vpop.f32.mrb[104].mxu1  ;;  %v16720_v56 = vld [vmem:[%s20575_s1 + $0x2128] sm:$0xff]   ;;  %v16722_v59 = vld [vmem:[%s20575_s1 + $0x2170] sm:$0xff]   ;;  %v668_v60 = vrot.slane %v654_v51, %v16926_v41  ;;  %v669_v61 = vcombine.high %v661_v52, %v661_v52  ;;  %15604 = vmatpush3.bf16.msra.mxu1 %v16724_v48 }
 0x438   :  { %15576 = vmatprep.subr.bf16.mxu0 %v16719_v46  ;;  %v15278_v57 = vpop.f32.mrb[107].mxu0  ;;  %v15297_v58 = vpop.f32.mrb[105].mxu1  ;;  %v16728_v0 = vld [vmem:[%s20575_s1 + $0x21a8] sm:$0xff]   ;;  %15605 = vmatprep.subr.bf16.mxu1 %v16778_v33  ;;  %v16723_v5 = vld [vmem:[%s20575_s1 + $0x2130] sm:$0xff]   ;;  %v16725_v6 = vld [vmem:[%s20575_s1 + $0x2178] sm:$0xff]   ;;  %vm9571_vm1 = vcmask 785408   ;;  %v937_v9 = vpack.c.bf16 %v661_v52, %v661_v52 }
 0x439   :  { %v11690_v62 = vadd.f32 %v15276_v53, %v20211_v12  ;;  %v15298_v63 = vadd.f32 %v15297_v58, %v15296_v55  ;;  %v15299_v1 = vpop.f32.mrb[106].mxu1  ;;  %v938_v2 = vpack.c.bf16 %v669_v61, %v669_v61  ;;  %v939_v7 = vpack.c.bf16 %v668_v60, %v668_v60  ;;  %v16726_v8 = vld [vmem:[%s20575_s1 + $0x2138] sm:$0xff]   ;;  %v12298_v35 = vld [vmem:[%s20577_s3] sm:$0xff]  ;;  %v12299_v37 = vld [vmem:[%s20577_s3 + $0x8] sm:$0xff] }
 0x43a   :  { %v15300_v3 = vpop.f32.mrb[107].mxu1  ;;  %v12302_v36 = vld [vmem:[%s20577_s3 + $0x20] sm:$0xff]  ;;  %v12303_v40 = vld [vmem:[%s20577_s3 + $0x28] sm:$0xff] }
 0x43b   :  { %15577 = vmatpush3.bf16.msra.mxu0 %v16720_v56  ;;  %v11730_v4 = vadd.f32 %v15298_v63, %v11690_v62  ;;  %12247 = vmatprep.mubr.bf16.mxu0 %v938_v2  ;;  %v14050_v38 = vcombine.low %v12298_v35, %v12302_v36  ;;  %v14051_v39 = vcombine.high %v12298_v35, %v12302_v36  ;;  %v12306_v42 = vld [vmem:[%s20577_s3 + $0x40] sm:$0xff]  ;;  %v12307_v47 = vld [vmem:[%s20577_s3 + $0x48] sm:$0xff] }
 0x43c   :  { %15578 = vmatprep.subr.bf16.mxu0 %v16722_v59  ;;  %15606 = vmatpush3.bf16.msra.mxu1 %v16728_v0  ;;  %v12310_v43 = vld [vmem:[%s20577_s3 + $0x60] sm:$0xff]  ;;  %v14052_v44 = vcombine.low %v12299_v37, %v12303_v40  ;;  %v14053_v45 = vcombine.high %v12299_v37, %v12303_v40  ;;  %v12311_v48 = vld [vmem:[%s20577_s3 + $0x68] sm:$0xff] }
 0x43d   :  { %v14059_v46 = vcombine.high %v12306_v42, %v12310_v43  ;;  %v12314_v49 = vld [vmem:[%s20577_s3 + $0x80] sm:$0xff]  ;;  %12724 = vmatprep.subr.bf16.mxu1 %v14051_v39  ;;  %v14061_v50 = vcombine.high %v12307_v47, %v12311_v48  ;;  %v12315_v52 = vld [vmem:[%s20577_s3 + $0x88] sm:$0xff]  ;;  %v14058_v54 = vcombine.low %v12306_v42, %v12310_v43  ;;  %v14060_v55 = vcombine.low %v12307_v47, %v12311_v48 }
 0x43e   :  { %v12318_v51 = vld [vmem:[%s20577_s3 + $0xa0] sm:$0xff]  ;;  %v12319_v53 = vld [vmem:[%s20577_s3 + $0xa8] sm:$0xff] }
 0x43f   :  { %15579 = vmatpush3.bf16.msra.mxu0 %v16723_v5  ;;  %15608 = vmatmul.mubr.msk.bf16.vlgmr.msra.gmra.mrb[132].mxu1 %vm9571_vm1, %v939_v7  ;;  %v14067_v56 = vcombine.high %v12314_v49, %v12318_v51  ;;  %v14069_v57 = vcombine.high %v12315_v52, %v12319_v53  ;;  %v12322_v58 = vld [vmem:[%s20577_s3 + $0xc0] sm:$0xff]  ;;  %v12323_v60 = vld [vmem:[%s20577_s3 + $0xc8] sm:$0xff]  ;;  %v14066_v62 = vcombine.low %v12314_v49, %v12318_v51  ;;  %v20415_v51 = vld [vmem:[%s20577_s3 + $0x30] sm:$0xff] }
 0x440   :  { %15580 = vmatprep.subr.bf16.mxu0 %v16725_v6  ;;  %12725 = vmatpush1.bf16.msra.mxu1 %v14050_v38  ;;  %v12326_v59 = vld [vmem:[%s20577_s3 + $0xe0] sm:$0xff]  ;;  %v12327_v61 = vld [vmem:[%s20577_s3 + $0xe8] sm:$0xff]  ;;  %v14068_v63 = vcombine.low %v12315_v52, %v12319_v53  ;;  %v20420_v52 = vld [vmem:[%s20577_s3 + $0x18] sm:$0xff] }
 0x441   :  { %12726 = vmatprep.subr.bf16.mxu1 %v14059_v46  ;;  %v14075_v0 = vcombine.high %v12322_v58, %v12326_v59  ;;  %v14077_v1 = vcombine.high %v12323_v60, %v12327_v61  ;;  %v12330_v2 = vld [vmem:[%s20577_s3 + $0x100] sm:$0xff]  ;;  %v12335_v5 = vld [vmem:[%s20577_s3 + $0x128] sm:$0xff]  ;;  %v14074_v6 = vcombine.low %v12322_v58, %v12326_v59  ;;  %v14076_v7 = vcombine.low %v12323_v60, %v12327_v61 }
 0x442   :  { %v12334_v3 = vld [vmem:[%s20577_s3 + $0x120] sm:$0xff]  ;;  %v12359_v46 = vld [vmem:[%s20577_s3 + $0x1e8] sm:$0xff]  ;;  %v16780_v58 = vmov 0  }
 0x443   :  { %15581 = vmatpush3.bf16.msra.mxu0 %v16726_v8  ;;  %v14083_v8 = vcombine.high %v12330_v2, %v12334_v3  ;;  %v12354_v43 = vld [vmem:[%s20577_s3 + $0x1c0] sm:$0xff]  ;;  %12756 = vmatprep.mubr.bf16.mxu1 %v16780_v58 }
 0x444   :  { %12765 = vmatprep.subr.bf16.mxu0 %v14053_v45  ;;  %12727 = vmatpush1.bf16.msra.mxu1 %v14058_v54  ;;  %v20427_v54 = vld [vmem:[%s20577_s3 + $0x38] sm:$0xff] }
 0x445   :  { %12728 = vmatprep.subr.bf16.mxu1 %v14067_v56  ;;  %v14056_v56 = vcombine.low %v20420_v52, %v20427_v54 }
 0x446   :  { %12248 = vmatmul.mubr.bf16.vlgmr.msra.gmra.mrb[132].mxu0 %v937_v9 }
 0x447   :  { %12766 = vmatpush1.bf16.msra.mxu0 %v14052_v44  ;;  %v12358_v44 = vld [vmem:[%s20577_s3 + $0x1e0] sm:$0xff]  ;;  %12797 = vmatprep.mubr.bf16.mxu0 %v16780_v58 }
 0x448   :  { %12767 = vmatprep.subr.bf16.mxu0 %v14061_v50  ;;  %12729 = vmatpush1.bf16.msra.mxu1 %v14066_v62  ;;  %v14107_v45 = vcombine.high %v12354_v43, %v12358_v44  ;;  %v14106_v47 = vcombine.low %v12354_v43, %v12358_v44  ;;  %v20410_v50 = vld [vmem:[%s20577_s3 + $0x10] sm:$0xff] }
 0x449   :  { %12730 = vmatprep.subr.bf16.mxu1 %v14075_v0  ;;  %v14055_v53 = vcombine.high %v20410_v50, %v20415_v51 }
 0x44b   :  { %12768 = vmatpush1.bf16.msra.mxu0 %v14060_v55  ;;  %v14054_v55 = vcombine.low %v20410_v50, %v20415_v51  ;;  %v12325_v50 = vld [vmem:[%s20577_s3 + $0xd8] sm:$0xff] }
 0x44c   :  { %12769 = vmatprep.subr.bf16.mxu0 %v14069_v57  ;;  %12731 = vmatpush1.bf16.msra.mxu1 %v14074_v6  ;;  %v14057_v57 = vcombine.high %v20420_v52, %v20427_v54  ;;  %v12329_v51 = vld [vmem:[%s20577_s3 + $0xf8] sm:$0xff] }
 0x44d   :  { %12732 = vmatprep.subr.bf16.mxu1 %v14083_v8 }
 0x44f   :  { %12770 = vmatpush1.bf16.msra.mxu0 %v14068_v63 }
 0x450   :  { %12771 = vmatprep.subr.bf16.mxu0 %v14077_v1 }
 0x453   :  { %12772 = vmatpush1.bf16.msra.mxu0 %v14076_v7 }
 0x455   :  { %v15318_v10 = vpop.f32.mrb[108].mxu0 }
 0x456   :  { %v15319_v11 = vpop.f32.mrb[109].mxu0 }
 0x457   :  { %v15320_v12 = vadd.f32 %v15319_v11, %v15318_v10  ;;  %v15321_v13 = vpop.f32.mrb[110].mxu0  ;;  %v15340_v14 = vpop.f32.mrb[108].mxu1  ;;  %v12338_v10 = vld [vmem:[%s20577_s3 + $0x140] sm:$0xff] }
 0x458   :  { %v15322_v15 = vpop.f32.mrb[111].mxu0  ;;  %v15341_v16 = vpop.f32.mrb[109].mxu1  ;;  %v12342_v11 = vld [vmem:[%s20577_s3 + $0x160] sm:$0xff]  ;;  %v12343_v13 = vld [vmem:[%s20577_s3 + $0x168] sm:$0xff] }
 0x459   :  { %v11770_v17 = vadd.f32 %v15320_v12, %v11730_v4  ;;  %v15342_v18 = vadd.f32 %v15341_v16, %v15340_v14  ;;  %v15343_v19 = vpop.f32.mrb[110].mxu1  ;;  %v12331_v4 = vld [vmem:[%s20577_s3 + $0x108] sm:$0xff]  ;;  %v14082_v14 = vcombine.low %v12330_v2, %v12334_v3  ;;  %v14091_v16 = vcombine.high %v12338_v10, %v12342_v11 }
 0x45a   :  { %v15344_v20 = vpop.f32.mrb[111].mxu1  ;;  %v14085_v9 = vcombine.high %v12331_v4, %v12335_v5  ;;  %v12339_v12 = vld [vmem:[%s20577_s3 + $0x148] sm:$0xff]  ;;  %v14084_v15 = vcombine.low %v12331_v4, %v12335_v5 }
 0x45b   :  { %v11810_v21 = vadd.f32 %v15342_v18, %v11770_v17  ;;  %v14093_v17 = vcombine.high %v12339_v12, %v12343_v13  ;;  %12733 = vmatpush1.bf16.msra.mxu1 %v14082_v14  ;;  %v14090_v18 = vcombine.low %v12338_v10, %v12342_v11  ;;  %v14092_v19 = vcombine.low %v12339_v12, %v12343_v13 }
 0x45c   :  { %12773 = vmatprep.subr.bf16.mxu0 %v14085_v9  ;;  %12734 = vmatprep.subr.bf16.mxu1 %v14091_v16 }
 0x45d   :  { %12774 = vmatpush1.bf16.msra.mxu0 %v14084_v15 }
 0x45e   :  { %12775 = vmatprep.subr.bf16.mxu0 %v14093_v17 }
 0x45f   :  { %12735 = vmatpush1.bf16.msra.mxu1 %v14090_v18 }
 0x461   :  { %12776 = vmatpush1.bf16.msra.mxu0 %v14092_v19 }
 0x475   :  { %v15362_v22 = vpop.f32.mrb[112].mxu0 }
 0x476   :  { %v15363_v23 = vpop.f32.mrb[113].mxu0 }
 0x477   :  { %v15364_v24 = vadd.f32 %v15363_v23, %v15362_v22  ;;  %v15365_v25 = vpop.f32.mrb[114].mxu0  ;;  %v15384_v26 = vpop.f32.mrb[112].mxu1 }
 0x478   :  { %v15366_v27 = vpop.f32.mrb[115].mxu0  ;;  %v15385_v28 = vpop.f32.mrb[113].mxu1  ;;  %v12346_v25 = vld [vmem:[%s20577_s3 + $0x180] sm:$0xff] }
 0x479   :  { %v11850_v29 = vadd.f32 %v15364_v24, %v11810_v21  ;;  %v15386_v30 = vadd.f32 %v15385_v28, %v15384_v26  ;;  %v15387_v31 = vpop.f32.mrb[114].mxu1  ;;  %v12350_v26 = vld [vmem:[%s20577_s3 + $0x1a0] sm:$0xff]  ;;  %v12347_v27 = vld [vmem:[%s20577_s3 + $0x188] sm:$0xff] }
 0x47a   :  { %v15388_v33 = vpop.f32.mrb[115].mxu1  ;;  %v12351_v31 = vld [vmem:[%s20577_s3 + $0x1a8] sm:$0xff]  ;;  %v14098_v37 = vcombine.low %v12346_v25, %v12350_v26 }
 0x47b   :  { %v20308_v34 = vadd.f32 %v15386_v30, %v11850_v29  ;;  %v14099_v30 = vcombine.high %v12346_v25, %v12350_v26  ;;  %v14100_v38 = vcombine.low %v12347_v27, %v12351_v31  ;;  %v14101_v40 = vcombine.high %v12347_v27, %v12351_v31 }
 0x47d   :  { %12736 = vmatprep.subr.bf16.mxu1 %v14099_v30  ;;  %12777 = vmatprep.subr.bf16.mxu0 %v14101_v40 }
 0x47e   :  { %12737 = vmatpush1.bf16.msra.mxu1 %v14098_v37  ;;  %12778 = vmatpush1.bf16.msra.mxu0 %v14100_v38 }
 0x47f   :  { %12738 = vmatprep.subr.bf16.mxu1 %v14107_v45  ;;  %v12312_v45 = vld [vmem:[%s20577_s3 + $0x70] sm:$0xff] }
 0x482   :  { %12739 = vmatpush1.bf16.msra.mxu1 %v14106_v47  ;;  %v12313_v47 = vld [vmem:[%s20577_s3 + $0x78] sm:$0xff] }
 0x483   :  { %12806 = vmatprep.subr.bf16.mxu1 %v14055_v53 }
 0x495   :  { %v15406_v20 = vpop.f32.mrb[116].mxu0 }
 0x496   :  { %v15407_v21 = vpop.f32.mrb[117].mxu0 }
 0x497   :  { %v15408_v22 = vadd.f32 %v15407_v21, %v15406_v20  ;;  %v15409_v23 = vpop.f32.mrb[118].mxu0  ;;  %v15428_v24 = vpop.f32.mrb[116].mxu1 }
 0x498   :  { %v15410_v28 = vpop.f32.mrb[119].mxu0  ;;  %v15429_v29 = vpop.f32.mrb[117].mxu1 }
 0x499   :  { %v11930_v33 = vadd.f32 %v15408_v22, %v20308_v34  ;;  %v15430_v35 = vadd.f32 %v15429_v29, %v15428_v24  ;;  %v15431_v36 = vpop.f32.mrb[118].mxu1  ;;  %v12355_v34 = vld [vmem:[%s20577_s3 + $0x1c8] sm:$0xff] }
 0x49a   :  { %v15432_v39 = vpop.f32.mrb[119].mxu1  ;;  %v14108_v48 = vcombine.low %v12355_v34, %v12359_v46  ;;  %v14109_v49 = vcombine.high %v12355_v34, %v12359_v46  ;;  %v12308_v34 = vld [vmem:[%s20577_s3 + $0x50] sm:$0xff]  ;;  %v12309_v46 = vld [vmem:[%s20577_s3 + $0x58] sm:$0xff] }
 0x49b   :  { %v11970_v42 = vadd.f32 %v15430_v35, %v11930_v33  ;;  %v14063_v53 = vcombine.high %v12308_v34, %v12312_v45 }
 0x49c   :  { %12779 = vmatprep.subr.bf16.mxu0 %v14109_v49 }
 0x49d   :  { %12780 = vmatpush1.bf16.msra.mxu0 %v14108_v48 }
 0x49e   :  { %12847 = vmatprep.subr.bf16.mxu0 %v14057_v57  ;;  %v14065_v57 = vcombine.high %v12309_v46, %v12313_v47 }
 0x4b5   :  { %v15450_v59 = vpop.f32.mrb[120].mxu0 }
 0x4b6   :  { %v15451_v60 = vpop.f32.mrb[121].mxu0 }
 0x4b7   :  { %v15452_v61 = vadd.f32 %v15451_v60, %v15450_v59  ;;  %v15453_v62 = vpop.f32.mrb[122].mxu0  ;;  %v15472_v63 = vpop.f32.mrb[120].mxu1  ;;  %v12316_v59 = vld [vmem:[%s20577_s3 + $0x90] sm:$0xff] }
 0x4b8   :  { %v15454_v0 = vpop.f32.mrb[123].mxu0  ;;  %v15473_v1 = vpop.f32.mrb[121].mxu1  ;;  %v12320_v60 = vld [vmem:[%s20577_s3 + $0xb0] sm:$0xff]  ;;  %v12321_v62 = vld [vmem:[%s20577_s3 + $0xb8] sm:$0xff] }
 0x4b9   :  { %v12010_v2 = vadd.f32 %v15452_v61, %v11970_v42  ;;  %v15474_v3 = vadd.f32 %v15473_v1, %v15472_v63  ;;  %v15475_v4 = vpop.f32.mrb[122].mxu1  ;;  %v12317_v61 = vld [vmem:[%s20577_s3 + $0x98] sm:$0xff]  ;;  %v14062_v63 = vcombine.low %v12308_v34, %v12312_v45  ;;  %v14064_v0 = vcombine.low %v12309_v46, %v12313_v47 }
 0x4ba   :  { %v15476_v5 = vpop.f32.mrb[123].mxu1  ;;  %v14071_v1 = vcombine.high %v12316_v59, %v12320_v60  ;;  %v12328_v4 = vld [vmem:[%s20577_s3 + $0xf0] sm:$0xff]  ;;  %v14070_v52 = vcombine.low %v12316_v59, %v12320_v60  ;;  %v14072_v54 = vcombine.low %v12317_v61, %v12321_v62 }
 0x4bb   :  { %v12050_v6 = vadd.f32 %v15474_v3, %v12010_v2  ;;  %v14073_v2 = vcombine.high %v12317_v61, %v12321_v62  ;;  %v12324_v3 = vld [vmem:[%s20577_s3 + $0xd0] sm:$0xff] }
 0x4bc   :  { %v12332_v5 = vld [vmem:[%s20577_s3 + $0x110] sm:$0xff] }
 0x4d5   :  { %v15494_v7 = vpop.f32.mrb[124].mxu0 }
 0x4d6   :  { %v15495_v8 = vpop.f32.mrb[125].mxu0 }
 0x4d7   :  { %v15496_v9 = vadd.f32 %v15495_v8, %v15494_v7  ;;  %v15497_v10 = vpop.f32.mrb[126].mxu0  ;;  %v15516_v11 = vpop.f32.mrb[124].mxu1  ;;  %v12337_v7 = vld [vmem:[%s20577_s3 + $0x138] sm:$0xff]  ;;  %v14078_v8 = vcombine.low %v12324_v3, %v12328_v4 }
 0x4d8   :  { %v15498_v12 = vpop.f32.mrb[127].mxu0  ;;  %v15517_v13 = vpop.f32.mrb[125].mxu1 }
 0x4d9   :  { %v12090_v14 = vadd.f32 %v15496_v9, %v12050_v6  ;;  %v15518_v15 = vadd.f32 %v15517_v13, %v15516_v11  ;;  %v15519_v16 = vpop.f32.mrb[126].mxu1  ;;  %v12336_v6 = vld [vmem:[%s20577_s3 + $0x130] sm:$0xff]  ;;  %v14080_v9 = vcombine.low %v12325_v50, %v12329_v51 }
 0x4da   :  { %v15520_v17 = vpop.f32.mrb[127].mxu1  ;;  %v14087_v10 = vcombine.high %v12332_v5, %v12336_v6  ;;  %v12340_v12 = vld [vmem:[%s20577_s3 + $0x150] sm:$0xff]  ;;  %v14086_v16 = vcombine.low %v12332_v5, %v12336_v6 }
 0x4db   :  { %v12130_v18 = vadd.f32 %v15518_v15, %v12090_v14  ;;  %v12344_v13 = vld [vmem:[%s20577_s3 + $0x170] sm:$0xff]  ;;  %v12341_v14 = vld [vmem:[%s20577_s3 + $0x158] sm:$0xff] }
 0x4dc   :  { %v12345_v15 = vld [vmem:[%s20577_s3 + $0x178] sm:$0xff] }
 0x4f5   :  { %v15538_v19 = vpop.f32.mrb[128].mxu0 }
 0x4f6   :  { %v15539_v20 = vpop.f32.mrb[129].mxu0 }
 0x4f7   :  { %v15540_v21 = vadd.f32 %v15539_v20, %v15538_v19  ;;  %v15541_v22 = vpop.f32.mrb[130].mxu0  ;;  %v15560_v23 = vpop.f32.mrb[128].mxu1  ;;  %v14097_v19 = vcombine.high %v12341_v14, %v12345_v15  ;;  %v12348_v20 = vld [vmem:[%s20577_s3 + $0x190] sm:$0xff] }
 0x4f8   :  { %v15542_v24 = vpop.f32.mrb[131].mxu0  ;;  %v15561_v25 = vpop.f32.mrb[129].mxu1  ;;  %v12349_v22 = vld [vmem:[%s20577_s3 + $0x198] sm:$0xff] }
 0x4f9   :  { %v12170_v26 = vadd.f32 %v15540_v21, %v12130_v18  ;;  %v15562_v27 = vadd.f32 %v15561_v25, %v15560_v23  ;;  %v15563_v28 = vpop.f32.mrb[130].mxu1  ;;  %v14095_v18 = vcombine.high %v12340_v12, %v12344_v13  ;;  %v12352_v21 = vld [vmem:[%s20577_s3 + $0x1b0] sm:$0xff]  ;;  %v12353_v23 = vld [vmem:[%s20577_s3 + $0x1b8] sm:$0xff]  ;;  %v14094_v24 = vcombine.low %v12340_v12, %v12344_v13 }
 0x4fa   :  { %v15564_v29 = vpop.f32.mrb[131].mxu1  ;;  %v14096_v25 = vcombine.low %v12341_v14, %v12345_v15  ;;  %v12356_v28 = vld [vmem:[%s20577_s3 + $0x1d0] sm:$0xff] }
 0x4fb   :  { %v12210_v30 = vadd.f32 %v15562_v27, %v12170_v26  ;;  %v14103_v26 = vcombine.high %v12348_v20, %v12352_v21  ;;  %v14105_v27 = vcombine.high %v12349_v22, %v12353_v23  ;;  %v12360_v29 = vld [vmem:[%s20577_s3 + $0x1f0] sm:$0xff] }
 0x512   :  { %v12289_v31 = vpop.f32.mrb[132].mxu1 }
 0x513   :  { %v15609_v33 = vpop.f32.mrb[133].mxu1 }
 0x514   :  { %v12292_v35 = vpop.f32.mrb[134].mxu1  ;;  %v14102_v33 = vcombine.low %v12348_v20, %v12352_v21 }
 0x515   :  { %v15610_v36 = vpop.f32.mrb[135].mxu1  ;;  %v14104_v35 = vcombine.low %v12349_v22, %v12353_v23 }
 0x516   :  { %v14111_v36 = vcombine.high %v12356_v28, %v12360_v29 }
 0x519   :  { %v15582_v37 = vpop.f32.mrb[132].mxu0 }
 0x51a   :  { %v15583_v38 = vpop.f32.mrb[133].mxu0 }
 0x51b   :  { %v15584_v39 = vadd.f32 %v15583_v38, %v15582_v37  ;;  %v15585_v40 = vpop.f32.mrb[134].mxu0  ;;  %v14110_v38 = vcombine.low %v12356_v28, %v12360_v29 }
 0x51c   :  { %v15586_v42 = vpop.f32.mrb[135].mxu0 }
 0x51d   :  { %v12250_v43 = vadd.f32 %v15584_v39, %v12210_v30  ;;  %v12357_v30 = vld [vmem:[%s20577_s3 + $0x1d8] sm:$0xff] }
 0x51f   :  { %v12290_v44 = vadd.f32 %v12289_v31, %v12250_v43  ;;  %v12361_v31 = vld [vmem:[%s20577_s3 + $0x1f8] sm:$0xff] }
 0x520   :  { %v14113_v37 = vcombine.high %v12357_v30, %v12361_v31  ;;  %v14112_v39 = vcombine.low %v12357_v30, %v12361_v31 }
 0x521   :  { %v12295_v48 = vmax.f32 %v12290_v44, 0.0 }
 0x523   :  { %v20449_v49 = vpack.c.bf16 %v12295_v48, %v12295_v48  ;;  %12296 = vst [vmem:[#allocation2] sm:$0x3] %v12295_v48 }
 0x525   :  { %12757 = vmatmul.mubr.bf16.vlgmr.msra.gmra.mrb[136].mxu1 %v20449_v49  ;;  %12798 = vmatmul.mubr.bf16.vlgmr.msra.gmra.mrb[136].mxu0 %v20449_v49 }
 0x526   :  { %12807 = vmatpush1.bf16.msra.mxu1 %v14054_v55  ;;  %12848 = vmatpush1.bf16.msra.mxu0 %v14056_v56  ;;  %v14079_v55 = vcombine.high %v12324_v3, %v12328_v4  ;;  %v14081_v56 = vcombine.high %v12325_v50, %v12329_v51 }
 0x527   :  { %12808 = vmatprep.subr.bf16.mxu1 %v14063_v53  ;;  %12849 = vmatprep.subr.bf16.mxu0 %v14065_v57 }
 0x528   :  { %12838 = vmatprep.mubr.bf16.mxu1 %v16780_v58  ;;  %12879 = vmatprep.mubr.bf16.mxu0 %v16780_v58  ;;  %v12333_v58 = vld [vmem:[%s20577_s3 + $0x118] sm:$0xff]  ;;  %s16781_s3 = smov [#allocation2]  }
 0x529   :  { %v14089_v11 = vcombine.high %v12333_v58, %v12337_v7  ;;  %v14088_v17 = vcombine.low %v12333_v58, %v12337_v7  ;;  %s12948_s11 = sshll.u32 %s16781_s3, 4  ;;  %s12949_s11 = int_to_ptr.vmem [resolvable:$true] %s12948_s11 }
 0x52a   :  { %12809 = vmatpush1.bf16.msra.mxu1 %v14062_v63  ;;  %12850 = vmatpush1.bf16.msra.mxu0 %v14064_v0  ;;  %s16729_s12 = scalar_lea.vmem %s12949_s11, 32  ;;  %p16734_p1 = scmp.lt.s32.totalorder %s12949_s11, %s12949_s11 }
 0x52b   :  { %12810 = vmatprep.subr.bf16.mxu1 %v14071_v1  ;;  %12851 = vmatprep.subr.bf16.mxu0 %v14073_v2  ;;  %p16730_p0 = scmp.ne.s32.totalorder %s12949_s11, %s16729_s12  ;;  %p16735_p2 = scmp.lt.s32.totalorder %s16729_s12, %s16729_s12 }
 0x52d   :  { %p16736_p3 = por %p16735_p2, %p16734_p1 }
 0x52e   :  { %12811 = vmatpush1.bf16.msra.mxu1 %v14070_v52  ;;  %12852 = vmatpush1.bf16.msra.mxu0 %v14072_v54 }
 0x52f   :  { %12812 = vmatprep.subr.bf16.mxu1 %v14079_v55  ;;  %12853 = vmatprep.subr.bf16.mxu0 %v14081_v56  ;;  %p16737_p4 = pnand %p16736_p3, %p16730_p0 }
 0x532   :  { %12813 = vmatpush1.bf16.msra.mxu1 %v14078_v8  ;;  %12854 = vmatpush1.bf16.msra.mxu0 %v14080_v9 }
 0x533   :  { %12814 = vmatprep.subr.bf16.mxu1 %v14087_v10  ;;  %12855 = vmatprep.subr.bf16.mxu0 %v14089_v11 }
 0x536   :  { %12815 = vmatpush1.bf16.msra.mxu1 %v14086_v16  ;;  %12856 = vmatpush1.bf16.msra.mxu0 %v14088_v17 }
 0x537   :  { %12816 = vmatprep.subr.bf16.mxu1 %v14095_v18  ;;  %12857 = vmatprep.subr.bf16.mxu0 %v14097_v19 }
 0x53a   :  { %12817 = vmatpush1.bf16.msra.mxu1 %v14094_v24  ;;  %12858 = vmatpush1.bf16.msra.mxu0 %v14096_v25 }
 0x53b   :  { %12818 = vmatprep.subr.bf16.mxu1 %v14103_v26  ;;  %12859 = vmatprep.subr.bf16.mxu0 %v14105_v27 }
 0x53e   :  { %12819 = vmatpush1.bf16.msra.mxu1 %v14102_v33  ;;  %12860 = vmatpush1.bf16.msra.mxu0 %v14104_v35 }
 0x53f   :  { %12820 = vmatprep.subr.bf16.mxu1 %v14111_v36  ;;  %12861 = vmatprep.subr.bf16.mxu0 %v14113_v37 }
 0x542   :  { %12821 = vmatpush1.bf16.msra.mxu1 %v14110_v38  ;;  %12862 = vmatpush1.bf16.msra.mxu0 %v14112_v39 }
 0x545   :  { %12839 = vmatmul.mubr.bf16.vlgmr.msra.gmra.mrb[140].mxu1 %v20449_v49  ;;  %12880 = vmatmul.mubr.bf16.vlgmr.msra.gmra.mrb[140].mxu0 %v20449_v49 }
 0x546   :  { %16740 = shalt.err (!%p16737_p4)
}
 0x547   :  { %s16741_s14 = scalar_lea.hbm %s20579_s5, 32 }
 0x548   :  { %p16742_p5 = scmp.ne.s32.totalorder %s20579_s5, %s16741_s14  ;;  %p16745_p6 = scmp.lt.u32.totalorder %s16741_s14, %s20579_s5 }
 0x54a   :  { %p16747_p7 = pnand %p16745_p6, %p16742_p5 }
 0x54c   :  { %16750 = shalt.err (!%p16747_p7)
}
 0x54d   :  { %12951 = dma.vmem_to_hbm [thread:$0]  %s12949_s11, 32, %s20579_s5, [#allocation3]   ;;  %v12366_v40 = vsub.s32 0, %v16911_v32  ;;  %v12374_v42 = vsub.s32 2, %v16911_v32  ;;  %v12362_v43 = vld [vmem:[%s20578_s4] sm:$0xff]  ;;  %v12370_v44 = vsub.s32 1, %v16911_v32 }
 0x54e   :  { %v12378_v34 = vsub.s32 3, %v16911_v32  ;;  %v12382_v58 = vsub.s32 4, %v16911_v32  ;;  %v12390_v7 = vsub.s32 6, %v16911_v32  ;;  %v12386_v8 = vsub.s32 5, %v16911_v32  ;;  %s16782_s4 = smov [#allocation4]  }
 0x54f   :  { %v12367_v45 = vrot.slane %v12362_v43, %v12366_v40  ;;  %v12375_v46 = vrot.slane %v12362_v43, %v12374_v42  ;;  %v12371_v47 = vrot.slane %v12362_v43, %v12370_v44  ;;  %v12394_v9 = vsub.s32 7, %v16911_v32  ;;  %s12958_s5 = sshll.u32 %s16782_s4, 4  ;;  %s12959_s5 = int_to_ptr.vmem [resolvable:$true] %s12958_s5 }
 0x550   :  { %v12379_v48 = vrot.slane %v12362_v43, %v12378_v34  ;;  %v12383_v10 = vrot.slane %v12362_v43, %v12382_v58  ;;  %v12391_v11 = vrot.slane %v12362_v43, %v12390_v7  ;;  %v12387_v12 = vrot.slane %v12362_v43, %v12386_v8  ;;  %s16751_s22 = scalar_lea.vmem %s12959_s5, 256  ;;  %p16756_p9 = scmp.lt.s32.totalorder %s12959_s5, %s12959_s5 }
 0x551   :  { %v12395_v13 = vrot.slane %v12362_v43, %v12394_v9  ;;  %p16752_p8 = scmp.ne.s32.totalorder %s12959_s5, %s16751_s22  ;;  %p16757_p10 = scmp.lt.s32.totalorder %s16751_s22, %s16751_s22 }
 0x553   :  { %p16758_p11 = por %p16757_p10, %p16756_p9 }
 0x555   :  { %p16759_p12 = pnand %p16758_p11, %p16752_p8 }
 0x5f8   :  { %v12758_v49 = vpop.f32.mrb[136].mxu1  ;;  %v12799_v53 = vpop.f32.mrb[136].mxu0 }
 0x5f9   :  { %v12759_v57 = vadd.f32 %v12758_v49, %v12367_v45  ;;  %v12800_v59 = vadd.f32 %v12799_v53, %v12375_v46  ;;  %v12760_v60 = vpop.f32.mrb[137].mxu1  ;;  %v12801_v61 = vpop.f32.mrb[137].mxu0 }
 0x5fa   :  { %v12761_v62 = vadd.f32 %v12760_v60, %v12371_v47  ;;  %v12802_v63 = vadd.f32 %v12801_v61, %v12379_v48  ;;  %v12762_v0 = vpop.f32.mrb[138].mxu1  ;;  %v12803_v1 = vpop.f32.mrb[138].mxu0 }
 0x5fb   :  { %v12888_v2 = vmax.f32 %v12759_v57, 0.0  ;;  %v12890_v3 = vmax.f32 %v12800_v59, 0.0  ;;  %v12763_v4 = vpop.f32.mrb[139].mxu1  ;;  %v12804_v50 = vpop.f32.mrb[139].mxu0 }
 0x5fc   :  { %v12889_v51 = vmax.f32 %v12761_v62, 0.0  ;;  %v12891_v52 = vmax.f32 %v12802_v63, 0.0 }
 0x5fe   :  { %v12904_v54 = vcombine.low %v12888_v2, %v12889_v51  ;;  %v12905_v55 = vcombine.low %v12890_v3, %v12891_v52 }
 0x600   :  { %v12912_v56 = vrot.slane %v12904_v54, %v16926_v41  ;;  %v12919_v5 = vrot.slane %v12905_v55, %v16926_v41 }
 0x602   :  { %v12920_v6 = vcombine.low %v12912_v56, %v12919_v5 }
 0x604   :  { %12940 = vst [vmem:[#allocation4] sm:$0xff] %v12920_v6 }
 0x618   :  { %v12840_v14 = vpop.f32.mrb[140].mxu1  ;;  %v12881_v15 = vpop.f32.mrb[140].mxu0 }
 0x619   :  { %v12841_v16 = vadd.f32 %v12840_v14, %v12383_v10  ;;  %v12882_v17 = vadd.f32 %v12881_v15, %v12391_v11  ;;  %v12842_v18 = vpop.f32.mrb[141].mxu1  ;;  %v12883_v19 = vpop.f32.mrb[141].mxu0 }
 0x61a   :  { %v12843_v20 = vadd.f32 %v12842_v18, %v12387_v12  ;;  %v12884_v21 = vadd.f32 %v12883_v19, %v12395_v13  ;;  %v12844_v22 = vpop.f32.mrb[142].mxu1  ;;  %v12885_v23 = vpop.f32.mrb[142].mxu0 }
 0x61b   :  { %v12892_v24 = vmax.f32 %v12841_v16, 0.0  ;;  %v12894_v25 = vmax.f32 %v12882_v17, 0.0  ;;  %v12845_v26 = vpop.f32.mrb[143].mxu1  ;;  %v12886_v27 = vpop.f32.mrb[143].mxu0 }
 0x61c   :  { %v12893_v28 = vmax.f32 %v12843_v20, 0.0  ;;  %v12895_v32 = vmax.f32 %v12884_v21, 0.0 }
 0x61e   :  { %v12921_v29 = vcombine.low %v12892_v24, %v12893_v28  ;;  %v12922_v30 = vcombine.low %v12894_v25, %v12895_v32 }
 0x620   :  { %v12929_v31 = vrot.slane %v12921_v29, %v16926_v41  ;;  %v12936_v33 = vrot.slane %v12922_v30, %v16926_v41 }
 0x622   :  { %v12937_v35 = vcombine.low %v12929_v31, %v12936_v33 }
 0x624   :  { %12941 = vst [vmem:[#allocation4 + $0x8] sm:$0xff] %v12937_v35 }
 0x625   :  { %16762 = shalt.err (!%p16759_p12)
}
 0x626   :  { %s16763_s25 = scalar_lea.hbm %s20580_s6, 256 }
 0x627   :  { %p16764_p13 = scmp.ne.s32.totalorder %s20580_s6, %s16763_s25  ;;  %p16767_p0 = scmp.lt.u32.totalorder %s16763_s25, %s20580_s6 }
 0x629   :  { %p16769_p1 = pnand %p16767_p0, %p16764_p13 }
 0x62b   :  { %16772 = shalt.err (!%p16769_p1)
}
 0x62c   :  { %12961 = dma.vmem_to_hbm [thread:$0]  %s12959_s5, 256, %s20580_s6, [#allocation5]  }
 0x62d   :  { %16773 = dma.done.wait [#allocation3], 32  }
 0x62e   :  { %16774 = vsyncadd [#allocation3], 4294967264 }
 0x62f   :  { %16775 = dma.done.wait [#allocation5], 256  }
 0x630   :  { %16776 = vsyncadd [#allocation5], 4294967040 }
 0x631   :  { %12968 = vsyncpa [#allocation3], 1 }
 0x632   :  { %12969 = vsyncpa [#allocation5], 1 }

</bundles_post_ra>
